<compile_context>
chip_gen: v6e
topology: v6e:2x2x1
jax: 0.10.0
libtpu: 0.0.40
codegen_flags: <defaults>
</compile_context>

<pallas_src>
import functools

import jax
import jax.numpy as jnp
import numpy as np
from jax.experimental import pallas as pl
from jax.experimental.pallas import tpu as pltpu

_EPS = 1e-5  # nn.BatchNorm2d default eps
_LANE = 128


# ------------------------------ fused kernel --------------------------------

def _dense_block_kernel(n_layers, growth, H, W, cin_slab, g_slab,
                        x_ref, *refs):
    """Fused DenseBlock forward for ONE image (grid is over the batch).

    x_ref      : (H*W, c_pad)   input in slab layout (padding lanes are zero)
    per layer i (8 refs):
      s1,t1    : (1, p_i)       folded BN1 scale/shift, slab layout (f32)
      w1       : (p_i, 4g)      1x1 conv weight, slab rows     (bf16)
      b1       : (1, 4g)        1x1 conv bias                  (f32)
      s2,t2    : (1, 4g)        folded BN2 scale/shift         (f32)
      w2       : (9*4g, 128)    3x3 conv weight, im2col layout (bf16, N padded)
      b2       : (1, 128)       3x3 conv bias (zero padded)    (f32)
    o_ref      : (H*W, c_pad)   dense-concat state / output, slab layout
    col_ref    : (H*W, 9*4g)    bf16 im2col staging scratch
    """
    R = H * W
    g = growth
    c4 = 4 * g
    layer_refs = refs[:8 * n_layers]
    o_ref = refs[8 * n_layers]
    col_ref = refs[8 * n_layers + 1]

    # Border rows of the im2col buffer must be zero; the interior is fully
    # rewritten every layer.  Re-zero per grid step (scratch is per-core).
    col_ref[...] = jnp.zeros(col_ref.shape, col_ref.dtype)

    # Seed the dense-concat state with the (already slab-padded) input.
    # Single full-width dense store -> also defines every padding lane.
    o_ref[...] = x_ref[...]

    # Column-wrap masks for the row-shifted im2col taps (x == p % W).
    xi = jax.lax.broadcasted_iota(jnp.int32, (R, 1), 0) % W
    mask_l = (xi != 0).astype(jnp.bfloat16)        # kernel dx == 0 (left tap)
    mask_r = (xi != W - 1).astype(jnp.bfloat16)    # kernel dx == 2 (right tap)

    for i in range(n_layers):
        s1, t1, w1, b1, s2, t2, w2f, b2 = layer_refs[8 * i: 8 * (i + 1)]
        p_i = cin_slab + i * g_slab                # lane-aligned prefix width

        # ---- BN1 + ReLU + 1x1 conv (bf16 MXU, f32 acc) + BN2 + ReLU -------
        x = o_ref[:, pl.ds(0, p_i)]                          # (R, p_i) f32
        h = jnp.maximum(x * s1[...] + t1[...], 0.0)
        y = jnp.dot(h.astype(jnp.bfloat16), w1[...],
                    preferred_element_type=jnp.float32) + b1[...]
        h2 = jnp.maximum(y * s2[...] + t2[...], 0.0)         # (R, 4g) f32
        h2b = h2.astype(jnp.bfloat16)

        # ---- 3x3 SAME conv as ONE im2col matmul ----------------------------
        # Tap (dy, dx) of output pixel p is input pixel p + (dy-1)*W + (dx-1);
        # scatter the row-shifted activation into the staging buffer, masking
        # the rows that would wrap across the left/right image edge.
        for dy in range(3):
            for dx in range(3):
                tap = dy * 3 + dx
                off = (dy - 1) * W + (dx - 1)
                lo, hi = max(0, -off), min(R, R - off)       # dest row range
                src = h2b[lo + off: hi + off, :]
                if dx == 0:
                    src = src * mask_l[lo:hi]
                elif dx == 2:
                    src = src * mask_r[lo:hi]
                col_ref[pl.ds(lo, hi - lo), pl.ds(tap * c4, c4)] = src

        out = jnp.dot(col_ref[...], w2f[...],
                      preferred_element_type=jnp.float32) + b2[...]

        # Lane-aligned, lane-dense 128-wide store of this layer's new slab.
        o_ref[:, pl.ds(p_i, g_slab)] = out.astype(o_ref.dtype)


# ------------------------------ host wrapper ---------------------------------

def _round_up(v, m):
    return (v + m - 1) // m * m


def _scatter_to_slabs(a, cin, g, cin_slab, g_slab, n_prev):
    """Scatter rows of `a` (first dim = cin + n_prev*g, dense concat order)
    into the 128-lane-aligned slab layout (first dim = cin_slab + n_prev*g_slab),
    zero-filling the padding rows."""
    zeros = lambda k: jnp.zeros((k,) + a.shape[1:], a.dtype)
    parts = [a[:cin], zeros(cin_slab - cin)]
    for j in range(n_prev):
        s = cin + j * g
        parts += [a[s:s + g], zeros(g_slab - g)]
    return jnp.concatenate(parts, axis=0)


def _dense_block_pallas(x_nchw, params):
    """x_nchw: (B, Cin, H, W) -> (B, Cin + n*g, H, W)."""
    B, cin, H, W = x_nchw.shape
    n_layers = len(params)
    g = params[0]["w2"].shape[3]
    c4 = 4 * g
    R = H * W
    cin_slab = _round_up(cin, _LANE)
    g_slab = _round_up(g, _LANE)
    c_pad = cin_slab + n_layers * g_slab
    c_total = cin + n_layers * g

    # NCHW -> (B, H*W, Cin) channels-last, placed into the slab layout with
    # zeroed padding lanes.
    x_nhwc = jnp.transpose(x_nchw, (0, 2, 3, 1)).reshape(B, R, cin)
    x_slab = jnp.zeros((B, R, c_pad), jnp.float32).at[:, :, :cin].set(x_nhwc)

    def const_spec(shape):
        nd = len(shape)
        return pl.BlockSpec(shape, lambda b, _nd=nd: (0,) * _nd)

    img_spec = pl.BlockSpec((None, R, c_pad), lambda b: (b, 0, 0))

    flat_args = [x_slab]
    in_specs = [img_spec]
    for i, p in enumerate(params):
        s1 = _scatter_to_slabs(p["s1"][0], cin, g, cin_slab, g_slab, i)[None, :]
        t1 = _scatter_to_slabs(p["t1"][0], cin, g, cin_slab, g_slab, i)[None, :]
        w1 = _scatter_to_slabs(p["w1"], cin, g, cin_slab, g_slab, i
                               ).astype(jnp.bfloat16)
        # (3,3,4g,g) -> (9*4g, g) matches the in-kernel tap order (dy,dx,c);
        # pad output columns to a full 128-lane slab (zero cols) -> the conv2
        # matmul directly produces a dense, aligned 128-wide store.
        w2f = p["w2"].reshape(9 * c4, g)
        w2f = jnp.concatenate(
            [w2f, jnp.zeros((9 * c4, g_slab - g), w2f.dtype)], axis=1
        ).astype(jnp.bfloat16)
        b2 = jnp.concatenate(
            [p["b2"], jnp.zeros((1, g_slab - g), p["b2"].dtype)], axis=1)
        for arr in (s1, t1, w1, p["b1"], p["s2"], p["t2"], w2f, b2):
            flat_args.append(arr)
            in_specs.append(const_spec(arr.shape))

    kernel = functools.partial(_dense_block_kernel,
                               n_layers, g, H, W, cin_slab, g_slab)

    # Explicit VMEM budget (v7x: 64 MiB physical / 32 MiB default scoped).
    block_bytes = R * c_pad * 4                       # one (R, c_pad) f32 block
    weight_bytes = sum(int(np.prod(a.shape)) * a.dtype.itemsize
                       for a in flat_args[1:])
    col_bytes = R * 9 * c4 * 2
    est = 4 * block_bytes + 2 * weight_bytes + col_bytes
    vmem_limit = int(min(max(2 * est, 32 << 20), 64 << 20))

    out = pl.pallas_call(
        kernel,
        out_shape=jax.ShapeDtypeStruct((B, R, c_pad), jnp.float32),
        grid_spec=pltpu.PrefetchScalarGridSpec(
            num_scalar_prefetch=0,
            grid=(B,),
            in_specs=in_specs,
            out_specs=img_spec,
            scratch_shapes=[pltpu.VMEM((R, 9 * c4), jnp.bfloat16)],
        ),
        compiler_params=pltpu.CompilerParams(
            dimension_semantics=("parallel",),
            vmem_limit_bytes=vmem_limit),
    )(*flat_args)

    # Dense repack at the JAX level: drop slab padding, back to NCHW.
    pieces = [out[:, :, :cin]]
    for i in range(n_layers):
        off = cin_slab + i * g_slab
        pieces.append(out[:, :, off:off + g])
    y = jnp.concatenate(pieces, axis=-1).reshape(B, H, W, c_total)
    return jnp.transpose(y, (0, 3, 1, 2))


# ----------------------- parameter construction -----------------------------

def _fold_bn(gamma, beta, mean, var):
    scale = gamma / jnp.sqrt(var + _EPS)
    shift = beta - mean * scale
    return scale[None, :], shift[None, :]


def init_bottleneck_params(key, cin, growth):
    c4 = 4 * growth
    k = jax.random.split(key, 12)
    g1 = jax.random.uniform(k[0], (cin,), jnp.float32, 0.5, 1.5)
    b1 = jax.random.normal(k[1], (cin,), jnp.float32) * 0.1
    m1 = jax.random.normal(k[2], (cin,), jnp.float32) * 0.1
    v1 = jax.random.uniform(k[3], (cin,), jnp.float32, 0.5, 1.5)
    g2 = jax.random.uniform(k[4], (c4,), jnp.float32, 0.5, 1.5)
    b2 = jax.random.normal(k[5], (c4,), jnp.float32) * 0.1
    m2 = jax.random.normal(k[6], (c4,), jnp.float32) * 0.1
    v2 = jax.random.uniform(k[7], (c4,), jnp.float32, 0.5, 1.5)
    # conv weights in the layouts the wrapper/kernel consume:
    #   w1: (Cin, 4g)   == torch conv1.weight (4g, Cin, 1, 1) transposed
    #   w2: (3,3,4g,g)  == torch conv2.weight (g, 4g, 3, 3) transposed to HWIO
    w1 = jax.random.normal(k[8], (cin, c4), jnp.float32) / jnp.sqrt(cin)
    bc1 = jax.random.normal(k[9], (c4,), jnp.float32) * 0.05
    w2 = jax.random.normal(k[10], (3, 3, c4, growth), jnp.float32) / jnp.sqrt(9.0 * c4)
    bc2 = jax.random.normal(k[11], (growth,), jnp.float32) * 0.05
    s1, t1 = _fold_bn(g1, b1, m1, v1)
    s2, t2 = _fold_bn(g2, b2, m2, v2)
    return {"s1": s1, "t1": t1, "w1": w1, "b1": bc1[None, :],
            "s2": s2, "t2": t2, "w2": w2, "b2": bc2[None, :]}


def init_dense_block_params(key, in_channels, growth, n):
    params, c = [], in_channels
    keys = jax.random.split(key, n)
    for i in range(n):
        params.append(init_bottleneck_params(keys[i], c, growth))
        c += growth
    return params


# ----------------------------- forward paths --------------------------------

def dense_block_forward(x_nchw, params):
    return _dense_block_pallas(x_nchw, params)


def _bottleneck_ref(x, p):
    h = jnp.maximum(x * p["s1"] + p["t1"], 0.0)
    y = jnp.einsum("bhwc,cd->bhwd", h, p["w1"]) + p["b1"]
    h2 = jnp.maximum(y * p["s2"] + p["t2"], 0.0)
    out = jax.lax.conv_general_dilated(
        h2, p["w2"], window_strides=(1, 1), padding="SAME",
        dimension_numbers=("NHWC", "HWIO", "NHWC")) + p["b2"]
    return jnp.concatenate([x, out], axis=-1)


def dense_block_ref(x_nchw, params):
    x = jnp.transpose(x_nchw, (0, 2, 3, 1))
    for p in params:
        x = _bottleneck_ref(x, p)
    return jnp.transpose(x, (0, 3, 1, 2))


# --------------------------------- main --------------------------------------

if __name__ == "__main__":
    B, Cin, H, W = 2, 16, 8, 8
    growth_rate, n_layers = 8, 3

    key = jax.random.PRNGKey(0)
    kx, kp = jax.random.split(key)
    x_nchw = jax.random.normal(kx, (B, Cin, H, W), jnp.float32)
    params = init_dense_block_params(kp, Cin, growth_rate, n_layers)

    out = dense_block_forward(x_nchw, params)
    out = jax.block_until_ready(out)

    assert out.shape == (B, Cin + n_layers * growth_rate, H, W), out.shape

    ref = jax.block_until_ready(dense_block_ref(x_nchw, params))
    # bf16 MXU operands (f32 accumulation) vs the pure-f32 reference: tolerance
    # loosened slightly relative to an all-f32 kernel.
    np.testing.assert_allclose(np.asarray(out), np.asarray(ref),
                               rtol=2e-2, atol=5e-2)

    print("KERNEL_OK")
</pallas_src>

<mosaic_0001>
module attributes {stable_mosaic.version = 11 : i64} {
  func.func @_dense_block_kernel(%arg0: i32, %arg1: memref<1x64x512xf32, #tpu.memory_space<vmem>>, %arg2: memref<1x128xf32, #tpu.memory_space<vmem>>, %arg3: memref<1x128xf32, #tpu.memory_space<vmem>>, %arg4: memref<128x32xbf16, #tpu.memory_space<vmem>>, %arg5: memref<1x32xf32, #tpu.memory_space<vmem>>, %arg6: memref<1x32xf32, #tpu.memory_space<vmem>>, %arg7: memref<1x32xf32, #tpu.memory_space<vmem>>, %arg8: memref<288x128xbf16, #tpu.memory_space<vmem>>, %arg9: memref<1x128xf32, #tpu.memory_space<vmem>>, %arg10: memref<1x256xf32, #tpu.memory_space<vmem>>, %arg11: memref<1x256xf32, #tpu.memory_space<vmem>>, %arg12: memref<256x32xbf16, #tpu.memory_space<vmem>>, %arg13: memref<1x32xf32, #tpu.memory_space<vmem>>, %arg14: memref<1x32xf32, #tpu.memory_space<vmem>>, %arg15: memref<1x32xf32, #tpu.memory_space<vmem>>, %arg16: memref<288x128xbf16, #tpu.memory_space<vmem>>, %arg17: memref<1x128xf32, #tpu.memory_space<vmem>>, %arg18: memref<1x384xf32, #tpu.memory_space<vmem>>, %arg19: memref<1x384xf32, #tpu.memory_space<vmem>>, %arg20: memref<384x32xbf16, #tpu.memory_space<vmem>>, %arg21: memref<1x32xf32, #tpu.memory_space<vmem>>, %arg22: memref<1x32xf32, #tpu.memory_space<vmem>>, %arg23: memref<1x32xf32, #tpu.memory_space<vmem>>, %arg24: memref<288x128xbf16, #tpu.memory_space<vmem>>, %arg25: memref<1x128xf32, #tpu.memory_space<vmem>>, %arg26: memref<1x64x512xf32, #tpu.memory_space<vmem>>, %arg27: memref<64x288xbf16, #tpu.memory_space<vmem>>) attributes {dimension_semantics = [#tpu.dimension_semantics<parallel>], iteration_bounds = array<i64: 2>, scalar_prefetch = 0 : i64, scratch_operands = 1 : i64, tpu.core_type = #tpu.core_type<tc>, window_params = [{transform_indices = @transform_0, window_bounds = array<i64: 1, 64, 512>}, {pipeline_mode = #tpu.pipeline_mode<synchronous>, transform_indices = @transform_1, window_bounds = array<i64: 1, 128>}, {pipeline_mode = #tpu.pipeline_mode<synchronous>, transform_indices = @transform_2, window_bounds = array<i64: 1, 128>}, {pipeline_mode = #tpu.pipeline_mode<synchronous>, transform_indices = @transform_3, window_bounds = array<i64: 128, 32>}, {pipeline_mode = #tpu.pipeline_mode<synchronous>, transform_indices = @transform_4, window_bounds = array<i64: 1, 32>}, {pipeline_mode = #tpu.pipeline_mode<synchronous>, transform_indices = @transform_5, window_bounds = array<i64: 1, 32>}, {pipeline_mode = #tpu.pipeline_mode<synchronous>, transform_indices = @transform_6, window_bounds = array<i64: 1, 32>}, {pipeline_mode = #tpu.pipeline_mode<synchronous>, transform_indices = @transform_7, window_bounds = array<i64: 288, 128>}, {pipeline_mode = #tpu.pipeline_mode<synchronous>, transform_indices = @transform_8, window_bounds = array<i64: 1, 128>}, {pipeline_mode = #tpu.pipeline_mode<synchronous>, transform_indices = @transform_9, window_bounds = array<i64: 1, 256>}, {pipeline_mode = #tpu.pipeline_mode<synchronous>, transform_indices = @transform_10, window_bounds = array<i64: 1, 256>}, {pipeline_mode = #tpu.pipeline_mode<synchronous>, transform_indices = @transform_11, window_bounds = array<i64: 256, 32>}, {pipeline_mode = #tpu.pipeline_mode<synchronous>, transform_indices = @transform_12, window_bounds = array<i64: 1, 32>}, {pipeline_mode = #tpu.pipeline_mode<synchronous>, transform_indices = @transform_13, window_bounds = array<i64: 1, 32>}, {pipeline_mode = #tpu.pipeline_mode<synchronous>, transform_indices = @transform_14, window_bounds = array<i64: 1, 32>}, {pipeline_mode = #tpu.pipeline_mode<synchronous>, transform_indices = @transform_15, window_bounds = array<i64: 288, 128>}, {pipeline_mode = #tpu.pipeline_mode<synchronous>, transform_indices = @transform_16, window_bounds = array<i64: 1, 128>}, {pipeline_mode = #tpu.pipeline_mode<synchronous>, transform_indices = @transform_17, window_bounds = array<i64: 1, 384>}, {pipeline_mode = #tpu.pipeline_mode<synchronous>, transform_indices = @transform_18, window_bounds = array<i64: 1, 384>}, {pipeline_mode = #tpu.pipeline_mode<synchronous>, transform_indices = @transform_19, window_bounds = array<i64: 384, 32>}, {pipeline_mode = #tpu.pipeline_mode<synchronous>, transform_indices = @transform_20, window_bounds = array<i64: 1, 32>}, {pipeline_mode = #tpu.pipeline_mode<synchronous>, transform_indices = @transform_21, window_bounds = array<i64: 1, 32>}, {pipeline_mode = #tpu.pipeline_mode<synchronous>, transform_indices = @transform_22, window_bounds = array<i64: 1, 32>}, {pipeline_mode = #tpu.pipeline_mode<synchronous>, transform_indices = @transform_23, window_bounds = array<i64: 288, 128>}, {pipeline_mode = #tpu.pipeline_mode<synchronous>, transform_indices = @transform_24, window_bounds = array<i64: 1, 128>}, {transform_indices = @transform_25, window_bounds = array<i64: 1, 64, 512>}]} {
    %cst = arith.constant 0.000000e+00 : bf16
    %0 = vector.broadcast %cst : bf16 to vector<64x288xbf16>
    %c0 = arith.constant 0 : index
    %c0_0 = arith.constant 0 : index
    %1 = vector.load %arg27[%c0, %c0_0] : memref<64x288xbf16, #tpu.memory_space<vmem>>, vector<64x288xbf16>
    tpu.vector_store %arg27[%c0, %c0_0], %0 {strides = array<i32>} : memref<64x288xbf16, #tpu.memory_space<vmem>>, vector<64x288xbf16>,
    %c0_1 = arith.constant 0 : index
    %c0_2 = arith.constant 0 : index
    %c0_3 = arith.constant 0 : index
    %2 = vector.load %arg1[%c0_1, %c0_2, %c0_3] : memref<1x64x512xf32, #tpu.memory_space<vmem>>, vector<1x64x512xf32>
    %3 = vector.shape_cast %2 : vector<1x64x512xf32> to vector<64x512xf32>
    %c0_4 = arith.constant 0 : index
    %c0_5 = arith.constant 0 : index
    %c0_6 = arith.constant 0 : index
    %4 = vector.load %arg26[%c0_4, %c0_5, %c0_6] : memref<1x64x512xf32, #tpu.memory_space<vmem>>, vector<1x64x512xf32>
    %5 = vector.shape_cast %4 : vector<1x64x512xf32> to vector<64x512xf32>
    %6 = vector.shape_cast %3 : vector<64x512xf32> to vector<1x64x512xf32>
    tpu.vector_store %arg26[%c0_4, %c0_5, %c0_6], %6 {strides = array<i32>} : memref<1x64x512xf32, #tpu.memory_space<vmem>>, vector<1x64x512xf32>,
    %7 = tpu.iota {dimensions = array<i32: 0>} : vector<64x1xi32>
    %c8_i32 = arith.constant 8 : i32
    %c0_i32 = arith.constant 0 : i32
    %8 = arith.cmpi eq, %c8_i32, %c0_i32 : i32
    %c1_i32 = arith.constant 1 : i32
    %9 = arith.select %8, %c1_i32, %c8_i32 : i32
    %10 = vector.broadcast %9 : i32 to vector<64x1xi32>
    %11 = arith.remsi %7, %10 : vector<64x1xi32>
    %c0_i32_7 = arith.constant 0 : i32
    %12 = vector.broadcast %c0_i32_7 : i32 to vector<64x1xi32>
    %13 = arith.cmpi ne, %11, %12 : vector<64x1xi32>
    %c0_i32_8 = arith.constant 0 : i32
    %14 = vector.broadcast %c0_i32_8 : i32 to vector<64x1xi32>
    %15 = arith.cmpi slt, %11, %14 : vector<64x1xi32>
    %c0_i32_9 = arith.constant 0 : i32
    %16 = arith.cmpi slt, %9, %c0_i32_9 : i32
    %17 = vector.broadcast %16 : i1 to vector<64x1xi1>
    %18 = vector.broadcast %17 : vector<64x1xi1> to vector<64x1xi1>
    %19 = arith.xori %15, %18 : vector<64x1xi1>
    %20 = arith.andi %19, %13 : vector<64x1xi1>
    %21 = vector.broadcast %9 : i32 to vector<64x1xi32>
    %22 = arith.addi %11, %21 : vector<64x1xi32>
    %23 = arith.select %20, %22, %11 : vector<64x1xi1>, vector<64x1xi32>
    %c0_i32_10 = arith.constant 0 : i32
    %24 = vector.broadcast %c0_i32_10 : i32 to vector<64x1xi32>
    %25 = arith.cmpi ne, %23, %24 : vector<64x1xi32>
    %26 = arith.extui %25 : vector<64x1xi1> to vector<64x1xi32>
    %27 = arith.sitofp %26 : vector<64x1xi32> to vector<64x1xf32>
    %28 = arith.truncf %27 : vector<64x1xf32> to vector<64x1xbf16>
    %c7_i32 = arith.constant 7 : i32
    %29 = vector.broadcast %c7_i32 : i32 to vector<64x1xi32>
    %30 = arith.cmpi ne, %23, %29 : vector<64x1xi32>
    %31 = arith.extui %30 : vector<64x1xi1> to vector<64x1xi32>
    %32 = arith.sitofp %31 : vector<64x1xi32> to vector<64x1xf32>
    %33 = arith.truncf %32 : vector<64x1xf32> to vector<64x1xbf16>
    %c0_11 = arith.constant 0 : index
    %c0_12 = arith.constant 0 : index
    %c0_13 = arith.constant 0 : index
    %34 = vector.load %arg26[%c0_11, %c0_12, %c0_13] : memref<1x64x512xf32, #tpu.memory_space<vmem>>, vector<1x64x128xf32>
    %35 = vector.shape_cast %34 : vector<1x64x128xf32> to vector<64x128xf32>
    %c0_14 = arith.constant 0 : index
    %c0_15 = arith.constant 0 : index
    %36 = vector.load %arg2[%c0_14, %c0_15] : memref<1x128xf32, #tpu.memory_space<vmem>>, vector<1x128xf32>
    %37 = vector.broadcast %36 : vector<1x128xf32> to vector<64x128xf32>
    %38 = arith.mulf %35, %37 : vector<64x128xf32>
    %c0_16 = arith.constant 0 : index
    %c0_17 = arith.constant 0 : index
    %39 = vector.load %arg3[%c0_16, %c0_17] : memref<1x128xf32, #tpu.memory_space<vmem>>, vector<1x128xf32>
    %40 = vector.broadcast %39 : vector<1x128xf32> to vector<64x128xf32>
    %41 = arith.addf %38, %40 : vector<64x128xf32>
    %cst_18 = arith.constant 0.000000e+00 : f32
    %42 = vector.broadcast %cst_18 : f32 to vector<64x128xf32>
    %43 = arith.maximumf %41, %42 : vector<64x128xf32>
    %44 = arith.truncf %43 : vector<64x128xf32> to vector<64x128xbf16>
    %c0_19 = arith.constant 0 : index
    %c0_20 = arith.constant 0 : index
    %45 = vector.load %arg4[%c0_19, %c0_20] : memref<128x32xbf16, #tpu.memory_space<vmem>>, vector<128x32xbf16>
    %cst_21 = arith.constant dense<0.000000e+00> : vector<64x32xf32>
    %46 = tpu.matmul %44, %45, %cst_21 {dimension_numbers = #tpu.dot_dimension_numbers<[1], [0], [0], [1], [0, 0, 1, 1], [], []>} : vector<64x128xbf16>, vector<128x32xbf16>, vector<64x32xf32> -> vector<64x32xf32>
    %c0_22 = arith.constant 0 : index
    %c0_23 = arith.constant 0 : index
    %47 = vector.load %arg5[%c0_22, %c0_23] : memref<1x32xf32, #tpu.memory_space<vmem>>, vector<1x32xf32>
    %48 = vector.broadcast %47 : vector<1x32xf32> to vector<64x32xf32>
    %49 = arith.addf %46, %48 : vector<64x32xf32>
    %c0_24 = arith.constant 0 : index
    %c0_25 = arith.constant 0 : index
    %50 = vector.load %arg6[%c0_24, %c0_25] : memref<1x32xf32, #tpu.memory_space<vmem>>, vector<1x32xf32>
    %51 = vector.broadcast %50 : vector<1x32xf32> to vector<64x32xf32>
    %52 = arith.mulf %49, %51 : vector<64x32xf32>
    %c0_26 = arith.constant 0 : index
    %c0_27 = arith.constant 0 : index
    %53 = vector.load %arg7[%c0_26, %c0_27] : memref<1x32xf32, #tpu.memory_space<vmem>>, vector<1x32xf32>
    %54 = vector.broadcast %53 : vector<1x32xf32> to vector<64x32xf32>
    %55 = arith.addf %52, %54 : vector<64x32xf32>
    %cst_28 = arith.constant 0.000000e+00 : f32
    %56 = vector.broadcast %cst_28 : f32 to vector<64x32xf32>
    %57 = arith.maximumf %55, %56 : vector<64x32xf32>
    %58 = arith.truncf %57 : vector<64x32xf32> to vector<64x32xbf16>
    %59 = vector.extract_strided_slice %58 {offsets = [0, 0], sizes = [55, 32], strides = [1, 1]} : vector<64x32xbf16> to vector<55x32xbf16>
    %60 = vector.extract_strided_slice %28 {offsets = [9, 0], sizes = [55, 1], strides = [1, 1]} : vector<64x1xbf16> to vector<55x1xbf16>
    %61 = vector.broadcast %60 : vector<55x1xbf16> to vector<55x32xbf16>
    %62 = arith.mulf %59, %61 : vector<55x32xbf16>
    %c9 = arith.constant 9 : index
    %c0_29 = arith.constant 0 : index
    %63 = vector.load %arg27[%c9, %c0_29] : memref<64x288xbf16, #tpu.memory_space<vmem>>, vector<55x32xbf16>
    tpu.vector_store %arg27[%c9, %c0_29], %62 {strides = array<i32>} : memref<64x288xbf16, #tpu.memory_space<vmem>>, vector<55x32xbf16>,
    %64 = vector.extract_strided_slice %58 {offsets = [0, 0], sizes = [56, 32], strides = [1, 1]} : vector<64x32xbf16> to vector<56x32xbf16>
    %c8 = arith.constant 8 : index
    %c32 = arith.constant 32 : index
    %65 = vector.load %arg27[%c8, %c32] : memref<64x288xbf16, #tpu.memory_space<vmem>>, vector<56x32xbf16>
    tpu.vector_store %arg27[%c8, %c32], %64 {strides = array<i32>} : memref<64x288xbf16, #tpu.memory_space<vmem>>, vector<56x32xbf16>,
    %66 = vector.extract_strided_slice %58 {offsets = [0, 0], sizes = [57, 32], strides = [1, 1]} : vector<64x32xbf16> to vector<57x32xbf16>
    %67 = vector.extract_strided_slice %33 {offsets = [7, 0], sizes = [57, 1], strides = [1, 1]} : vector<64x1xbf16> to vector<57x1xbf16>
    %68 = vector.broadcast %67 : vector<57x1xbf16> to vector<57x32xbf16>
    %69 = arith.mulf %66, %68 : vector<57x32xbf16>
    %c7 = arith.constant 7 : index
    %c64 = arith.constant 64 : index
    %70 = vector.load %arg27[%c7, %c64] : memref<64x288xbf16, #tpu.memory_space<vmem>>, vector<57x32xbf16>
    tpu.vector_store %arg27[%c7, %c64], %69 {strides = array<i32>} : memref<64x288xbf16, #tpu.memory_space<vmem>>, vector<57x32xbf16>,
    %71 = vector.extract_strided_slice %58 {offsets = [0, 0], sizes = [63, 32], strides = [1, 1]} : vector<64x32xbf16> to vector<63x32xbf16>
    %72 = vector.extract_strided_slice %28 {offsets = [1, 0], sizes = [63, 1], strides = [1, 1]} : vector<64x1xbf16> to vector<63x1xbf16>
    %73 = vector.broadcast %72 : vector<63x1xbf16> to vector<63x32xbf16>
    %74 = arith.mulf %71, %73 : vector<63x32xbf16>
    %c1 = arith.constant 1 : index
    %c96 = arith.constant 96 : index
    %75 = vector.load %arg27[%c1, %c96] : memref<64x288xbf16, #tpu.memory_space<vmem>>, vector<63x32xbf16>
    tpu.vector_store %arg27[%c1, %c96], %74 {strides = array<i32>} : memref<64x288xbf16, #tpu.memory_space<vmem>>, vector<63x32xbf16>,
    %c0_30 = arith.constant 0 : index
    %c128 = arith.constant 128 : index
    %76 = vector.load %arg27[%c0_30, %c128] : memref<64x288xbf16, #tpu.memory_space<vmem>>, vector<64x32xbf16>
    tpu.vector_store %arg27[%c0_30, %c128], %58 {strides = array<i32>} : memref<64x288xbf16, #tpu.memory_space<vmem>>, vector<64x32xbf16>,
    %77 = vector.extract_strided_slice %58 {offsets = [1, 0], sizes = [63, 32], strides = [1, 1]} : vector<64x32xbf16> to vector<63x32xbf16>
    %78 = vector.extract_strided_slice %33 {offsets = [0, 0], sizes = [63, 1], strides = [1, 1]} : vector<64x1xbf16> to vector<63x1xbf16>
    %79 = vector.broadcast %78 : vector<63x1xbf16> to vector<63x32xbf16>
    %80 = arith.mulf %77, %79 : vector<63x32xbf16>
    %c0_31 = arith.constant 0 : index
    %c160 = arith.constant 160 : index
    %81 = vector.load %arg27[%c0_31, %c160] : memref<64x288xbf16, #tpu.memory_space<vmem>>, vector<63x32xbf16>
    tpu.vector_store %arg27[%c0_31, %c160], %80 {strides = array<i32>} : memref<64x288xbf16, #tpu.memory_space<vmem>>, vector<63x32xbf16>,
    %82 = vector.extract_strided_slice %58 {offsets = [7, 0], sizes = [57, 32], strides = [1, 1]} : vector<64x32xbf16> to vector<57x32xbf16>
    %83 = vector.extract_strided_slice %28 {offsets = [0, 0], sizes = [57, 1], strides = [1, 1]} : vector<64x1xbf16> to vector<57x1xbf16>
    %84 = vector.broadcast %83 : vector<57x1xbf16> to vector<57x32xbf16>
    %85 = arith.mulf %82, %84 : vector<57x32xbf16>
    %c0_32 = arith.constant 0 : index
    %c192 = arith.constant 192 : index
    %86 = vector.load %arg27[%c0_32, %c192] : memref<64x288xbf16, #tpu.memory_space<vmem>>, vector<57x32xbf16>
    tpu.vector_store %arg27[%c0_32, %c192], %85 {strides = array<i32>} : memref<64x288xbf16, #tpu.memory_space<vmem>>, vector<57x32xbf16>,
    %87 = vector.extract_strided_slice %58 {offsets = [8, 0], sizes = [56, 32], strides = [1, 1]} : vector<64x32xbf16> to vector<56x32xbf16>
    %c0_33 = arith.constant 0 : index
    %c224 = arith.constant 224 : index
    %88 = vector.load %arg27[%c0_33, %c224] : memref<64x288xbf16, #tpu.memory_space<vmem>>, vector<56x32xbf16>
    tpu.vector_store %arg27[%c0_33, %c224], %87 {strides = array<i32>} : memref<64x288xbf16, #tpu.memory_space<vmem>>, vector<56x32xbf16>,
    %89 = vector.extract_strided_slice %58 {offsets = [9, 0], sizes = [55, 32], strides = [1, 1]} : vector<64x32xbf16> to vector<55x32xbf16>
    %90 = vector.extract_strided_slice %33 {offsets = [0, 0], sizes = [55, 1], strides = [1, 1]} : vector<64x1xbf16> to vector<55x1xbf16>
    %91 = vector.broadcast %90 : vector<55x1xbf16> to vector<55x32xbf16>
    %92 = arith.mulf %89, %91 : vector<55x32xbf16>
    %c0_34 = arith.constant 0 : index
    %c256 = arith.constant 256 : index
    %93 = vector.load %arg27[%c0_34, %c256] : memref<64x288xbf16, #tpu.memory_space<vmem>>, vector<55x32xbf16>
    tpu.vector_store %arg27[%c0_34, %c256], %92 {strides = array<i32>} : memref<64x288xbf16, #tpu.memory_space<vmem>>, vector<55x32xbf16>,
    %c0_35 = arith.constant 0 : index
    %c0_36 = arith.constant 0 : index
    %94 = vector.load %arg27[%c0_35, %c0_36] : memref<64x288xbf16, #tpu.memory_space<vmem>>, vector<64x288xbf16>
    %c0_37 = arith.constant 0 : index
    %c0_38 = arith.constant 0 : index
    %95 = vector.load %arg8[%c0_37, %c0_38] : memref<288x128xbf16, #tpu.memory_space<vmem>>, vector<288x128xbf16>
    %cst_39 = arith.constant dense<0.000000e+00> : vector<64x128xf32>
    %96 = tpu.matmul %94, %95, %cst_39 {dimension_numbers = #tpu.dot_dimension_numbers<[1], [0], [0], [1], [0, 0, 1, 1], [], []>} : vector<64x288xbf16>, vector<288x128xbf16>, vector<64x128xf32> -> vector<64x128xf32>
    %c0_40 = arith.constant 0 : index
    %c0_41 = arith.constant 0 : index
    %97 = vector.load %arg9[%c0_40, %c0_41] : memref<1x128xf32, #tpu.memory_space<vmem>>, vector<1x128xf32>
    %98 = vector.broadcast %97 : vector<1x128xf32> to vector<64x128xf32>
    %99 = arith.addf %96, %98 : vector<64x128xf32>
    %c0_42 = arith.constant 0 : index
    %c0_43 = arith.constant 0 : index
    %c128_44 = arith.constant 128 : index
    %100 = vector.load %arg26[%c0_42, %c0_43, %c128_44] : memref<1x64x512xf32, #tpu.memory_space<vmem>>, vector<1x64x128xf32>
    %101 = vector.shape_cast %100 : vector<1x64x128xf32> to vector<64x128xf32>
    %102 = vector.shape_cast %99 : vector<64x128xf32> to vector<1x64x128xf32>
    tpu.vector_store %arg26[%c0_42, %c0_43, %c128_44], %102 {strides = array<i32>} : memref<1x64x512xf32, #tpu.memory_space<vmem>>, vector<1x64x128xf32>,
    %c0_45 = arith.constant 0 : index
    %c0_46 = arith.constant 0 : index
    %c0_47 = arith.constant 0 : index
    %103 = vector.load %arg26[%c0_45, %c0_46, %c0_47] : memref<1x64x512xf32, #tpu.memory_space<vmem>>, vector<1x64x256xf32>
    %104 = vector.shape_cast %103 : vector<1x64x256xf32> to vector<64x256xf32>
    %c0_48 = arith.constant 0 : index
    %c0_49 = arith.constant 0 : index
    %105 = vector.load %arg10[%c0_48, %c0_49] : memref<1x256xf32, #tpu.memory_space<vmem>>, vector<1x256xf32>
    %106 = vector.broadcast %105 : vector<1x256xf32> to vector<64x256xf32>
    %107 = arith.mulf %104, %106 : vector<64x256xf32>
    %c0_50 = arith.constant 0 : index
    %c0_51 = arith.constant 0 : index
    %108 = vector.load %arg11[%c0_50, %c0_51] : memref<1x256xf32, #tpu.memory_space<vmem>>, vector<1x256xf32>
    %109 = vector.broadcast %108 : vector<1x256xf32> to vector<64x256xf32>
    %110 = arith.addf %107, %109 : vector<64x256xf32>
    %cst_52 = arith.constant 0.000000e+00 : f32
    %111 = vector.broadcast %cst_52 : f32 to vector<64x256xf32>
    %112 = arith.maximumf %110, %111 : vector<64x256xf32>
    %113 = arith.truncf %112 : vector<64x256xf32> to vector<64x256xbf16>
    %c0_53 = arith.constant 0 : index
    %c0_54 = arith.constant 0 : index
    %114 = vector.load %arg12[%c0_53, %c0_54] : memref<256x32xbf16, #tpu.memory_space<vmem>>, vector<256x32xbf16>
    %cst_55 = arith.constant dense<0.000000e+00> : vector<64x32xf32>
    %115 = tpu.matmul %113, %114, %cst_55 {dimension_numbers = #tpu.dot_dimension_numbers<[1], [0], [0], [1], [0, 0, 1, 1], [], []>} : vector<64x256xbf16>, vector<256x32xbf16>, vector<64x32xf32> -> vector<64x32xf32>
    %c0_56 = arith.constant 0 : index
    %c0_57 = arith.constant 0 : index
    %116 = vector.load %arg13[%c0_56, %c0_57] : memref<1x32xf32, #tpu.memory_space<vmem>>, vector<1x32xf32>
    %117 = vector.broadcast %116 : vector<1x32xf32> to vector<64x32xf32>
    %118 = arith.addf %115, %117 : vector<64x32xf32>
    %c0_58 = arith.constant 0 : index
    %c0_59 = arith.constant 0 : index
    %119 = vector.load %arg14[%c0_58, %c0_59] : memref<1x32xf32, #tpu.memory_space<vmem>>, vector<1x32xf32>
    %120 = vector.broadcast %119 : vector<1x32xf32> to vector<64x32xf32>
    %121 = arith.mulf %118, %120 : vector<64x32xf32>
    %c0_60 = arith.constant 0 : index
    %c0_61 = arith.constant 0 : index
    %122 = vector.load %arg15[%c0_60, %c0_61] : memref<1x32xf32, #tpu.memory_space<vmem>>, vector<1x32xf32>
    %123 = vector.broadcast %122 : vector<1x32xf32> to vector<64x32xf32>
    %124 = arith.addf %121, %123 : vector<64x32xf32>
    %cst_62 = arith.constant 0.000000e+00 : f32
    %125 = vector.broadcast %cst_62 : f32 to vector<64x32xf32>
    %126 = arith.maximumf %124, %125 : vector<64x32xf32>
    %127 = arith.truncf %126 : vector<64x32xf32> to vector<64x32xbf16>
    %128 = vector.extract_strided_slice %127 {offsets = [0, 0], sizes = [55, 32], strides = [1, 1]} : vector<64x32xbf16> to vector<55x32xbf16>
    %129 = vector.extract_strided_slice %28 {offsets = [9, 0], sizes = [55, 1], strides = [1, 1]} : vector<64x1xbf16> to vector<55x1xbf16>
    %130 = vector.broadcast %129 : vector<55x1xbf16> to vector<55x32xbf16>
    %131 = arith.mulf %128, %130 : vector<55x32xbf16>
    %c9_63 = arith.constant 9 : index
    %c0_64 = arith.constant 0 : index
    %132 = vector.load %arg27[%c9_63, %c0_64] : memref<64x288xbf16, #tpu.memory_space<vmem>>, vector<55x32xbf16>
    tpu.vector_store %arg27[%c9_63, %c0_64], %131 {strides = array<i32>} : memref<64x288xbf16, #tpu.memory_space<vmem>>, vector<55x32xbf16>,
    %133 = vector.extract_strided_slice %127 {offsets = [0, 0], sizes = [56, 32], strides = [1, 1]} : vector<64x32xbf16> to vector<56x32xbf16>
    %c8_65 = arith.constant 8 : index
    %c32_66 = arith.constant 32 : index
    %134 = vector.load %arg27[%c8_65, %c32_66] : memref<64x288xbf16, #tpu.memory_space<vmem>>, vector<56x32xbf16>
    tpu.vector_store %arg27[%c8_65, %c32_66], %133 {strides = array<i32>} : memref<64x288xbf16, #tpu.memory_space<vmem>>, vector<56x32xbf16>,
    %135 = vector.extract_strided_slice %127 {offsets = [0, 0], sizes = [57, 32], strides = [1, 1]} : vector<64x32xbf16> to vector<57x32xbf16>
    %136 = vector.extract_strided_slice %33 {offsets = [7, 0], sizes = [57, 1], strides = [1, 1]} : vector<64x1xbf16> to vector<57x1xbf16>
    %137 = vector.broadcast %136 : vector<57x1xbf16> to vector<57x32xbf16>
    %138 = arith.mulf %135, %137 : vector<57x32xbf16>
    %c7_67 = arith.constant 7 : index
    %c64_68 = arith.constant 64 : index
    %139 = vector.load %arg27[%c7_67, %c64_68] : memref<64x288xbf16, #tpu.memory_space<vmem>>, vector<57x32xbf16>
    tpu.vector_store %arg27[%c7_67, %c64_68], %138 {strides = array<i32>} : memref<64x288xbf16, #tpu.memory_space<vmem>>, vector<57x32xbf16>,
    %140 = vector.extract_strided_slice %127 {offsets = [0, 0], sizes = [63, 32], strides = [1, 1]} : vector<64x32xbf16> to vector<63x32xbf16>
    %141 = vector.extract_strided_slice %28 {offsets = [1, 0], sizes = [63, 1], strides = [1, 1]} : vector<64x1xbf16> to vector<63x1xbf16>
    %142 = vector.broadcast %141 : vector<63x1xbf16> to vector<63x32xbf16>
    %143 = arith.mulf %140, %142 : vector<63x32xbf16>
    %c1_69 = arith.constant 1 : index
    %c96_70 = arith.constant 96 : index
    %144 = vector.load %arg27[%c1_69, %c96_70] : memref<64x288xbf16, #tpu.memory_space<vmem>>, vector<63x32xbf16>
    tpu.vector_store %arg27[%c1_69, %c96_70], %143 {strides = array<i32>} : memref<64x288xbf16, #tpu.memory_space<vmem>>, vector<63x32xbf16>,
    %c0_71 = arith.constant 0 : index
    %c128_72 = arith.constant 128 : index
    %145 = vector.load %arg27[%c0_71, %c128_72] : memref<64x288xbf16, #tpu.memory_space<vmem>>, vector<64x32xbf16>
    tpu.vector_store %arg27[%c0_71, %c128_72], %127 {strides = array<i32>} : memref<64x288xbf16, #tpu.memory_space<vmem>>, vector<64x32xbf16>,
    %146 = vector.extract_strided_slice %127 {offsets = [1, 0], sizes = [63, 32], strides = [1, 1]} : vector<64x32xbf16> to vector<63x32xbf16>
    %147 = vector.extract_strided_slice %33 {offsets = [0, 0], sizes = [63, 1], strides = [1, 1]} : vector<64x1xbf16> to vector<63x1xbf16>
    %148 = vector.broadcast %147 : vector<63x1xbf16> to vector<63x32xbf16>
    %149 = arith.mulf %146, %148 : vector<63x32xbf16>
    %c0_73 = arith.constant 0 : index
    %c160_74 = arith.constant 160 : index
    %150 = vector.load %arg27[%c0_73, %c160_74] : memref<64x288xbf16, #tpu.memory_space<vmem>>, vector<63x32xbf16>
    tpu.vector_store %arg27[%c0_73, %c160_74], %149 {strides = array<i32>} : memref<64x288xbf16, #tpu.memory_space<vmem>>, vector<63x32xbf16>,
    %151 = vector.extract_strided_slice %127 {offsets = [7, 0], sizes = [57, 32], strides = [1, 1]} : vector<64x32xbf16> to vector<57x32xbf16>
    %152 = vector.extract_strided_slice %28 {offsets = [0, 0], sizes = [57, 1], strides = [1, 1]} : vector<64x1xbf16> to vector<57x1xbf16>
    %153 = vector.broadcast %152 : vector<57x1xbf16> to vector<57x32xbf16>
    %154 = arith.mulf %151, %153 : vector<57x32xbf16>
    %c0_75 = arith.constant 0 : index
    %c192_76 = arith.constant 192 : index
    %155 = vector.load %arg27[%c0_75, %c192_76] : memref<64x288xbf16, #tpu.memory_space<vmem>>, vector<57x32xbf16>
    tpu.vector_store %arg27[%c0_75, %c192_76], %154 {strides = array<i32>} : memref<64x288xbf16, #tpu.memory_space<vmem>>, vector<57x32xbf16>,
    %156 = vector.extract_strided_slice %127 {offsets = [8, 0], sizes = [56, 32], strides = [1, 1]} : vector<64x32xbf16> to vector<56x32xbf16>
    %c0_77 = arith.constant 0 : index
    %c224_78 = arith.constant 224 : index
    %157 = vector.load %arg27[%c0_77, %c224_78] : memref<64x288xbf16, #tpu.memory_space<vmem>>, vector<56x32xbf16>
    tpu.vector_store %arg27[%c0_77, %c224_78], %156 {strides = array<i32>} : memref<64x288xbf16, #tpu.memory_space<vmem>>, vector<56x32xbf16>,
    %158 = vector.extract_strided_slice %127 {offsets = [9, 0], sizes = [55, 32], strides = [1, 1]} : vector<64x32xbf16> to vector<55x32xbf16>
    %159 = vector.extract_strided_slice %33 {offsets = [0, 0], sizes = [55, 1], strides = [1, 1]} : vector<64x1xbf16> to vector<55x1xbf16>
    %160 = vector.broadcast %159 : vector<55x1xbf16> to vector<55x32xbf16>
    %161 = arith.mulf %158, %160 : vector<55x32xbf16>
    %c0_79 = arith.constant 0 : index
    %c256_80 = arith.constant 256 : index
    %162 = vector.load %arg27[%c0_79, %c256_80] : memref<64x288xbf16, #tpu.memory_space<vmem>>, vector<55x32xbf16>
    tpu.vector_store %arg27[%c0_79, %c256_80], %161 {strides = array<i32>} : memref<64x288xbf16, #tpu.memory_space<vmem>>, vector<55x32xbf16>,
    %c0_81 = arith.constant 0 : index
    %c0_82 = arith.constant 0 : index
    %163 = vector.load %arg27[%c0_81, %c0_82] : memref<64x288xbf16, #tpu.memory_space<vmem>>, vector<64x288xbf16>
    %c0_83 = arith.constant 0 : index
    %c0_84 = arith.constant 0 : index
    %164 = vector.load %arg16[%c0_83, %c0_84] : memref<288x128xbf16, #tpu.memory_space<vmem>>, vector<288x128xbf16>
    %cst_85 = arith.constant dense<0.000000e+00> : vector<64x128xf32>
    %165 = tpu.matmul %163, %164, %cst_85 {dimension_numbers = #tpu.dot_dimension_numbers<[1], [0], [0], [1], [0, 0, 1, 1], [], []>} : vector<64x288xbf16>, vector<288x128xbf16>, vector<64x128xf32> -> vector<64x128xf32>
    %c0_86 = arith.constant 0 : index
    %c0_87 = arith.constant 0 : index
    %166 = vector.load %arg17[%c0_86, %c0_87] : memref<1x128xf32, #tpu.memory_space<vmem>>, vector<1x128xf32>
    %167 = vector.broadcast %166 : vector<1x128xf32> to vector<64x128xf32>
    %168 = arith.addf %165, %167 : vector<64x128xf32>
    %c0_88 = arith.constant 0 : index
    %c0_89 = arith.constant 0 : index
    %c256_90 = arith.constant 256 : index
    %169 = vector.load %arg26[%c0_88, %c0_89, %c256_90] : memref<1x64x512xf32, #tpu.memory_space<vmem>>, vector<1x64x128xf32>
    %170 = vector.shape_cast %169 : vector<1x64x128xf32> to vector<64x128xf32>
    %171 = vector.shape_cast %168 : vector<64x128xf32> to vector<1x64x128xf32>
    tpu.vector_store %arg26[%c0_88, %c0_89, %c256_90], %171 {strides = array<i32>} : memref<1x64x512xf32, #tpu.memory_space<vmem>>, vector<1x64x128xf32>,
    %c0_91 = arith.constant 0 : index
    %c0_92 = arith.constant 0 : index
    %c0_93 = arith.constant 0 : index
    %172 = vector.load %arg26[%c0_91, %c0_92, %c0_93] : memref<1x64x512xf32, #tpu.memory_space<vmem>>, vector<1x64x384xf32>
    %173 = vector.shape_cast %172 : vector<1x64x384xf32> to vector<64x384xf32>
    %c0_94 = arith.constant 0 : index
    %c0_95 = arith.constant 0 : index
    %174 = vector.load %arg18[%c0_94, %c0_95] : memref<1x384xf32, #tpu.memory_space<vmem>>, vector<1x384xf32>
    %175 = vector.broadcast %174 : vector<1x384xf32> to vector<64x384xf32>
    %176 = arith.mulf %173, %175 : vector<64x384xf32>
    %c0_96 = arith.constant 0 : index
    %c0_97 = arith.constant 0 : index
    %177 = vector.load %arg19[%c0_96, %c0_97] : memref<1x384xf32, #tpu.memory_space<vmem>>, vector<1x384xf32>
    %178 = vector.broadcast %177 : vector<1x384xf32> to vector<64x384xf32>
    %179 = arith.addf %176, %178 : vector<64x384xf32>
    %cst_98 = arith.constant 0.000000e+00 : f32
    %180 = vector.broadcast %cst_98 : f32 to vector<64x384xf32>
    %181 = arith.maximumf %179, %180 : vector<64x384xf32>
    %182 = arith.truncf %181 : vector<64x384xf32> to vector<64x384xbf16>
    %c0_99 = arith.constant 0 : index
    %c0_100 = arith.constant 0 : index
    %183 = vector.load %arg20[%c0_99, %c0_100] : memref<384x32xbf16, #tpu.memory_space<vmem>>, vector<384x32xbf16>
    %cst_101 = arith.constant dense<0.000000e+00> : vector<64x32xf32>
    %184 = tpu.matmul %182, %183, %cst_101 {dimension_numbers = #tpu.dot_dimension_numbers<[1], [0], [0], [1], [0, 0, 1, 1], [], []>} : vector<64x384xbf16>, vector<384x32xbf16>, vector<64x32xf32> -> vector<64x32xf32>
    %c0_102 = arith.constant 0 : index
    %c0_103 = arith.constant 0 : index
    %185 = vector.load %arg21[%c0_102, %c0_103] : memref<1x32xf32, #tpu.memory_space<vmem>>, vector<1x32xf32>
    %186 = vector.broadcast %185 : vector<1x32xf32> to vector<64x32xf32>
    %187 = arith.addf %184, %186 : vector<64x32xf32>
    %c0_104 = arith.constant 0 : index
    %c0_105 = arith.constant 0 : index
    %188 = vector.load %arg22[%c0_104, %c0_105] : memref<1x32xf32, #tpu.memory_space<vmem>>, vector<1x32xf32>
    %189 = vector.broadcast %188 : vector<1x32xf32> to vector<64x32xf32>
    %190 = arith.mulf %187, %189 : vector<64x32xf32>
    %c0_106 = arith.constant 0 : index
    %c0_107 = arith.constant 0 : index
    %191 = vector.load %arg23[%c0_106, %c0_107] : memref<1x32xf32, #tpu.memory_space<vmem>>, vector<1x32xf32>
    %192 = vector.broadcast %191 : vector<1x32xf32> to vector<64x32xf32>
    %193 = arith.addf %190, %192 : vector<64x32xf32>
    %cst_108 = arith.constant 0.000000e+00 : f32
    %194 = vector.broadcast %cst_108 : f32 to vector<64x32xf32>
    %195 = arith.maximumf %193, %194 : vector<64x32xf32>
    %196 = arith.truncf %195 : vector<64x32xf32> to vector<64x32xbf16>
    %197 = vector.extract_strided_slice %196 {offsets = [0, 0], sizes = [55, 32], strides = [1, 1]} : vector<64x32xbf16> to vector<55x32xbf16>
    %198 = vector.extract_strided_slice %28 {offsets = [9, 0], sizes = [55, 1], strides = [1, 1]} : vector<64x1xbf16> to vector<55x1xbf16>
    %199 = vector.broadcast %198 : vector<55x1xbf16> to vector<55x32xbf16>
    %200 = arith.mulf %197, %199 : vector<55x32xbf16>
    %c9_109 = arith.constant 9 : index
    %c0_110 = arith.constant 0 : index
    %201 = vector.load %arg27[%c9_109, %c0_110] : memref<64x288xbf16, #tpu.memory_space<vmem>>, vector<55x32xbf16>
    tpu.vector_store %arg27[%c9_109, %c0_110], %200 {strides = array<i32>} : memref<64x288xbf16, #tpu.memory_space<vmem>>, vector<55x32xbf16>,
    %202 = vector.extract_strided_slice %196 {offsets = [0, 0], sizes = [56, 32], strides = [1, 1]} : vector<64x32xbf16> to vector<56x32xbf16>
    %c8_111 = arith.constant 8 : index
    %c32_112 = arith.constant 32 : index
    %203 = vector.load %arg27[%c8_111, %c32_112] : memref<64x288xbf16, #tpu.memory_space<vmem>>, vector<56x32xbf16>
    tpu.vector_store %arg27[%c8_111, %c32_112], %202 {strides = array<i32>} : memref<64x288xbf16, #tpu.memory_space<vmem>>, vector<56x32xbf16>,
    %204 = vector.extract_strided_slice %196 {offsets = [0, 0], sizes = [57, 32], strides = [1, 1]} : vector<64x32xbf16> to vector<57x32xbf16>
    %205 = vector.extract_strided_slice %33 {offsets = [7, 0], sizes = [57, 1], strides = [1, 1]} : vector<64x1xbf16> to vector<57x1xbf16>
    %206 = vector.broadcast %205 : vector<57x1xbf16> to vector<57x32xbf16>
    %207 = arith.mulf %204, %206 : vector<57x32xbf16>
    %c7_113 = arith.constant 7 : index
    %c64_114 = arith.constant 64 : index
    %208 = vector.load %arg27[%c7_113, %c64_114] : memref<64x288xbf16, #tpu.memory_space<vmem>>, vector<57x32xbf16>
    tpu.vector_store %arg27[%c7_113, %c64_114], %207 {strides = array<i32>} : memref<64x288xbf16, #tpu.memory_space<vmem>>, vector<57x32xbf16>,
    %209 = vector.extract_strided_slice %196 {offsets = [0, 0], sizes = [63, 32], strides = [1, 1]} : vector<64x32xbf16> to vector<63x32xbf16>
    %210 = vector.extract_strided_slice %28 {offsets = [1, 0], sizes = [63, 1], strides = [1, 1]} : vector<64x1xbf16> to vector<63x1xbf16>
    %211 = vector.broadcast %210 : vector<63x1xbf16> to vector<63x32xbf16>
    %212 = arith.mulf %209, %211 : vector<63x32xbf16>
    %c1_115 = arith.constant 1 : index
    %c96_116 = arith.constant 96 : index
    %213 = vector.load %arg27[%c1_115, %c96_116] : memref<64x288xbf16, #tpu.memory_space<vmem>>, vector<63x32xbf16>
    tpu.vector_store %arg27[%c1_115, %c96_116], %212 {strides = array<i32>} : memref<64x288xbf16, #tpu.memory_space<vmem>>, vector<63x32xbf16>,
    %c0_117 = arith.constant 0 : index
    %c128_118 = arith.constant 128 : index
    %214 = vector.load %arg27[%c0_117, %c128_118] : memref<64x288xbf16, #tpu.memory_space<vmem>>, vector<64x32xbf16>
    tpu.vector_store %arg27[%c0_117, %c128_118], %196 {strides = array<i32>} : memref<64x288xbf16, #tpu.memory_space<vmem>>, vector<64x32xbf16>,
    %215 = vector.extract_strided_slice %196 {offsets = [1, 0], sizes = [63, 32], strides = [1, 1]} : vector<64x32xbf16> to vector<63x32xbf16>
    %216 = vector.extract_strided_slice %33 {offsets = [0, 0], sizes = [63, 1], strides = [1, 1]} : vector<64x1xbf16> to vector<63x1xbf16>
    %217 = vector.broadcast %216 : vector<63x1xbf16> to vector<63x32xbf16>
    %218 = arith.mulf %215, %217 : vector<63x32xbf16>
    %c0_119 = arith.constant 0 : index
    %c160_120 = arith.constant 160 : index
    %219 = vector.load %arg27[%c0_119, %c160_120] : memref<64x288xbf16, #tpu.memory_space<vmem>>, vector<63x32xbf16>
    tpu.vector_store %arg27[%c0_119, %c160_120], %218 {strides = array<i32>} : memref<64x288xbf16, #tpu.memory_space<vmem>>, vector<63x32xbf16>,
    %220 = vector.extract_strided_slice %196 {offsets = [7, 0], sizes = [57, 32], strides = [1, 1]} : vector<64x32xbf16> to vector<57x32xbf16>
    %221 = vector.extract_strided_slice %28 {offsets = [0, 0], sizes = [57, 1], strides = [1, 1]} : vector<64x1xbf16> to vector<57x1xbf16>
    %222 = vector.broadcast %221 : vector<57x1xbf16> to vector<57x32xbf16>
    %223 = arith.mulf %220, %222 : vector<57x32xbf16>
    %c0_121 = arith.constant 0 : index
    %c192_122 = arith.constant 192 : index
    %224 = vector.load %arg27[%c0_121, %c192_122] : memref<64x288xbf16, #tpu.memory_space<vmem>>, vector<57x32xbf16>
    tpu.vector_store %arg27[%c0_121, %c192_122], %223 {strides = array<i32>} : memref<64x288xbf16, #tpu.memory_space<vmem>>, vector<57x32xbf16>,
    %225 = vector.extract_strided_slice %196 {offsets = [8, 0], sizes = [56, 32], strides = [1, 1]} : vector<64x32xbf16> to vector<56x32xbf16>
    %c0_123 = arith.constant 0 : index
    %c224_124 = arith.constant 224 : index
    %226 = vector.load %arg27[%c0_123, %c224_124] : memref<64x288xbf16, #tpu.memory_space<vmem>>, vector<56x32xbf16>
    tpu.vector_store %arg27[%c0_123, %c224_124], %225 {strides = array<i32>} : memref<64x288xbf16, #tpu.memory_space<vmem>>, vector<56x32xbf16>,
    %227 = vector.extract_strided_slice %196 {offsets = [9, 0], sizes = [55, 32], strides = [1, 1]} : vector<64x32xbf16> to vector<55x32xbf16>
    %228 = vector.extract_strided_slice %33 {offsets = [0, 0], sizes = [55, 1], strides = [1, 1]} : vector<64x1xbf16> to vector<55x1xbf16>
    %229 = vector.broadcast %228 : vector<55x1xbf16> to vector<55x32xbf16>
    %230 = arith.mulf %227, %229 : vector<55x32xbf16>
    %c0_125 = arith.constant 0 : index
    %c256_126 = arith.constant 256 : index
    %231 = vector.load %arg27[%c0_125, %c256_126] : memref<64x288xbf16, #tpu.memory_space<vmem>>, vector<55x32xbf16>
    tpu.vector_store %arg27[%c0_125, %c256_126], %230 {strides = array<i32>} : memref<64x288xbf16, #tpu.memory_space<vmem>>, vector<55x32xbf16>,
    %c0_127 = arith.constant 0 : index
    %c0_128 = arith.constant 0 : index
    %232 = vector.load %arg27[%c0_127, %c0_128] : memref<64x288xbf16, #tpu.memory_space<vmem>>, vector<64x288xbf16>
    %c0_129 = arith.constant 0 : index
    %c0_130 = arith.constant 0 : index
    %233 = vector.load %arg24[%c0_129, %c0_130] : memref<288x128xbf16, #tpu.memory_space<vmem>>, vector<288x128xbf16>
    %cst_131 = arith.constant dense<0.000000e+00> : vector<64x128xf32>
    %234 = tpu.matmul %232, %233, %cst_131 {dimension_numbers = #tpu.dot_dimension_numbers<[1], [0], [0], [1], [0, 0, 1, 1], [], []>} : vector<64x288xbf16>, vector<288x128xbf16>, vector<64x128xf32> -> vector<64x128xf32>
    %c0_132 = arith.constant 0 : index
    %c0_133 = arith.constant 0 : index
    %235 = vector.load %arg25[%c0_132, %c0_133] : memref<1x128xf32, #tpu.memory_space<vmem>>, vector<1x128xf32>
    %236 = vector.broadcast %235 : vector<1x128xf32> to vector<64x128xf32>
    %237 = arith.addf %234, %236 : vector<64x128xf32>
    %c0_134 = arith.constant 0 : index
    %c0_135 = arith.constant 0 : index
    %c384 = arith.constant 384 : index
    %238 = vector.load %arg26[%c0_134, %c0_135, %c384] : memref<1x64x512xf32, #tpu.memory_space<vmem>>, vector<1x64x128xf32>
    %239 = vector.shape_cast %238 : vector<1x64x128xf32> to vector<64x128xf32>
    %240 = vector.shape_cast %237 : vector<64x128xf32> to vector<1x64x128xf32>
    tpu.vector_store %arg26[%c0_134, %c0_135, %c384], %240 {strides = array<i32>} : memref<1x64x512xf32, #tpu.memory_space<vmem>>, vector<1x64x128xf32>,
    return
  }
  func.func @transform_0(%arg0: i32) -> (i32, i32, i32) {
    %c0_i32 = arith.constant 0 : i32
    %c0_i32_0 = arith.constant 0 : i32
    %c0_i32_1 = arith.constant 0 : i32
    return %arg0, %c0_i32, %c0_i32_0 : i32, i32, i32
  }
  func.func @transform_1(%arg0: i32) -> (i32, i32) {
    %c0_i32 = arith.constant 0 : i32
    %c0_i32_0 = arith.constant 0 : i32
    %c0_i32_1 = arith.constant 0 : i32
    return %c0_i32, %c0_i32_0 : i32, i32
  }
  func.func @transform_2(%arg0: i32) -> (i32, i32) {
    %c0_i32 = arith.constant 0 : i32
    %c0_i32_0 = arith.constant 0 : i32
    %c0_i32_1 = arith.constant 0 : i32
    return %c0_i32, %c0_i32_0 : i32, i32
  }
  func.func @transform_3(%arg0: i32) -> (i32, i32) {
    %c0_i32 = arith.constant 0 : i32
    %c0_i32_0 = arith.constant 0 : i32
    %c0_i32_1 = arith.constant 0 : i32
    return %c0_i32, %c0_i32_0 : i32, i32
  }
  func.func @transform_4(%arg0: i32) -> (i32, i32) {
    %c0_i32 = arith.constant 0 : i32
    %c0_i32_0 = arith.constant 0 : i32
    %c0_i32_1 = arith.constant 0 : i32
    return %c0_i32, %c0_i32_0 : i32, i32
  }
  func.func @transform_5(%arg0: i32) -> (i32, i32) {
    %c0_i32 = arith.constant 0 : i32
    %c0_i32_0 = arith.constant 0 : i32
    %c0_i32_1 = arith.constant 0 : i32
    return %c0_i32, %c0_i32_0 : i32, i32
  }
  func.func @transform_6(%arg0: i32) -> (i32, i32) {
    %c0_i32 = arith.constant 0 : i32
    %c0_i32_0 = arith.constant 0 : i32
    %c0_i32_1 = arith.constant 0 : i32
    return %c0_i32, %c0_i32_0 : i32, i32
  }
  func.func @transform_7(%arg0: i32) -> (i32, i32) {
    %c0_i32 = arith.constant 0 : i32
    %c0_i32_0 = arith.constant 0 : i32
    %c0_i32_1 = arith.constant 0 : i32
    return %c0_i32, %c0_i32_0 : i32, i32
  }
  func.func @transform_8(%arg0: i32) -> (i32, i32) {
    %c0_i32 = arith.constant 0 : i32
    %c0_i32_0 = arith.constant 0 : i32
    %c0_i32_1 = arith.constant 0 : i32
    return %c0_i32, %c0_i32_0 : i32, i32
  }
  func.func @transform_9(%arg0: i32) -> (i32, i32) {
    %c0_i32 = arith.constant 0 : i32
    %c0_i32_0 = arith.constant 0 : i32
    %c0_i32_1 = arith.constant 0 : i32
    return %c0_i32, %c0_i32_0 : i32, i32
  }
  func.func @transform_10(%arg0: i32) -> (i32, i32) {
    %c0_i32 = arith.constant 0 : i32
    %c0_i32_0 = arith.constant 0 : i32
    %c0_i32_1 = arith.constant 0 : i32
    return %c0_i32, %c0_i32_0 : i32, i32
  }
  func.func @transform_11(%arg0: i32) -> (i32, i32) {
    %c0_i32 = arith.constant 0 : i32
    %c0_i32_0 = arith.constant 0 : i32
    %c0_i32_1 = arith.constant 0 : i32
    return %c0_i32, %c0_i32_0 : i32, i32
  }
  func.func @transform_12(%arg0: i32) -> (i32, i32) {
    %c0_i32 = arith.constant 0 : i32
    %c0_i32_0 = arith.constant 0 : i32
    %c0_i32_1 = arith.constant 0 : i32
    return %c0_i32, %c0_i32_0 : i32, i32
  }
  func.func @transform_13(%arg0: i32) -> (i32, i32) {
    %c0_i32 = arith.constant 0 : i32
    %c0_i32_0 = arith.constant 0 : i32
    %c0_i32_1 = arith.constant 0 : i32
    return %c0_i32, %c0_i32_0 : i32, i32
  }
  func.func @transform_14(%arg0: i32) -> (i32, i32) {
    %c0_i32 = arith.constant 0 : i32
    %c0_i32_0 = arith.constant 0 : i32
    %c0_i32_1 = arith.constant 0 : i32
    return %c0_i32, %c0_i32_0 : i32, i32
  }
  func.func @transform_15(%arg0: i32) -> (i32, i32) {
    %c0_i32 = arith.constant 0 : i32
    %c0_i32_0 = arith.constant 0 : i32
    %c0_i32_1 = arith.constant 0 : i32
    return %c0_i32, %c0_i32_0 : i32, i32
  }
  func.func @transform_16(%arg0: i32) -> (i32, i32) {
    %c0_i32 = arith.constant 0 : i32
    %c0_i32_0 = arith.constant 0 : i32
    %c0_i32_1 = arith.constant 0 : i32
    return %c0_i32, %c0_i32_0 : i32, i32
  }
  func.func @transform_17(%arg0: i32) -> (i32, i32) {
    %c0_i32 = arith.constant 0 : i32
    %c0_i32_0 = arith.constant 0 : i32
    %c0_i32_1 = arith.constant 0 : i32
    return %c0_i32, %c0_i32_0 : i32, i32
  }
  func.func @transform_18(%arg0: i32) -> (i32, i32) {
    %c0_i32 = arith.constant 0 : i32
    %c0_i32_0 = arith.constant 0 : i32
    %c0_i32_1 = arith.constant 0 : i32
    return %c0_i32, %c0_i32_0 : i32, i32
  }
  func.func @transform_19(%arg0: i32) -> (i32, i32) {
    %c0_i32 = arith.constant 0 : i32
    %c0_i32_0 = arith.constant 0 : i32
    %c0_i32_1 = arith.constant 0 : i32
    return %c0_i32, %c0_i32_0 : i32, i32
  }
  func.func @transform_20(%arg0: i32) -> (i32, i32) {
    %c0_i32 = arith.constant 0 : i32
    %c0_i32_0 = arith.constant 0 : i32
    %c0_i32_1 = arith.constant 0 : i32
    return %c0_i32, %c0_i32_0 : i32, i32
  }
  func.func @transform_21(%arg0: i32) -> (i32, i32) {
    %c0_i32 = arith.constant 0 : i32
    %c0_i32_0 = arith.constant 0 : i32
    %c0_i32_1 = arith.constant 0 : i32
    return %c0_i32, %c0_i32_0 : i32, i32
  }
  func.func @transform_22(%arg0: i32) -> (i32, i32) {
    %c0_i32 = arith.constant 0 : i32
    %c0_i32_0 = arith.constant 0 : i32
    %c0_i32_1 = arith.constant 0 : i32
    return %c0_i32, %c0_i32_0 : i32, i32
  }
  func.func @transform_23(%arg0: i32) -> (i32, i32) {
    %c0_i32 = arith.constant 0 : i32
    %c0_i32_0 = arith.constant 0 : i32
    %c0_i32_1 = arith.constant 0 : i32
    return %c0_i32, %c0_i32_0 : i32, i32
  }
  func.func @transform_24(%arg0: i32) -> (i32, i32) {
    %c0_i32 = arith.constant 0 : i32
    %c0_i32_0 = arith.constant 0 : i32
    %c0_i32_1 = arith.constant 0 : i32
    return %c0_i32, %c0_i32_0 : i32, i32
  }
  func.func @transform_25(%arg0: i32) -> (i32, i32, i32) {
    %c0_i32 = arith.constant 0 : i32
    %c0_i32_0 = arith.constant 0 : i32
    %c0_i32_1 = arith.constant 0 : i32
    return %arg0, %c0_i32, %c0_i32_0 : i32, i32, i32
  }
}

</mosaic_0001>

<bundles_post_ra>
// kernel: tpu_custom_call.1
= control target key start
LH: loop header
LB: loop body
LE: loop exit
PB: predicated region body
PF: predicated region fallthrough
CT: control target
= control target key end

     0   :  { %s9891_s0 = inlined_call_operand.hbm [shape: f32[2,64,512], index: 0, kind: input, shape index: {}]   ;;  %s9892_s1 = inlined_call_operand.hbm [shape: f32[1,128], index: 1, kind: input, shape index: {}]   ;;  %s9893_s2 = inlined_call_operand.hbm [shape: f32[1,128], index: 2, kind: input, shape index: {}]   ;;  %s9894_s3 = inlined_call_operand.vmem [shape: bf16[128,32], index: 3, kind: input, shape index: {}]   ;;  %s9895_s4 = inlined_call_operand.hbm [shape: f32[1,32], index: 4, kind: input, shape index: {}]   ;;  %s9896_s5 = inlined_call_operand.hbm [shape: f32[1,32], index: 5, kind: input, shape index: {}]   ;;  %s9897_s6 = inlined_call_operand.hbm [shape: f32[1,32], index: 6, kind: input, shape index: {}]   ;;  %s9898_s7 = inlined_call_operand.vmem [shape: bf16[288,128], index: 7, kind: input, shape index: {}]   ;;  %s9899_s8 = inlined_call_operand.hbm [shape: f32[1,128], index: 8, kind: input, shape index: {}]   ;;  %s9900_s9 = inlined_call_operand.vmem [shape: f32[1,256], index: 9, kind: input, shape index: {}]   ;;  %s9901_s10 = inlined_call_operand.vmem [shape: f32[1,256], index: 10, kind: input, shape index: {}]   ;;  %s9902_s11 = inlined_call_operand.vmem [shape: bf16[256,32], index: 11, kind: input, shape index: {}]   ;;  %s9903_s12 = inlined_call_operand.vmem [shape: f32[1,32], index: 12, kind: input, shape index: {}]   ;;  %s9904_s13 = inlined_call_operand.vmem [shape: f32[1,32], index: 13, kind: input, shape index: {}]   ;;  %s9905_s14 = inlined_call_operand.vmem [shape: f32[1,32], index: 14, kind: input, shape index: {}]   ;;  %s9906_s15 = inlined_call_operand.vmem [shape: bf16[288,128], index: 15, kind: input, shape index: {}]   ;;  %s9907_s16 = inlined_call_operand.vmem [shape: f32[1,128], index: 16, kind: input, shape index: {}]   ;;  %s9908_s17 = inlined_call_operand.vmem [shape: f32[1,384], index: 17, kind: input, shape index: {}]   ;;  %s9909_s18 = inlined_call_operand.vmem [shape: f32[1,384], index: 18, kind: input, shape index: {}]   ;;  %s9910_s19 = inlined_call_operand.vmem [shape: bf16[384,32], index: 19, kind: input, shape index: {}]   ;;  %s9911_s20 = inlined_call_operand.vmem [shape: f32[1,32], index: 20, kind: input, shape index: {}]   ;;  %s9912_s21 = inlined_call_operand.vmem [shape: f32[1,32], index: 21, kind: input, shape index: {}]   ;;  %s9913_s22 = inlined_call_operand.vmem [shape: f32[1,32], index: 22, kind: input, shape index: {}]   ;;  %s9914_s23 = inlined_call_operand.vmem [shape: bf16[288,128], index: 23, kind: input, shape index: {}]   ;;  %s9915_s24 = inlined_call_operand.vmem [shape: f32[1,128], index: 24, kind: input, shape index: {}]   ;;  %s9916_s25 = inlined_call_operand.hbm [shape: f32[2,64,512], index: 25, kind: output, shape index: {}]  }
   0x1   :  { %9954 = sst [smem:[#allocation39_spill]] %s9891_s0 }
   0x2   :  { %9955 = sst [smem:[#allocation40_spill]] %s9892_s1 }
   0x3   :  { %9956 = sst [smem:[#allocation41_spill]] %s9893_s2 }
   0x4   :  { %9957 = sst [smem:[#allocation42_spill]] %s9894_s3 }
   0x5   :  { %9958 = sst [smem:[#allocation43_spill]] %s9895_s4 }
   0x6   :  { %9959 = sst [smem:[#allocation44_spill]] %s9896_s5 }
   0x7   :  { %9960 = sst [smem:[#allocation45_spill]] %s9897_s6 }
   0x8   :  { %9961 = sst [smem:[#allocation46_spill]] %s9898_s7 }
   0x9   :  { %9962 = sst [smem:[#allocation47_spill]] %s9899_s8 }
   0xa   :  { %9963 = sst [smem:[#allocation48_spill]] %s9900_s9 }
   0xb   :  { %9964 = sst [smem:[#allocation49_spill]] %s9913_s22 }
   0xc   :  { %9965 = sst [smem:[#allocation50_spill]] %s9915_s24 }
   0xd   :  { %9966 = sst [smem:[#allocation51_spill]] %s9916_s25 }
   0xe   :  { %30 = vsyncpa [#allocation4], 0 }
   0xf   :  { %32 = vsyncpa [#allocation4 + $0x1], 0 }
  0x10   :  { %33 = vsyncpa [#allocation7], 0 }
  0x11   :  { %34 = vsyncpa [#allocation10], 0 }
  0x12   :  { %35 = vsyncpa [#allocation13], 0 }
  0x13   :  { %36 = vsyncpa [#allocation5], 0 }
  0x14   :  { %38 = vsyncpa [#allocation5 + $0x1], 0  ;;  %s7437_s29 = smov 0   ;;  %s7439_s2 = smov 0  }
  0x15   :  { %s7441_s6 = smov 0   ;;  %s7443_s30 = smov 0  }
  0x16 LB: > { %9967 = sst [smem:[#allocation21_spill]] %s7277_s29  ;;  %s7291_s7 = smov [#allocation6]   ;;  %s7289_s30 = sphi %s7443_s30, %s10056_s30   ;;  %s7285_s6 = sphi %s7441_s6, %s10058_s6   ;;  %s7281_s2 = sphi %s7439_s2, %s10060_s2   ;;  %s7277_s29 = sphi %s7437_s29, %s10059_s29  }
  0x17   : > { %9968 = sst [smem:[#allocation22_spill]] %s7285_s6  ;;  %s618_s3 = sshll.u32 %s7291_s7, 4  ;;  %s619_s3 = int_to_ptr.vmem [resolvable:$true] %s618_s3 }
  0x18   : > { %9969 = sst [smem:[#allocation23_spill]] %s7289_s30  ;;  %s7458_s26 = sadd.s32 4294967295, %s7289_s30  }
  0x19   : > { %p6054_p0 = scmp.ge.s32.totalorder %s7289_s30, 1  ;;  %p9921_p1 = scmp.eq.s32.totalorder %s7458_s26, 0 }
  0x1a   : > { %p605_p2 = scmp.lt.s32.totalorder %s7289_s30, 3  ;;  %s7292_s8 = smov [#allocation9]  }
  0x1b   : > { %s643_s27 = sshll.u32 %s7292_s8, 4  ;;  %s7293_s4 = smov [#allocation12]   ;;  %s7470_s27 = int_to_ptr.vmem [resolvable:$true] %s643_s27 }
  0x1c   : > { %p7463_p3 = pnand %p6054_p0, %p605_p2  ;;  %s665_s28 = sshll.u32 %s7293_s4, 4  ;;  %s7478_s28 = int_to_ptr.vmem [resolvable:$true] %s665_s28 }
  0x1d   : > { %s7294_s5 = smov [#allocation8]   ;;  %s7040_s8 = scalar_lea.vmem %s619_s3, 16 }
  0x1e   : > { %s9970_s1 = scalar_select %p7463_p3, 1, 0 }
  0x1f   : > { %p6804_p5 = pneg %p7463_p3  ;;  %s7480_s0 = sshll.u32 %s7294_s5, 4  ;;  %s630_s0 = int_to_ptr.vmem [resolvable:$true] %s7480_s0 }
  0x20   : > { %p7041_p8 = scmp.ne.s32.totalorder %s619_s3, %s7040_s8  ;;  %s7047_s4 = scalar_lea.vmem %s619_s3, 32 }
  0x21   : > { %p7474_p6 = pnand %p6804_p5, %p9921_p1  ;;  %p7048_p11 = scmp.lt.s32.totalorder %s619_s3, %s619_s3 }
  0x22   : > { %p7049_p12 = scmp.lt.s32.totalorder %s7047_s4, %s7040_s8 }
  0x23   : > { %p7484_p7 = pneg %p7474_p6 }
  0x24   : > { %p7050_p13 = por %p7049_p12, %p7048_p11 }
  0x25   : > { %p7043_p9 = pnand %p7041_p8, %p7484_p7 }
  0x27   : > { %p7044_p10 = pneg %p7043_p9 }
  0x29   : > { %p7051_p0 = pnand %p7050_p13, %p7044_p10 }
  0x2b   : > { %7054 = shalt.err (!%p7051_p0)
}
  0x2c   : > { %s9973_s24 = sld [smem:[#allocation40_spill]]  ;;  %s7066_s22 = scalar_lea.vmem %s7470_s27, 16 }
  0x2d   : > { %p7067_p2 = scmp.ne.s32.totalorder %s7470_s27, %s7066_s22  ;;  %s7073_s8 = scalar_lea.vmem %s7470_s27, 32 }
  0x2e   : > { %p7074_p9 = scmp.lt.s32.totalorder %s7470_s27, %s7470_s27  ;;  %p7075_p10 = scmp.lt.s32.totalorder %s7073_s8, %s7066_s22 }
  0x2f   : > { %p7069_p5 = pnand %p7067_p2, %p7484_p7 }
  0x30   : > { %p7076_p11 = por %p7075_p10, %p7074_p9 }
  0x31   : > { %p7070_p8 = pneg %p7069_p5 }
  0x32   : > { %6807 = dma.hbm_to_vmem [thread:$0]  (!%p7474_p6), %s9973_s24, 16, %s619_s3, [#allocation7]  }
  0x33   : > { %p7077_p12 = pnand %p7076_p11, %p7070_p8 }
  0x35   : > { %7080 = shalt.err (!%p7077_p12)
}
  0x36   : > { %s9974_s5 = sld [smem:[#allocation43_spill]]  ;;  %s7092_s24 = scalar_lea.vmem %s7478_s28, 16 }
  0x37   : > { %p7093_p13 = scmp.ne.s32.totalorder %s7478_s28, %s7092_s24  ;;  %s7099_s22 = scalar_lea.vmem %s7478_s28, 32 }
  0x38   : > { %p7100_p5 = scmp.lt.s32.totalorder %s7478_s28, %s7478_s28  ;;  %p7101_p8 = scmp.lt.s32.totalorder %s7099_s22, %s7092_s24 }
  0x39   : > { %p7095_p0 = pnand %p7093_p13, %p7484_p7 }
  0x3a   : > { %p7102_p9 = por %p7101_p8, %p7100_p5 }
  0x3b   : > { %p7096_p2 = pneg %p7095_p0 }
  0x3c   : > { %6813 = dma.hbm_to_vmem [thread:$0]  (!%p7474_p6), %s9974_s5, 16, %s7470_s27, [#allocation10]  }
  0x3d   : > { %p7103_p10 = pnand %p7102_p9, %p7096_p2 }
  0x3f   : > { %7106 = shalt.err (!%p7103_p10)
}
  0x40   : > { %s9975_s25 = sld [smem:[#allocation45_spill]]  ;;  %s7295_s27 = smov [#allocation11]  }
  0x41   : > { %s654_s4 = sshll.u32 %s7295_s27, 4  ;;  %s7118_s5 = scalar_lea.vmem %s630_s0, 16  ;;  %s655_s4 = int_to_ptr.vmem [resolvable:$true] %s654_s4 }
  0x42   : > { %p7119_p11 = scmp.ne.s32.totalorder %s630_s0, %s7118_s5  ;;  %s7125_s24 = scalar_lea.vmem %s630_s0, 32 }
  0x43   : > { %p7126_p0 = scmp.lt.s32.totalorder %s630_s0, %s630_s0  ;;  %p7127_p2 = scmp.lt.s32.totalorder %s7125_s24, %s7118_s5 }
  0x44   : > { %p7121_p12 = pnand %p7119_p11, %p7484_p7 }
  0x45   : > { %p7128_p5 = por %p7127_p2, %p7126_p0 }
  0x46   : > { %6819 = dma.hbm_to_vmem [thread:$0]  (!%p7474_p6), %s9975_s25, 16, %s7478_s28, [#allocation13]  }
  0x47   : > { %p7122_p13 = pneg %p7121_p12 }
  0x49   : > { %p7129_p8 = pnand %p7128_p5, %p7122_p13 }
  0x4b   : > { %7132 = shalt.err (!%p7129_p8)
}
  0x4c   : > { %s9976_s8 = sld [smem:[#allocation41_spill]]  ;;  %s7144_s28 = scalar_lea.vmem %s655_s4, 16 }
  0x4d   : > { %p7145_p9 = scmp.ne.s32.totalorder %s655_s4, %s7144_s28  ;;  %s7151_s25 = scalar_lea.vmem %s655_s4, 32 }
  0x4e   : > { %p7152_p12 = scmp.lt.s32.totalorder %s655_s4, %s655_s4  ;;  %p7153_p4 = scmp.lt.s32.totalorder %s7151_s25, %s7144_s28 }
  0x4f   : > { %p7147_p10 = pnand %p7145_p9, %p7484_p7 }
  0x50   : > { %p7154_p1 = por %p7153_p4, %p7152_p12 }
  0x51   : > { %p7148_p11 = pneg %p7147_p10 }
  0x52   : > { %6810 = dma.hbm_to_vmem [thread:$0]  (!%p7474_p6), %s9976_s8, 16, %s630_s0, [#allocation7]  }
  0x53   : > { %p7155_p0 = pnand %p7154_p1, %p7148_p11 }
  0x55   : > { %7158 = shalt.err (!%p7155_p0)
}
  0x56   : > { %s9977_s24 = sld [smem:[#allocation44_spill]]  ;;  %s7296_s0 = smov [#allocation14]  }
  0x57   : > { %s679_s22 = sshll.u32 %s7296_s0, 4  ;;  %s680_s22 = int_to_ptr.vmem [resolvable:$true] %s679_s22 }
  0x58   : > { %s7170_s3 = scalar_lea.vmem %s680_s22, 16  ;;  %s7177_s8 = scalar_lea.vmem %s680_s22, 32 }
  0x59   : > { %p7171_p13 = scmp.ne.s32.totalorder %s680_s22, %s7170_s3  ;;  %p7178_p8 = scmp.lt.s32.totalorder %s680_s22, %s680_s22 }
  0x5a   : > { %p7179_p4 = scmp.lt.s32.totalorder %s7177_s8, %s7170_s3 }
  0x5b   : > { %p7173_p2 = pnand %p7171_p13, %p7484_p7 }
  0x5c   : > { %6816 = dma.hbm_to_vmem [thread:$0]  (!%p7474_p6), %s9977_s24, 16, %s655_s4, [#allocation10]  }
  0x5d   : > { %p7174_p5 = pneg %p7173_p2  ;;  %p7180_p1 = por %p7179_p4, %p7178_p8 }
  0x5f   : > { %p7181_p9 = pnand %p7180_p1, %p7174_p5 }
  0x61   : > { %7184 = shalt.err (!%p7181_p9)
}
  0x62   : > { %s9978_s27 = sld [smem:[#allocation47_spill]]  ;;  %s6053_s7 = sadd.s32 4294967294, %s7289_s30  }
  0x63   : > { %s7545_s9 = sadd.s32 1, %s7289_s30   ;;  %s51_s5 = sadd.s32 1, %s7285_s6 }
  0x64   : > { %9979 = sst [smem:[#allocation24_spill]] %s7545_s9  ;;  %s48_s4 = ssub.s32 %s7289_s30, %s7545_s9 }
  0x65   : > { %p49_p7 = scmp.eq.s32.totalorder %s48_s4, 0  ;;  %p58_p10 = scmp.ne.s32.totalorder %s7285_s6, %s7281_s2 }
  0x66   : > { %p59_p11 = scmp.eq.s32.totalorder %s7289_s30, 0  ;;  %p64_p12 = scmp.ne.s32.totalorder %s7281_s2, %s7277_s29 }
  0x67   : > { %s7556_s24 = scalar_select %p49_p7, %s7285_s6, %s51_s5  }
  0x68   : > { %6822 = dma.hbm_to_vmem [thread:$0]  (!%p7474_p6), %s9978_s27, 16, %s680_s22, [#allocation13]  }
  0x69   : > { %9980 = sst [smem:[#allocation25_spill]] %s7556_s24  ;;  %p7558_p0 = por %p59_p11, %p58_p10 }
  0x6a   : > { %p9982_p13 = scmp.eq.s32.totalorder %s7458_s26, 0  ;;  %p592_p2 = scmp.eq.s32.totalorder %s7458_s26, 1 }
  0x6b   : > { %p598_p5 = scmp.eq.s32.totalorder %s6053_s7, 1  ;;  %p6837_p8 = scmp.lt.s32.totalorder %s7289_s30, 2 }
  0x6c   : > { %p7564_p6 = por %p9982_p13, %p64_p12  ;;  %s738_s3 = sand.u32 1, %s7285_s6  }
  0x6d   : > { %p7571_p4 = por %p592_p2, %p58_p10  ;;  %p7575_p1 = por %p598_p5, %p64_p12 }
  0x6e   : > { %s9983_s22 = scalar_select %p7564_p6, 1, 0 }
  0x6f   : > { %s9984_s8 = scalar_select %p7571_p4, 1, 0 }
  0x70   : > { %s9986_s28 = scalar_select %p7575_p1, 1, 0 }
  0x71   : > { %9985 = sst [smem:[#allocation26_spill]] %s9984_s8  ;;  %s6062_s25 = sshll.u32 %s738_s3, 8 }
  0x72   : > { %9987 = sst [smem:[#allocation27_spill]] %s9986_s28  ;;  %s6424_s27 = sshll.u32 %s7289_s30, 12 }
  0x73   : > { %s9988_s24 = sld [smem:[#allocation39_spill]]  ;;  %s742_s7 = scalar_lea.vmem [#allocation3], %s6062_s25 }
  0x74   : > { %s749_s6 = sshll.u32 %s742_s7, 4  ;;  %p7589_p9 = pnand %p6837_p8, %p7558_p0  ;;  %s7585_s6 = int_to_ptr.vmem [resolvable:$true] %s749_s6 }
  0x75   : > { %s7593_s28 = scalar_lea.sflag [#allocation4], %s738_s3 }
  0x76   : > { %p7187_p10 = pneg %p7589_p9 }
  0x79   : > { %s7583_s9 = scalar_lea.hbm %s9988_s24, %s6424_s27  ;;  %s7190_s25 = scalar_lea.hbm %s9988_s24, 8192 }
  0x7a   : > { %s7185_s30 = scalar_lea.hbm %s7583_s9, 4096  ;;  %p7191_p0 = scmp.lt.s32.totalorder %s7583_s9, %s9988_s24 }
  0x7b   : > { %p7186_p7 = scmp.ne.s32.totalorder %s7583_s9, %s7185_s30  ;;  %p7192_p13 = scmp.lt.s32.totalorder %s7190_s25, %s7185_s30 }
  0x7d   : > { %p7188_p11 = pnand %p7187_p10, %p7186_p7  ;;  %p7193_p2 = por %p7192_p13, %p7191_p0 }
  0x7f   : > { %p7189_p12 = pneg %p7188_p11 }
  0x81   : > { %p7194_p5 = pnand %p7193_p2, %p7189_p12 }
  0x83   : > { %7197 = shalt.err (!%p7194_p5)
}
  0x84   : > { %s7198_s0 = scalar_lea.vmem %s7585_s6, 4096  ;;  %s7297_s3 = smov [#allocation3]  }
  0x85   : > { %p7199_p8 = scmp.ne.s32.totalorder %s7585_s6, %s7198_s0  ;;  %s7203_s8 = sshll.u32 %s7297_s3, 4  ;;  %s7204_s8 = int_to_ptr.vmem [resolvable:$false] %s7203_s8 }
  0x86   : > { %s7205_s27 = scalar_lea.vmem %s7204_s8, 8192  ;;  %p7206_p11 = scmp.lt.s32.totalorder %s7585_s6, %s7204_s8 }
  0x87   : > { %p7201_p1 = pnand %p7199_p8, %p7187_p10  ;;  %p7207_p4 = scmp.lt.s32.totalorder %s7205_s27, %s7198_s0 }
  0x89   : > { %p7202_p7 = pneg %p7201_p1  ;;  %p7208_p6 = por %p7207_p4, %p7206_p11 }
  0x8b   : > { %p7209_p3 = pnand %p7208_p6, %p7202_p7 }
  0x8d   : > { %7212 = shalt.err (!%p7209_p3)
}
  0x8e   : > { %s7298_s30 = smov 512   ;;  %s7299_s4 = smov 32  }
  0x8f   : > { %6826 = dma.hbm_to_vmem [thread:$0]  (!%p7589_p9), %s7583_s9, 4096, %s7585_s6, %s7593_s28, %s7298_s30, %s7298_s30, %s7299_s4  }
  0x90   : > { %p9990_p10 = scmp.ne.s32.totalorder %s9970_s1, 0 }
  0x92   : > { %761 = sbr.rel (%p9990_p10) target bundleno = 2097 (0x831), region = 120 }
  0x97   : > { %s7617_s25 = sand.u32 1, %s7281_s2   ;;  %p9991_p3 = scmp.ne.s32.totalorder %s9983_s22, 0 }
  0x98   : > { %s6066_s8 = sshll.u32 %s7617_s25, 8  ;;  %s764_s5 = scalar_lea.sflag [#allocation4], %s7617_s25 }
  0x99   : > { %s7621_s7 = scalar_lea.vmem [#allocation3], %s6066_s8 }
  0x9a   : > { %7256 = dma.done.wait (%p9991_p3), %s764_s5, 4096  }
  0x9b   : > { %7258 = vsyncadd (%p9991_p3), %s764_s5, 4294963200  ;;  %p9992_p6 = scmp.eq.s32.totalorder %s7458_s26, 0 }
  0x9d   : > { %7260 = dma.done.wait (%p9992_p6), [#allocation7], 32   ;;  %p9993_p4 = pmov %p9992_p6 }
  0x9f   : > { %7262 = vsyncadd (%p9993_p4), [#allocation7], 4294967264  ;;  %p9994_p1 = pmov %p9993_p4 }
  0xa1   : > { %7264 = dma.done.wait (%p9994_p1), [#allocation10], 32   ;;  %p9995_p9 = pmov %p9994_p1 }
  0xa2   : > { %p9996_p12 = pmov %p9994_p1 }
  0xa3   : > { %7266 = vsyncadd (%p9995_p9), [#allocation10], 4294967264 }
  0xa4   : > { %7268 = dma.done.wait (%p9996_p12), [#allocation13], 32   ;;  %p9997_p0 = pmov %p9994_p1 }
  0xa5   : > { %s9998_s1 = sld [smem:[#allocation42_spill]]  ;;  %v876_v4 = vld [vmem:[%s7621_s7] sm:$0xff]  ;;  %s7653_s30 = scalar_lea.vmem [#allocation15], %s6066_s8  ;;  %vm860_vm0 = vcmask 257024   ;;  %v7300_v46 = vmov 0   ;;  %v940_v49 = vlaneseq }
  0xa6   : > { %7270 = vsyncadd (%p9997_p0), [#allocation13], 4294967264  ;;  %v880_v5 = vld [vmem:[%s7621_s7 + $0x20] sm:$0xff]  ;;  %908 = vst [vmem:[%s7653_s30] sm:$0xff] %v876_v4  ;;  %s9999_s3 = sld [smem:[#allocation46_spill]]  ;;  %s9935_s5 = smov 96  }
  0xa7   : > { %v6090_v6 = vld [vmem:[#allocation6] ss:$0 sm:$0xff]  ;;  %912 = vst [vmem:[%s7653_s30 + $0x20] sm:$0xff] %v880_v5  ;;  %v6091_v9 = vld [vmem:[#allocation8] ss:$0 sm:$0xff]  ;;  %859 = vst [vmem:[#allocation2] sm:$0xff] %v7300_v46 }
  0xa8   : > { %v1116_v7 = vmul.f32 %v6090_v6, %v876_v4  ;;  %v1117_v8 = vmul.f32 %v6090_v6, %v880_v5  ;;  %v884_v10 = vld [vmem:[%s7621_s7 + $0x40] sm:$0xff]  ;;  %862 = vst [vmem:[#allocation2 + $0xc] sm:$0xff] %v7300_v46  ;;  %864 = vst [vmem:[#allocation2 + $0x18] sm:$0xff] %v7300_v46  ;;  %v7695_v50 = vshrl.u32 %v940_v49, 7  ;;  %s9951_s8 = smov 32   ;;  %s9933_s29 = smov 64  }
  0xa9   : > { %v888_v11 = vld [vmem:[%s7621_s7 + $0x60] sm:$0xff]  ;;  %916 = vst [vmem:[%s7653_s30 + $0x40] sm:$0xff] %v884_v10  ;;  %v1118_v13 = vmul.f32 %v6090_v6, %v884_v10  ;;  %866 = vst [vmem:[#allocation2 + $0x24] sm:$0xff] %v7300_v46  ;;  %s10027_s28 = sld [smem:[#allocation48_spill]]  ;;  %s10028_s4 = smov 96  }
  0xaa   : > { %920 = vst [vmem:[%s7653_s30 + $0x60] sm:$0xff] %v888_v11  ;;  %v1119_v14 = vmul.f32 %v6090_v6, %v888_v11  ;;  %v892_v15 = vld [vmem:[%s7621_s7 + $0x80] sm:$0xff]  ;;  %v1131_v18 = vadd.f32 %v6091_v9, %v1116_v7  ;;  %v1132_v19 = vadd.f32 %v6091_v9, %v1117_v8  ;;  %868 = vst [vmem:[#allocation2 + $0x30] sm:$0xff] %v7300_v46  ;;  %v942_v51 = vadd.s32 8, %v7695_v50  ;;  %s10045_s6 = sld [smem:[#allocation50_spill]]  ;;  %s6449_s22 = sshll.u32 %s7458_s26, 12 }
  0xab   : > { %v6891_v0 = vld [vmem:[%s9998_s1 + $0x38] sm:$0xff]   ;;  %v6892_v1 = vld [vmem:[%s9998_s1 + $0x30] sm:$0xff]   ;;  %v6893_v2 = vld [vmem:[%s9998_s1 + $0x28] sm:$0xff]   ;;  %924 = vst [vmem:[%s7653_s30 + $0x80] sm:$0xff] %v892_v15  ;;  %v1120_v20 = vmul.f32 %v6090_v6, %v892_v15  ;;  %v1133_v23 = vadd.f32 %v6091_v9, %v1118_v13  ;;  %v943_v52 = vadd.s32 16, %v7695_v50  ;;  %v944_v53 = vadd.s32 24, %v7695_v50 }
  0xac   : > { %6692 = vmatprep.subr.bf16.mxu0 %v6891_v0  ;;  %v6894_v3 = vld [vmem:[%s9998_s1 + $0x20] sm:$0xff]   ;;  %v6895_v12 = vld [vmem:[%s9998_s1 + $0x18] sm:$0xff]   ;;  %v1134_v24 = vadd.f32 %v6091_v9, %v1119_v14  ;;  %v1139_v27 = vmax.f32 %v1131_v18, 0.0  ;;  %v1140_v28 = vmax.f32 %v1132_v19, 0.0  ;;  %v6896_v31 = vld [vmem:[%s9998_s1 + $0x10] sm:$0xff]   ;;  %870 = vst [vmem:[#allocation2 + $0x3c] sm:$0xff] %v7300_v46 }
  0xad   : > { %6693 = vmatpush3.bf16.msra.mxu0 %v6891_v0  ;;  %v896_v16 = vld [vmem:[%s7621_s7 + $0xa0] sm:$0xff]  ;;  %v1135_v29 = vadd.f32 %v6091_v9, %v1120_v20  ;;  %v1141_v32 = vmax.f32 %v1133_v23, 0.0  ;;  %v6897_v41 = vld [vmem:[%s9998_s1 + $0x8] sm:$0xff]   ;;  %872 = vst [vmem:[#allocation2 + $0x48] sm:$0xff] %v7300_v46  ;;  %874 = vst [vmem:[#allocation2 + $0x54] sm:$0xff] %v7300_v46  ;;  %v945_v54 = vadd.s32 32, %v7695_v50 }
  0xae   : > { %6694 = vmatprep.subr.bf16.mxu0 %v6892_v1  ;;  %v900_v17 = vld [vmem:[%s7621_s7 + $0xc0] sm:$0xff]  ;;  %928 = vst [vmem:[%s7653_s30 + $0xa0] sm:$0xff] %v896_v16  ;;  %v1121_v21 = vmul.f32 %v6090_v6, %v896_v16  ;;  %v1142_v33 = vmax.f32 %v1134_v24, 0.0  ;;  %v1147_v36 = vpack.c.bf16 %v1140_v28, %v1139_v27  ;;  %861 = vst.msk [vmem:[#allocation2 + $0x8] sm:$0xf] %vm860_vm0, %v7300_v46  ;;  %v6899_v47 = vld [vmem:[%s9999_s3 + $0x88] sm:$0xff]  }
  0xaf   : > { %v904_v22 = vld [vmem:[%s7621_s7 + $0xe0] sm:$0xff]  ;;  %932 = vst [vmem:[%s7653_s30 + $0xc0] sm:$0xff] %v900_v17  ;;  %v1122_v25 = vmul.f32 %v6090_v6, %v900_v17  ;;  %v1143_v37 = vmax.f32 %v1135_v29, 0.0  ;;  %863 = vst.msk [vmem:[#allocation2 + $0x14] sm:$0xf] %vm860_vm0, %v7300_v46  ;;  %v946_v55 = vadd.s32 40, %v7695_v50 }
  0xb0   : > { %936 = vst [vmem:[%s7653_s30 + $0xe0] sm:$0xff] %v904_v22  ;;  %v1123_v26 = vmul.f32 %v6090_v6, %v904_v22  ;;  %v1136_v30 = vadd.f32 %v6091_v9, %v1121_v21  ;;  %6708 = vmatprep.mubr.bf16.mxu0 %v1147_v36  ;;  %v6898_v42 = vld [vmem:[%s9998_s1] sm:$0xff]   ;;  %v1148_v43 = vpack.c.bf16 %v1142_v33, %v1141_v32  ;;  %865 = vst.msk [vmem:[#allocation2 + $0x20] sm:$0xf] %vm860_vm0, %v7300_v46  ;;  %s10034_s7 = sld [smem:[#allocation49_spill]]  ;;  %s7305_s26 = smov [#allocation15]  }
  0xb1   : > { %6695 = vmatpush3.bf16.msra.mxu0 %v6892_v1  ;;  %v1137_v34 = vadd.f32 %v6091_v9, %v1122_v25  ;;  %867 = vst.msk [vmem:[#allocation2 + $0x2c] sm:$0xf] %vm860_vm0, %v7300_v46  ;;  %869 = vst.msk [vmem:[#allocation2 + $0x38] sm:$0xf] %vm860_vm0, %v7300_v46  ;;  %v6901_v48 = vld [vmem:[%s9999_s3 + $0x80] sm:$0xff]   ;;  %v953_v56 = vand.u32 7, %v7695_v50 }
  0xb2   : > { %6696 = vmatprep.subr.bf16.mxu0 %v6893_v2  ;;  %v1138_v35 = vadd.f32 %v6091_v9, %v1123_v26  ;;  %v1144_v38 = vmax.f32 %v1136_v30, 0.0  ;;  %871 = vst.msk [vmem:[#allocation2 + $0x44] sm:$0xf] %vm860_vm0, %v7300_v46  ;;  %873 = vst.msk [vmem:[#allocation2 + $0x50] sm:$0xf] %vm860_vm0, %v7300_v46  ;;  %v960_v57 = vand.u32 7, %v942_v51 }
  0xb3   : > { %v1145_v39 = vmax.f32 %v1137_v34, 0.0  ;;  %875 = vst.msk [vmem:[#allocation2 + $0x5c] sm:$0xf] %vm860_vm0, %v7300_v46  ;;  %10000 = vst [vmem:[#allocation28_spill] sm:$0xff] %v7695_v50  ;;  %v7704_v58 = vadd.s32 48, %v7695_v50  ;;  %v7707_v59 = vadd.s32 56, %v7695_v50 }
  0xb4   : > { %v1146_v40 = vmax.f32 %v1138_v35, 0.0  ;;  %v1149_v44 = vpack.c.bf16 %v1144_v38, %v1143_v37  ;;  %v967_v60 = vand.u32 7, %v943_v52  ;;  %v974_v61 = vand.u32 7, %v944_v53  ;;  %s10046_s9 = sld [smem:[#allocation26_spill]] }
  0xb5   : > { %6697 = vmatpush3.bf16.msra.mxu0 %v6893_v2  ;;  %v981_v62 = vand.u32 7, %v945_v54  ;;  %v988_v63 = vand.u32 7, %v946_v55  ;;  %vm1073_vm1 = vcmp.ne.s32.totalorder %v953_v56, 7  ;;  %vm1074_vm2 = vcmp.ne.s32.totalorder %v960_v57, 7  ;;  %s10047_s27 = sld [smem:[#allocation51_spill]] }
  0xb6   : > { %6698 = vmatprep.subr.bf16.mxu0 %v6894_v3  ;;  %v1150_v45 = vpack.c.bf16 %v1146_v40, %v1145_v39  ;;  %v995_v0 = vand.u32 7, %v7704_v58  ;;  %v1002_v1 = vand.u32 7, %v7707_v59  ;;  %vm1075_vm3 = vcmp.ne.s32.totalorder %v967_v60, 7  ;;  %v7749_v58 = vld [vmem:[#allocation9] ss:$0 sm:$0xff] }
  0xb7   : > { %vm1076_vm4 = vcmp.ne.s32.totalorder %v974_v61, 7  ;;  %vm1077_vm5 = vcmp.ne.s32.totalorder %v981_v62, 7  ;;  %vm1078_vm6 = vcmp.ne.s32.totalorder %v988_v63, 7  ;;  %v7301_v2 = vmov 0.0  }
  0xb8   : > { %v6083_v4 = vsel %vm1074_vm2, 1.0, %v7301_v2  ;;  %v6084_v5 = vsel %vm1075_vm3, 1.0, %v7301_v2  ;;  %v6085_v6 = vsel %vm1076_vm4, 1.0, %v7301_v2  ;;  %vm1079_vm7 = vcmp.ne.s32.totalorder %v995_v0, 7 }
  0xb9   : > { %6699 = vmatpush3.bf16.msra.mxu0 %v6894_v3  ;;  %v6082_v3 = vsel %vm1073_vm1, 1.0, %v7301_v2  ;;  %vm1080_vm8 = vcmp.ne.s32.totalorder %v1002_v1, 7  ;;  %v6086_v7 = vsel %vm1077_vm5, 1.0, %v7301_v2  ;;  %v6087_v8 = vsel %vm1078_vm6, 1.0, %v7301_v2 }
  0xba   : > { %6700 = vmatprep.subr.bf16.mxu0 %v6895_v12  ;;  %v7711_v9 = vpack.c.bf16 %v6083_v4, %v6082_v3  ;;  %v7713_v10 = vpack.c.bf16 %v6085_v6, %v6084_v5  ;;  %vm1045_vm9 = vcmp.ne.s32.totalorder %v953_v56, 0  ;;  %vm1046_vm10 = vcmp.ne.s32.totalorder %v960_v57, 0  ;;  %p10048_p2 = scmp.ne.s32.totalorder %s10046_s9, 0 }
  0xbb   : > { %v6088_v11 = vsel %vm1079_vm7, 1.0, %v7301_v2  ;;  %vm1047_vm11 = vcmp.ne.s32.totalorder %v967_v60, 0  ;;  %vm1048_vm12 = vcmp.ne.s32.totalorder %v974_v61, 0  ;;  %v7715_v13 = vpack.c.bf16 %v6087_v8, %v6086_v7 }
  0xbc   : > { %v6074_v14 = vsel %vm1045_vm9, 1.0, %v7301_v2  ;;  %v6075_v15 = vsel %vm1046_vm10, 1.0, %v7301_v2  ;;  %v6076_v17 = vsel %vm1047_vm11, 1.0, %v7301_v2  ;;  %v6077_v18 = vsel %vm1048_vm12, 1.0, %v7301_v2 }
  0xbd   : > { %6701 = vmatpush3.bf16.msra.mxu0 %v6895_v12  ;;  %v6089_v12 = vsel %vm1080_vm8, 1.0, %v7301_v2  ;;  %v1523_v19 = vshrl.u32 %v7711_v9, 16  ;;  %v1526_v20 = vshll.u32 %v7711_v9, 16  ;;  %v1531_v21 = vshrl.u32 %v7713_v10, 16 }
  0xbe   : > { %6702 = vmatprep.subr.bf16.mxu0 %v6896_v31  ;;  %v7717_v16 = vpack.c.bf16 %v6089_v12, %v6088_v11  ;;  %v1534_v22 = vshll.u32 %v7713_v10, 16  ;;  %v1540_v23 = vshrl.u32 %v7715_v13, 16  ;;  %v1069_v24 = vpack.c.bf16 %v6075_v15, %v6074_v14  ;;  %v7769_v11 = vld [vmem:[#allocation12] ss:$0 sm:$0xff] }
  0xbf   : > { %v1543_v25 = vshll.u32 %v7715_v13, 16  ;;  %v1070_v26 = vpack.c.bf16 %v6077_v18, %v6076_v17  ;;  %vm1049_vm13 = vcmp.ne.s32.totalorder %v981_v62, 0  ;;  %vm1050_vm14 = vcmp.ne.s32.totalorder %v988_v63, 0 }
  0xc0   : > { %v1549_v27 = vshrl.u32 %v7717_v16, 16  ;;  %v1552_v28 = vshll.u32 %v7717_v16, 16  ;;  %v1525_v29 = vrot.slane %v1523_v19, 3  ;;  %v1528_v30 = vrot.slane %v1526_v20, 4 }
  0xc1   : > { %6703 = vmatpush3.bf16.msra.mxu0 %v6896_v31  ;;  %v1533_v31 = vrot.slane %v1531_v21, 3  ;;  %v1536_v32 = vrot.slane %v1534_v22, 4  ;;  %v1331_v33 = vshrl.u32 %v1069_v24, 16  ;;  %v1334_v34 = vshll.u32 %v1069_v24, 16 }
  0xc2   : > { %6704 = vmatprep.subr.bf16.mxu0 %v6897_v41  ;;  %v6078_v35 = vsel %vm1049_vm13, 1.0, %v7301_v2  ;;  %v6079_v36 = vsel %vm1050_vm14, 1.0, %v7301_v2  ;;  %v1542_v37 = vrot.slane %v1540_v23, 3  ;;  %v1545_v38 = vrot.slane %v1543_v25, 4 }
  0xc3   : > { %v1339_v39 = vshrl.u32 %v1070_v26, 16  ;;  %v1342_v40 = vshll.u32 %v1070_v26, 16  ;;  %vm1051_vm15 = vcmp.ne.s32.totalorder %v995_v0, 0  ;;  %vm1052_vm1 = vcmp.ne.s32.totalorder %v1002_v1, 0  ;;  %v7759_v1 = vld [vmem:[#allocation11] ss:$0 sm:$0xff] }
  0xc4   : > { %v1333_v46 = vrot.slane %v1331_v33, 4  ;;  %v6080_v51 = vsel %vm1051_vm15, 1.0, %v7301_v2  ;;  %v6081_v52 = vsel %vm1052_vm1, 1.0, %v7301_v2  ;;  %vm1521_vm2 = vsmask.f32 4352 }
  0xc5   : > { %6705 = vmatpush3.bf16.msra.mxu0 %v6897_v41  ;;  %v1551_v41 = vrot.slane %v1549_v27, 3  ;;  %v1344_v49 = vrot.slane %v1342_v40, 5  ;;  %v1546_v53 = vor.u32 %v1545_v38, %v1542_v37  ;;  %v1702_v55 = vrot.slane %v1342_v40, 1 }
  0xc6   : > { %6706 = vmatprep.subr.bf16.mxu0 %v6898_v42  ;;  %v1700_v59 = vrot.slane %v1334_v34, 1  ;;  %v7751_v60 = vpack.c.bf16 %v6081_v52, %v6080_v51  ;;  %vm1329_vm3 = vsmask.f32 3328  ;;  %vm1391_vm4 = vsmask.f32 256 }
  0xc7   : > { %v1866_v4 = vrot.slane %v1531_v21, 7  ;;  %v1704_v6 = vor.u32 %v1702_v55, %v1339_v39  ;;  %vm1699_vm5 = vsmask.f32 7424  ;;  %vm1585_vm6 = vsmask.f32 7440  ;;  %vm7945_vm10 = vmand %vm860_vm0, %vm1329_vm3 }
  0xc8   : > { %v1701_v14 = vor.u32 %v1700_v59, %v1331_v33  ;;  %v1357_v17 = vshrl.u32 %v7751_v60, 16  ;;  %v1360_v18 = vshll.u32 %v7751_v60, 16  ;;  %v1872_v33 = vrot.slane %v1549_v27, 7  ;;  %vm7898_vm7 = vmor %vm1329_vm3, %vm1585_vm6 }
  0xc9   : > { %6707 = vmatpush3.bf16.msra.mxu0 %v6898_v42  ;;  %v1554_v42 = vrot.slane %v1552_v28, 4  ;;  %vm1392_vm8 = vsmask.f32 4368  ;;  %vm2511_vm9 = vcmask 261120   ;;  %vm1463_vm12 = vsmask.f32 7938 }
  0xca   : > { %6716 = vmatprep.subr.bf16.mxu0 %v6899_v47  ;;  %vm7955_vm11 = vmor %vm1391_vm4, %vm1392_vm8  ;;  %vm1513_vm14 = vcmask 519424   ;;  %vm1685_vm15 = vcmask 781827   ;;  %vm1686_vm1 = vsmask.f32 7950  ;;  %vm1691_vm8 = vcmask 781824  }
  0xcb   : > { %v7745_v54 = vor.u32 %v1554_v42, %v1551_v41  ;;  %vm8242_vm13 = vmand %vm860_vm0, %vm1463_vm12 }
  0xcc   : > { %6709 = vmatmul.mubr.bf16.vlgmr.msra.gmra.mxu0 %v1148_v43  ;;  %v7741_v43 = vpack.c.bf16 %v6079_v36, %v6078_v35 }
  0xcd   : > { %6712 = vmatprep.mubr.bf16.mxu0 %v1149_v44  ;;  %6717 = vmatpush3.bf16.msra.mxu0 %v6899_v47  ;;  %v7743_v44 = vor.u32 %v1528_v30, %v1525_v29  ;;  %v1336_v47 = vrot.slane %v1334_v34, 5  ;;  %v7766_v3 = vsel %vm1521_vm2, %v1546_v53, %v7745_v54  ;;  %v1864_v30 = vrot.slane %v1523_v19, 7 }
  0xce   : > { %6718 = vmatprep.subr.bf16.mxu0 %v6901_v48  ;;  %v1348_v56 = vshrl.u32 %v7741_v43, 16  ;;  %v1351_v57 = vshll.u32 %v7741_v43, 16  ;;  %v1359_v19 = vrot.slane %v1357_v17, 4 }
  0xcf   : > { %10001 = vst [vmem:[#allocation29_spill] sm:$0xff] %v7743_v44  ;;  %v7757_v62 = vor.u32 %v1336_v47, %v1333_v46  ;;  %v1873_v47 = vor.u32 %v1872_v33, %v1552_v28 }
  0xd0   : > { %v1350_v7 = vrot.slane %v1348_v56, 4  ;;  %v1353_v8 = vrot.slane %v1351_v57, 5  ;;  %v1705_v15 = vrot.slane %v1351_v57, 1 }
  0xd1   : > { %6719 = vmatpush3.bf16.msra.mxu0 %v6901_v48  ;;  %v1341_v48 = vrot.slane %v1339_v39, 4  ;;  %10003 = vst [vmem:[#allocation31_spill] sm:$0xff] %v7757_v62  ;;  %v7791_v39 = vsel %vm1699_vm5, %v1701_v14, %v1702_v55 }
  0xd2   : > { %v1354_v37 = vor.u32 %v1353_v8, %v1350_v7  ;;  %10005 = vst [vmem:[#allocation33_spill] sm:$0xff] %v7791_v39  ;;  %v7794_v10 = vsel %vm1699_vm5, %v1704_v6, %v1705_v15 }
  0xd3   : > { %v1345_v63 = vor.u32 %v1344_v49, %v1341_v48  ;;  %10006 = vst [vmem:[#allocation34_spill] sm:$0xff] %v7794_v10 }
  0xd4   : > { %6713 = vmatmul.mubr.bf16.gmra.mxu0 %v1150_v45  ;;  %v1537_v45 = vor.u32 %v1536_v32, %v1533_v31  ;;  %v1867_v31 = vor.u32 %v1866_v4, %v1534_v22  ;;  %v1869_v32 = vrot.slane %v1540_v23, 7  ;;  %v1362_v22 = vrot.slane %v1360_v18, 5 }
  0xd5   : > { %v7777_v21 = vsel %vm1329_vm3, %v7757_v62, %v1345_v63  ;;  %v7816_v57 = vsel %vm1329_vm3, %v1345_v63, %v1354_v37 }
  0xd6   : > { %v7755_v61 = vsel %vm1521_vm2, %v7743_v44, %v1537_v45  ;;  %v7762_v2 = vsel %vm1521_vm2, %v1537_v45, %v1546_v53  ;;  %10004 = vst [vmem:[#allocation32_spill] sm:$0xff] %v7777_v21  ;;  %v7802_v43 = vsel %vm1391_vm4, %v1864_v30, %v1867_v31  ;;  %v7806_v45 = vor.u32 %v1864_v30, %v1526_v20  ;;  %vm8273_vm2 = vmand %vm1685_vm15, %vm1686_vm1 }
  0xd7   : > { %10002 = vst [vmem:[#allocation30_spill] sm:$0xff] %v7755_v61  ;;  %10007 = vst [vmem:[#allocation35_spill] sm:$0xff] %v7802_v43  ;;  %v1870_v46 = vor.u32 %v1869_v32, %v1543_v25  ;;  %v7818_v9 = vor.u32 %v1362_v22, %v1359_v19  ;;  %v1707_v20 = vor.u32 %v1705_v15, %v1348_v56  ;;  %v1708_v56 = vrot.slane %v1360_v18, 1 }
  0xd8   : > { %10008 = vst [vmem:[#allocation36_spill] sm:$0xff] %v7806_v45 }
  0xd9   : > { %v7826_v63 = vsel %vm1391_vm4, %v1866_v4, %v1870_v46  ;;  %v7839_v4 = vsel %vm1329_vm3, %v1354_v37, %v7818_v9 }
 0x18c   : > { %v6710_v0 = vpop.f32.mrf.mxu0 }
 0x18d   : > { %v1265_v5 = vadd.f32 %v6710_v0, %v7749_v58 }
 0x18e   : > { %v1256_v12 = vpop.f32.mrf.mxu0 }
 0x18f   : > { %v1296_v24 = vmul.f32 %v7759_v1, %v1265_v5  ;;  %v1257_v26 = vadd.f32 %v7749_v58, %v1256_v12  ;;  %v7829_v5 = vsel %vm1391_vm4, %v1869_v32, %v1873_v47 }
 0x190   : > { %v6711_v29 = vpop.f32.mrf.mxu0 }
 0x191   : > { %v1311_v34 = vadd.f32 %v7769_v11, %v1296_v24  ;;  %v1294_v35 = vmul.f32 %v7759_v1, %v1257_v26  ;;  %v1268_v36 = vadd.f32 %v6711_v29, %v7749_v58  ;;  %v7842_v26 = vsel %vm1699_vm5, %v1707_v20, %v1708_v56 }
 0x192   : > { %v1259_v38 = vpop.f32.mrf.mxu0  ;;  %vm1833_vm5 = vcmask 1044224  }
 0x193   : > { %v1319_v23 = vmax.f32 %v1311_v34, 0.0  ;;  %v1309_v27 = vadd.f32 %v7769_v11, %v1294_v35  ;;  %v1297_v40 = vmul.f32 %v7759_v1, %v1268_v36  ;;  %v1260_v41 = vadd.f32 %v7749_v58, %v1259_v38  ;;  %vm8287_vm6 = vmand %vm1833_vm5, %vm1463_vm12 }
 0x194   : > { %v6714_v42 = vpop.f32.mrf.mxu0  ;;  %vm8312_vm12 = vmand %vm1513_vm14, %vm1329_vm3  ;;  %vm2142_vm3 = vcmask 778752  }
 0x195   : > { %v1317_v48 = vmax.f32 %v1309_v27, 0.0  ;;  %v1312_v49 = vadd.f32 %v7769_v11, %v1297_v40  ;;  %v1295_v51 = vmul.f32 %v7759_v1, %v1260_v41  ;;  %v1281_v52 = vadd.f32 %v6714_v42, %v7749_v58  ;;  %vm8339_vm15 = vmand %vm2142_vm3, %vm1391_vm4 }
 0x196   : > { %v1272_v53 = vpop.f32.mrf.mxu0  ;;  %v6427_v55 = vpack.c.bf16 %v1319_v23, %v1319_v23 }
 0x197   : > { %v1320_v13 = vmax.f32 %v1312_v49, 0.0  ;;  %v1310_v25 = vadd.f32 %v7769_v11, %v1295_v51  ;;  %v1300_v16 = vmul.f32 %v7759_v1, %v1281_v52  ;;  %v1273_v28 = vadd.f32 %v7749_v58, %v1272_v53 }
 0x198   : > { %2149 = vrot.lane.b32.xlu0 %v6427_v55, %s9935_s5  ;;  %v6715_v59 = vpop.f32.mrf.mxu0  ;;  %v6425_v0 = vpack.c.bf16 %v1317_v48, %v1317_v48  ;;  %1858 = vst.msk [vmem:[#allocation2 + $0x1c] sm:$0xf] %vm860_vm0, %v6427_v55 }
 0x199   : > { %v7831_v6 = vpack.c.bf16 %v1320_v13, %v1319_v23  ;;  %v1318_v7 = vmax.f32 %v1310_v25, 0.0  ;;  %v1315_v8 = vadd.f32 %v7769_v11, %v1300_v16  ;;  %v1298_v12 = vmul.f32 %v7759_v1, %v1273_v28 }
 0x19a   : > { %v1284_v14 = vadd.f32 %v6715_v59, %v7749_v58  ;;  %v1275_v15 = vpop.f32.mrf.mxu0  ;;  %v6428_v24 = vpack.c.bf16 %v1320_v13, %v1320_v13  ;;  %1856 = vst.msk [vmem:[#allocation2 + $0x4] sm:$0xf] %vm860_vm0, %v6425_v0 }
 0x19b   : > { %v7844_v18 = vpack.c.bf16 %v1318_v7, %v1317_v48  ;;  %v1323_v29 = vmax.f32 %v1315_v8, 0.0  ;;  %v1313_v30 = vadd.f32 %v7769_v11, %v1298_v12  ;;  %v1276_v31 = vadd.f32 %v7749_v58, %v1275_v15 }
 0x19c   : > { %v1301_v32 = vmul.f32 %v7759_v1, %v1284_v14  ;;  %1496 = vrot.lane.b32.xlu0 %v6427_v55, %s9951_s8  ;;  %2151 = vrot.lane.b32.xlu1 %v6428_v24, %s9935_s5  ;;  %v6426_v33 = vpack.c.bf16 %v1318_v7, %v1318_v7  ;;  %v2177_v34 = vmul.bf16 %v7755_v61, %v7831_v6 }
 0x19d   : > { %1859 = vst.msk [vmem:[#allocation2 + $0x28] sm:$0xf] %vm860_vm0, %v6428_v24  ;;  %v2176_v35 = vmul.bf16 %v7743_v44, %v7844_v18  ;;  %v1321_v36 = vmax.f32 %v1313_v30, 0.0  ;;  %v1299_v58 = vmul.f32 %v7759_v1, %v1276_v31  ;;  %v7857_v37 = vpack.c.bf16 %v1323_v29, %v1323_v29 }
 0x19e   : > { %v1316_v38 = vadd.f32 %v7769_v11, %v1301_v32  ;;  %v7862_v19 = vmul.bf16 %v7755_v61, %v7844_v18  ;;  %v6152_v22 = vcombine.low %v2177_v34, %v2177_v34  ;;  %v6153_v23 = vcombine.high %v2177_v34, %v2177_v34  ;;  %1857 = vst.msk [vmem:[#allocation2 + $0x10] sm:$0xf] %vm860_vm0, %v6426_v33 }
 0x19f   : > { %v6151_v27 = vcombine.high %v2176_v35, %v2176_v35  ;;  %v1314_v40 = vadd.f32 %v7769_v11, %v1299_v58  ;;  %v6429_v41 = vpack.c.bf16 %v1321_v36, %v1321_v36  ;;  %1862 = vst.msk [vmem:[#allocation2 + $0x4c] sm:$0xf] %vm860_vm0, %v7857_v37  ;;  %v7870_v1 = vor.u32 %v1708_v56, %v1357_v17 }
 0x1a0   : > { %v7872_v42 = vmax.f32 %v1316_v38, 0.0  ;;  %1498 = vrot.lane.b32.xlu1 %v6428_v24, %s9951_s8  ;;  %1492 = vrot.lane.b32.xlu0 %v6425_v0, %s9951_s8  ;;  %v6117_v46 = vcombine.low %v7862_v19, %v7862_v19  ;;  %v2208_v47 = vshll.u32 %v6152_v22, 16  ;;  %v2212_v48 = vshrl.u32 %v6152_v22, 16 }
 0x1a1   : > { %v2199_v11 = vshrl.u32 %v6151_v27, 16  ;;  %v2202_v49 = vshll.u32 %v6151_v27, 16  ;;  %v1322_v51 = vmax.f32 %v1314_v40, 0.0  ;;  %v2218_v52 = vshll.u32 %v6153_v23, 16  ;;  %1860 = vst.msk [vmem:[#allocation2 + $0x34] sm:$0xf] %vm860_vm0, %v6429_v41 }
 0x1a2   : > { %v7880_v60 = vpack.c.bf16 %v7872_v42, %v1323_v29  ;;  %v1588_v17 = vshll.u32 %v6117_v46, 16  ;;  %v1591_v53 = vshrl.u32 %v6117_v46, 16  ;;  %v2210_v55 = vrot.slane %v2208_v47, 5 }
 0x1a3   : > { %v2201_v20 = vrot.slane %v2199_v11, 4  ;;  %v2204_v13 = vrot.slane %v2202_v49, 5  ;;  %v7882_v25 = vpack.c.bf16 %v1322_v51, %v1321_v36  ;;  %v2214_v16 = vrot.slane %v2212_v48, 4 }
 0x1a4   : > { %2147 = vrot.lane.b32.xlu1 %v6426_v33, %s9935_s5  ;;  %2153 = vrot.lane.b32.xlu0 %v6429_v41, %s9935_s5  ;;  %v7886_v28 = vrot.slane %v1588_v17, 5  ;;  %v7888_v59 = vrot.slane %v1591_v53, 4  ;;  %v2179_v0 = vmul.bf16 %v7766_v3, %v7880_v60  ;;  %v2020_v56 = vmul.bf16 %v7777_v21, %v7831_v6 }
 0x1a5   : > { %v2205_v7 = vor.u32 %v2204_v13, %v2201_v20  ;;  %v2178_v8 = vmul.bf16 %v7762_v2, %v7882_v25  ;;  %v2215_v12 = vor.u32 %v2214_v16, %v2210_v55  ;;  %v2222_v14 = vshrl.u32 %v6153_v23, 16 }
 0x1a6   : > { %v6156_v24 = vcombine.low %v2179_v0, %v2179_v0  ;;  %v6157_v29 = vcombine.high %v2179_v0, %v2179_v0  ;;  %v2220_v30 = vrot.slane %v2218_v52, 5  ;;  %v7902_v31 = vpack.c.bf16 %v1322_v51, %v1322_v51 }
 0x1a7   : > { %v2206_v32 = vrot.slane %v2205_v7, 4  ;;  %v6154_v34 = vcombine.low %v2178_v8, %v2178_v8  ;;  %v6155_v35 = vcombine.high %v2178_v8, %v2178_v8  ;;  %v2216_v36 = vrot.slane %v2215_v12, 4 }
 0x1a8   : > { %1494 = vrot.lane.b32.xlu1 %v6426_v33, %s9951_s8  ;;  %1500 = vrot.lane.b32.xlu0 %v6429_v41, %s9951_s8  ;;  %v2224_v58 = vrot.slane %v2222_v14, 4  ;;  %v2248_v38 = vshll.u32 %v6156_v24, 16  ;;  %v2252_v22 = vshrl.u32 %v6156_v24, 16  ;;  %v2258_v23 = vshll.u32 %v6157_v29, 16  ;;  %1861 = vst.msk [vmem:[#allocation2 + $0x40] sm:$0xf] %vm860_vm0, %v7902_v31 }
 0x1a9   : > { %v2211_v27 = vsel %vm7898_vm7, %v2206_v32, %v2210_v55  ;;  %v2221_v40 = vsel %vm7898_vm7, %v2216_v36, %v2220_v30  ;;  %v2228_v46 = vshll.u32 %v6154_v34, 16  ;;  %v2232_v47 = vshrl.u32 %v6154_v34, 16 }
 0x1aa   : > { %v2225_v48 = vor.u32 %v2224_v58, %v2220_v30  ;;  %v2238_v33 = vshll.u32 %v6155_v35, 16  ;;  %v2242_v11 = vshrl.u32 %v6155_v35, 16  ;;  %v2250_v41 = vrot.slane %v2248_v38, 5  ;;  %2274 = vst.msk [vmem:[#allocation2 + $0x8] sm:$0xf] %vm860_vm0, %v2211_v27  ;;  %v6906_v27 = vld [vmem:[%s9999_s3 + $0x38] sm:$0xff]  }
 0x1ab   : > { %2275 = vst.msk [vmem:[#allocation2 + $0x14] sm:$0xf] %vm860_vm0, %v2221_v40  ;;  %v2230_v49 = vrot.slane %v2228_v46, 5  ;;  %v2234_v51 = vrot.slane %v2232_v47, 4  ;;  %v2254_v52 = vrot.slane %v2252_v22, 4  ;;  %v2260_v17 = vrot.slane %v2258_v23, 5 }
 0x1ac   : > { %2157 = vrot.lane.b32.xlu1 %v7857_v37, %s9935_s5  ;;  %v2226_v53 = vrot.slane %v2225_v48, 4  ;;  %v2240_v55 = vrot.slane %v2238_v33, 5  ;;  %v2244_v20 = vrot.slane %v2242_v11, 4  ;;  %v2262_v13 = vshrl.u32 %v6157_v29, 16  ;;  %1661 = vrot.lane.b32.xlu0 %v7886_v28, %s9933_s29  ;;  %v2281_v38 = vld [vmem:[#allocation2 + $0x50] sm:$0xf] }
 0x1ad   : > { %v2235_v16 = vor.u32 %v2234_v51, %v2230_v49  ;;  %v2255_v0 = vor.u32 %v2254_v52, %v2250_v41  ;;  %v6144_v7 = vcombine.low %v2020_v56, %v2020_v56  ;;  %v6145_v8 = vcombine.high %v2020_v56, %v2020_v56  ;;  %v6905_v23 = vld [vmem:[%s9999_s3 + $0x78] sm:$0xff]  }
 0x1ae   : > { %v2231_v12 = vsel %vm7898_vm7, %v2226_v53, %v2230_v49  ;;  %v2245_v14 = vor.u32 %v2244_v20, %v2240_v55  ;;  %v2264_v24 = vrot.slane %v2262_v13, 4  ;;  %v7922_v30 = vmul.bf16 %v7791_v39, %v7844_v18  ;;  %6462 = vmatprep.subr.bf16.mxu1 %v6905_v23  ;;  %v7001_v48 = vld [vmem:[%s9914_s23 + $0x78] sm:$0xff]  }
 0x1af   : > { %v2236_v32 = vrot.slane %v2235_v16, 4  ;;  %v2256_v34 = vrot.slane %v2255_v0, 4  ;;  %2276 = vst.msk [vmem:[#allocation2 + $0x20] sm:$0xf] %vm860_vm0, %v2231_v12  ;;  %v2058_v29 = vshrl.u32 %v6144_v7, 16  ;;  %v2067_v35 = vshrl.u32 %v6145_v8, 16  ;;  %6463 = vmatpush3.bf16.msra.mxu1 %v6906_v27 }
 0x1b0   : > { %v2246_v36 = vrot.slane %v2245_v14, 4  ;;  %v2265_v58 = vor.u32 %v2264_v24, %v2260_v17  ;;  %1504 = vrot.lane.b32.xlu1 %v7857_v37, %s9951_s8  ;;  %2155 = vrot.lane.b32.xlu0 %v7902_v31, %s9935_s5  ;;  %v2070_v56 = vshll.u32 %v6145_v8, 16  ;;  %v6125_v22 = vcombine.low %v7922_v30, %v7922_v30  ;;  %v6907_v12 = vld [vmem:[%s9999_s3 + $0x70] sm:$0xff]  }
 0x1b1   : > { %v2241_v40 = vsel %vm7898_vm7, %v2236_v32, %v2240_v55  ;;  %v2261_v37 = vsel %vm7898_vm7, %v2256_v34, %v2260_v17  ;;  %v2060_v46 = vrot.slane %v2058_v29, 7  ;;  %v7941_v47 = vrot.slane %v2067_v35, 7  ;;  %v6908_v14 = vld [vmem:[%s9999_s3 + $0x30] sm:$0xff]   ;;  %6464 = vmatprep.subr.bf16.mxu1 %v6907_v12 }
 0x1b2   : > { %v2251_v33 = vsel %vm7898_vm7, %v2246_v36, %v2250_v41  ;;  %v2266_v11 = vrot.slane %v2265_v58, 4  ;;  %2277 = vst.msk [vmem:[#allocation2 + $0x2c] sm:$0xf] %vm860_vm0, %v2241_v40  ;;  %2279 = vst.msk [vmem:[#allocation2 + $0x44] sm:$0xf] %vm860_vm0, %v2261_v37  ;;  %v1740_v52 = vshrl.u32 %v6125_v22, 16  ;;  %v1716_v55 = vmul.bf16 %v7794_v10, %v7831_v6 }
 0x1b3   : > { %v6900_v51 = vld [vmem:[#allocation2 + $0x8] ss:$12 sps:$4 sm:$0xff]   ;;  %v1743_v17 = vshll.u32 %v6125_v22, 16  ;;  %2278 = vst.msk [vmem:[#allocation2 + $0x38] sm:$0xf] %vm860_vm0, %v2251_v33  ;;  %v2065_v53 = vrot.slane %v2060_v46, 4  ;;  %v2072_v41 = vor.u32 %v2070_v56, %v7941_v47  ;;  %v2019_v20 = vmul.bf16 %v7757_v62, %v7844_v18  ;;  %6465 = vmatpush3.bf16.msra.mxu1 %v6908_v14 }
 0x1b4   : > { %v2282_v13 = vsel %vm7945_vm10, %v2266_v11, %v2281_v38  ;;  %1502 = vrot.lane.b32.xlu0 %v7902_v31, %s9951_s8  ;;  %6720 = vmatprep.mubr.msk.bf16.mxu0 %vm2511_vm9, %v6900_v51  ;;  %v7970_v16 = vrot.slane %v1740_v52, 7  ;;  %v2061_v0 = vshll.u32 %v6144_v7, 16  ;;  %v1880_v8 = vmul.bf16 %v7802_v43, %v7831_v6  ;;  %v6909_v33 = vld [vmem:[%s9999_s3 + $0x68] sm:$0xff]  }
 0x1b5   : > { %v2073_v24 = vsel %vm7955_vm11, %v2065_v53, %v2072_v41  ;;  %2283 = vst [vmem:[#allocation2 + $0x50] sm:$0xf] %v2282_v13  ;;  %v7982_v31 = vcombine.low %v1716_v55, %v1716_v55  ;;  %v6128_v32 = vcombine.high %v1716_v55, %v1716_v55  ;;  %v6143_v34 = vcombine.high %v2019_v20, %v2019_v20 }
 0x1b6   : > { %2115 = vrot.lane.b32.xlu1 %v2073_v24, %s9933_s29  ;;  %v1745_v7 = vor.u32 %v1743_v17, %v7970_v16  ;;  %v2063_v29 = vor.u32 %v2061_v0, %v2060_v46  ;;  %v6142_v35 = vcombine.low %v2019_v20, %v2019_v20  ;;  %v6136_v36 = vcombine.low %v1880_v8, %v1880_v8  ;;  %v6910_v46 = vld [vmem:[%s9999_s3 + $0x28] sm:$0xff]  }
 0x1b7   : > { %v1757_v58 = vshrl.u32 %v7982_v31, 16  ;;  %v1766_v56 = vshrl.u32 %v6128_v32, 16  ;;  %v1769_v38 = vshll.u32 %v6128_v32, 16  ;;  %v2049_v22 = vshrl.u32 %v6143_v34, 16  ;;  %6466 = vmatprep.subr.bf16.mxu1 %v6909_v33 }
 0x1b8   : > { %v2044_v23 = vshrl.u32 %v6142_v35, 16  ;;  %v2052_v27 = vshll.u32 %v6143_v34, 16  ;;  %v7987_v40 = vcombine.high %v1880_v8, %v1880_v8  ;;  %v1923_v37 = vshll.u32 %v6136_v36, 16  ;;  %6467 = vmatpush3.bf16.msra.mxu1 %v6910_v46 }
 0x1b9   : > { %v1759_v11 = vrot.slane %v1757_v58, 7  ;;  %v7995_v51 = vrot.slane %v1766_v56, 7  ;;  %v2051_v52 = vrot.slane %v2049_v22, 7  ;;  %v1927_v17 = vshrl.u32 %v6136_v36, 16  ;;  %v6902_v41 = vld [vmem:[#allocation2 + $0x20] ss:$12 sps:$4 sm:$0xff]  }
 0x1ba   : > { %1809 = vrot.lane.b32.xlu1 %v1745_v7, %s9935_s5  ;;  %v6150_v53 = vrot.slane %v2044_v23, 11  ;;  %v7998_v55 = vrot.slane %v1923_v37, 5  ;;  %v6126_v20 = vcombine.high %v7922_v30, %v7922_v30  ;;  %v1562_v13 = vmul.bf16 %v7762_v2, %v7831_v6  ;;  %v6903_v24 = vld [vmem:[#allocation2 + $0x38] ss:$12 sps:$4 sm:$0xff]   ;;  %6721 = vmatmul.mubr.msk.bf16.vlgmr.msra.gmra.mxu0 %vm2511_vm9, %v6902_v41 }
 0x1bb   : > { %v1764_v0 = vrot.slane %v1759_v11, 4  ;;  %v1771_v8 = vor.u32 %v1769_v38, %v7995_v51  ;;  %v2056_v12 = vrot.slane %v2051_v52, 4  ;;  %v2054_v14 = vor.u32 %v2052_v27, %v2051_v52  ;;  %6724 = vmatprep.mubr.msk.bf16.mxu0 %vm2511_vm9, %v6903_v24  ;;  %v6912_v27 = vld [vmem:[%s9999_s3 + $0x20] sm:$0xff]  }
 0x1bc   : > { %v1929_v32 = vrot.slane %v1927_v17, 4  ;;  %v1933_v34 = vshll.u32 %v7987_v40, 16  ;;  %v1746_v7 = vrot.slane %v7970_v16, 4  ;;  %v1748_v35 = vshrl.u32 %v6126_v20, 16 }
 0x1bd   : > { %v1772_v30 = vsel %vm7955_vm11, %v1764_v0, %v1771_v8  ;;  %v2064_v36 = vsel %vm7955_vm11, %v2056_v12, %v2063_v29  ;;  %v2055_v58 = vsel %vm7955_vm11, %v6150_v53, %v2054_v14  ;;  %v1751_v56 = vshll.u32 %v6126_v20, 16  ;;  %v6911_v29 = vld [vmem:[%s9999_s3 + $0x60] sm:$0xff]  }
 0x1be   : > { %1815 = vrot.lane.b32.xlu0 %v1772_v30, %s9935_s5  ;;  %2113 = vrot.lane.b32.xlu1 %v2064_v36, %s9933_s29  ;;  %v1930_v16 = vor.u32 %v1929_v32, %v7998_v55  ;;  %v8018_v38 = vrot.slane %v1933_v34, 5  ;;  %v1750_v22 = vrot.slane %v1748_v35, 7  ;;  %v1760_v23 = vshll.u32 %v7982_v31, 16 }
 0x1bf   : > { %v6119_v37 = vcombine.low %v1562_v13, %v1562_v13  ;;  %v8027_v33 = vcombine.high %v1562_v13, %v1562_v13  ;;  %v1879_v46 = vmul.bf16 %v7806_v45, %v7844_v18  ;;  %v6118_v52 = vcombine.high %v7862_v19, %v7862_v19  ;;  %6468 = vmatprep.subr.bf16.mxu1 %v6911_v29 }
 0x1c0   : > { %v1931_v17 = vrot.slane %v1930_v16, 4  ;;  %v1753_v53 = vor.u32 %v1751_v56, %v1750_v22  ;;  %v1755_v31 = vrot.slane %v1750_v22, 4  ;;  %v1762_v41 = vor.u32 %v1760_v23, %v1759_v11  ;;  %6469 = vmatpush3.bf16.msra.mxu1 %v6912_v27  ;;  %v6904_v11 = vld [vmem:[#allocation2 + $0x50] ss:$12 sps:$4 sm:$0xff]  }
 0x1c1   : > { %v1607_v20 = vshll.u32 %v6119_v37, 16  ;;  %v1611_v0 = vshrl.u32 %v6119_v37, 16  ;;  %v1617_v8 = vshll.u32 %v8027_v33, 16  ;;  %v6134_v12 = vcombine.low %v1879_v46, %v1879_v46 }
 0x1c2   : > { %v1594_v13 = vor.u32 %v7888_v59, %v7886_v28  ;;  %2111 = vrot.lane.b32.xlu0 %v2055_v58, %s9933_s29  ;;  %v1936_v19 = vsel %vm7898_vm7, %v1931_v17, %v8018_v38  ;;  %v1754_v14 = vsel %vm7955_vm11, %v1746_v7, %v1753_v53  ;;  %v6135_v24 = vcombine.high %v1879_v46, %v1879_v46 }
 0x1c3   : > { %1986 = vrot.lane.b32.xlu1 %v1936_v19, %s9951_s8  ;;  %v1763_v32 = vsel %vm7955_vm11, %v1755_v31, %v1762_v41  ;;  %v8045_v34 = vrot.slane %v1607_v20, 5  ;;  %v1613_v35 = vrot.slane %v1611_v0, 4  ;;  %v1904_v28 = vshrl.u32 %v6134_v12, 16  ;;  %6725 = vmatmul.mubr.msk.bf16.gmra.mxu0 %vm2511_vm9, %v6904_v11  ;;  %v6913_v11 = vld [vmem:[%s9999_s3 + $0x58] sm:$0xff]  }
 0x1c4   : > { %v1619_v59 = vrot.slane %v1617_v8, 5  ;;  %v1907_v30 = vshll.u32 %v6134_v12, 16  ;;  %v1913_v36 = vshll.u32 %v6135_v24, 16  ;;  %v1597_v58 = vshll.u32 %v6118_v52, 16  ;;  %6470 = vmatprep.subr.bf16.mxu1 %v6913_v11 }
 0x1c5   : > { %v1614_v56 = vor.u32 %v1613_v35, %v8045_v34  ;;  %v1906_v7 = vrot.slane %v1904_v28, 4  ;;  %v1917_v16 = vshrl.u32 %v6135_v24, 16  ;;  %v8051_v22 = vmul.bf16 %v7826_v63, %v7882_v25 }
 0x1c6   : > { %1811 = vrot.lane.b32.xlu0 %v1754_v14, %s9935_s5  ;;  %v1909_v23 = vrot.slane %v1907_v30, 5  ;;  %v1915_v29 = vrot.slane %v1913_v36, 5  ;;  %v1599_v27 = vrot.slane %v1597_v58, 5  ;;  %v1937_v37 = vshrl.u32 %v7987_v40, 16 }
 0x1c7   : > { %1813 = vrot.lane.b32.xlu1 %v1763_v32, %s9935_s5  ;;  %v1615_v46 = vrot.slane %v1614_v56, 4  ;;  %v1919_v17 = vrot.slane %v1917_v16, 4  ;;  %v8058_v53 = vcombine.low %v8051_v22, %v8051_v22  ;;  %v1601_v31 = vshrl.u32 %v6118_v52, 16  ;;  %v6914_v52 = vld [vmem:[%s9999_s3 + $0x18] sm:$0xff]  }
 0x1c8   : > { %v1910_v41 = vor.u32 %v1909_v23, %v1906_v7  ;;  %v1595_v20 = vrot.slane %v1594_v13, 4  ;;  %v1939_v0 = vrot.slane %v1937_v37, 4  ;;  %v8062_v8 = vmul.bf16 %v7766_v3, %v7882_v25  ;;  %6471 = vmatpush3.bf16.msra.mxu1 %v6914_v52 }
 0x1c9   : > { %v1620_v12 = vsel %vm7898_vm7, %v1615_v46, %v1619_v59  ;;  %v1920_v40 = vor.u32 %v1919_v17, %v1915_v29  ;;  %v1943_v19 = vshll.u32 %v8058_v53, 16  ;;  %v1603_v14 = vrot.slane %v1601_v31, 4  ;;  %v6916_v17 = vld [vmem:[%s9999_s3 + $0x10] sm:$0xff]  }
 0x1ca   : > { %1667 = vrot.lane.b32.xlu0 %v1620_v12, %s9933_s29  ;;  %v1911_v13 = vrot.slane %v1910_v41, 4  ;;  %v1940_v24 = vor.u32 %v1939_v0, %v8018_v38  ;;  %v8077_v32 = vcombine.low %v8062_v8, %v8062_v8  ;;  %v1621_v35 = vshrl.u32 %v8027_v33, 16 }
 0x1cb   : > { %v1921_v28 = vrot.slane %v1920_v40, 4  ;;  %v8080_v30 = vrot.slane %v1943_v19, 5  ;;  %v1604_v36 = vor.u32 %v1603_v14, %v1599_v27  ;;  %v8084_v58 = vmul.bf16 %v7829_v5, %v7880_v60 }
 0x1cc   : > { %v1916_v56 = vsel %vm7898_vm7, %v1911_v13, %v1915_v29  ;;  %v1941_v7 = vrot.slane %v1940_v24, 4  ;;  %v1623_v38 = vrot.slane %v1621_v35, 4  ;;  %v1627_v16 = vshll.u32 %v8077_v32, 16  ;;  %v6915_v29 = vld [vmem:[%s9999_s3 + $0x50] sm:$0xff]   ;;  %v6918_v13 = vld [vmem:[%s9999_s3 + $0x8] sm:$0xff]  }
 0x1cd   : > { %1982 = vrot.lane.b32.xlu1 %v1916_v56, %s9951_s8  ;;  %v1600_v33 = vsel %vm7898_vm7, %v1595_v20, %v1599_v27  ;;  %v1605_v23 = vrot.slane %v1604_v36, 4  ;;  %v6141_v37 = vcombine.high %v8084_v58, %v8084_v58  ;;  %v2021_v46 = vmul.bf16 %v7816_v57, %v7882_v25  ;;  %6472 = vmatprep.subr.bf16.mxu1 %v6915_v29 }
 0x1ce   : > { %1663 = vrot.lane.b32.xlu0 %v1600_v33, %s9933_s29  ;;  %v1926_v27 = vsel %vm7898_vm7, %v1921_v28, %v7998_v55  ;;  %v1946_v31 = vsel %vm7898_vm7, %v1941_v7, %v8080_v30  ;;  %v1624_v41 = vor.u32 %v1623_v38, %v1619_v59  ;;  %v8109_v20 = vrot.slane %v1627_v16, 5  ;;  %6473 = vmatpush3.bf16.msra.mxu1 %v6916_v17  ;;  %v6917_v59 = vld [vmem:[%s9999_s3 + $0x48] sm:$0xff]  }
 0x1cf   : > { %v1973_v0 = vshll.u32 %v6141_v37, 16  ;;  %v1977_v12 = vshrl.u32 %v6141_v37, 16  ;;  %v6146_v40 = vcombine.low %v2021_v46, %v2021_v46  ;;  %v2074_v19 = vrot.slane %v7941_v47, 4  ;;  %6474 = vmatprep.subr.bf16.mxu1 %v6917_v59 }
 0x1d0   : > { %v1625_v14 = vrot.slane %v1624_v41, 4  ;;  %v2022_v11 = vmul.bf16 %v7839_v4, %v7880_v60  ;;  %v6147_v52 = vcombine.high %v2021_v46, %v2021_v46  ;;  %v1717_v55 = vmul.bf16 %v7842_v26, %v7882_v25 }
 0x1d1   : > { %1984 = vrot.lane.b32.xlu1 %v1926_v27, %s9951_s8  ;;  %v1610_v47 = vsel %vm7898_vm7, %v1605_v23, %v8045_v34  ;;  %v8126_v24 = vrot.slane %v1973_v0, 5  ;;  %v1979_v35 = vrot.slane %v1977_v12, 4  ;;  %v2076_v28 = vshrl.u32 %v6146_v40, 16  ;;  %v6919_v12 = vld [vmem:[%s9999_s3 + $0x40] sm:$0xff]  }
 0x1d2   : > { %1988 = vrot.lane.b32.xlu0 %v1946_v31, %s9951_s8  ;;  %v1630_v36 = vsel %vm7898_vm7, %v1625_v14, %v8109_v20  ;;  %v2079_v56 = vshll.u32 %v6146_v40, 16  ;;  %v6148_v7 = vcombine.low %v2022_v11, %v2022_v11  ;;  %v2085_v38 = vshrl.u32 %v6147_v52, 16  ;;  %6475 = vmatpush3.bf16.msra.mxu1 %v6918_v13  ;;  %v6920_v40 = vld [vmem:[%s9999_s3] sm:$0xff]  }
 0x1d3   : > { %v1980_v16 = vor.u32 %v1979_v35, %v8126_v24  ;;  %v2078_v33 = vrot.slane %v2076_v28, 7  ;;  %v6129_v37 = vcombine.low %v1717_v55, %v1717_v55  ;;  %v6130_v46 = vcombine.high %v1717_v55, %v1717_v55  ;;  %6476 = vmatprep.subr.bf16.mxu1 %v6919_v12 }
 0x1d4   : > { %v2087_v34 = vrot.slane %v2085_v38, 7  ;;  %v2094_v23 = vshrl.u32 %v6148_v7, 16  ;;  %v2097_v29 = vshll.u32 %v6148_v7, 16  ;;  %v2088_v17 = vshll.u32 %v6147_v52, 16 }
 0x1d5   : > { %1665 = vrot.lane.b32.xlu1 %v1610_v47, %s9933_s29  ;;  %v1981_v27 = vrot.slane %v1980_v16, 4  ;;  %v2081_v31 = vor.u32 %v2079_v56, %v2078_v33  ;;  %v1775_v41 = vshrl.u32 %v6129_v37, 16  ;;  %v1773_v0 = vrot.slane %v7995_v51, 4 }
 0x1d6   : > { %1669 = vrot.lane.b32.xlu0 %v1630_v36, %s9933_s29  ;;  %v8142_v14 = vrot.slane %v2094_v23, 7  ;;  %v2083_v52 = vrot.slane %v2078_v33, 4  ;;  %v2090_v55 = vor.u32 %v2088_v17, %v2087_v34  ;;  %v1784_v59 = vshrl.u32 %v6130_v46, 16  ;;  %6477 = vmatpush3.bf16.msra.mxu1 %v6920_v40 }
 0x1d7   : > { %v2082_v13 = vsel %vm7955_vm11, %v2074_v19, %v2081_v31  ;;  %v2092_v47 = vrot.slane %v2087_v34, 4  ;;  %v1777_v51 = vrot.slane %v1775_v41, 7  ;;  %v1778_v35 = vshll.u32 %v6129_v37, 16 }
 0x1d8   : > { %v2099_v28 = vor.u32 %v2097_v29, %v8142_v14  ;;  %v8147_v56 = vrot.slane %v1784_v59, 7  ;;  %v1787_v7 = vshll.u32 %v6130_v46, 16  ;;  %v6139_v36 = vcombine.high %v8051_v22, %v8051_v22 }
 0x1d9   : > { %1996 = vrot.lane.b32.xlu1 %v1981_v27, %s9951_s8  ;;  %v1782_v38 = vrot.slane %v1777_v51, 4  ;;  %v1780_v16 = vor.u32 %v1778_v35, %v1777_v51  ;;  %v1947_v33 = vshrl.u32 %v8058_v53, 16  ;;  %v6140_v19 = vcombine.low %v8084_v58, %v8084_v58 }
 0x1da   : > { %2117 = vrot.lane.b32.xlu0 %v2082_v13, %s9933_s29  ;;  %v2091_v37 = vsel %vm7955_vm11, %v2083_v52, %v2090_v55  ;;  %v1789_v46 = vor.u32 %v1787_v7, %v8147_v56  ;;  %v1953_v34 = vshll.u32 %v6139_v36, 16  ;;  %v6149_v23 = vcombine.high %v2022_v11, %v2022_v11 }
 0x1db   : > { %v2100_v22 = vsel %vm7955_vm11, %v2092_v47, %v2099_v28  ;;  %v1949_v29 = vrot.slane %v1947_v33, 4  ;;  %v1963_v17 = vshll.u32 %v6140_v19, 16  ;;  %v1967_v27 = vshrl.u32 %v6140_v19, 16 }
 0x1dc   : > { %v1790_v53 = vsel %vm7955_vm11, %v1782_v38, %v1789_v46  ;;  %v1781_v58 = vsel %vm7955_vm11, %v1773_v0, %v1780_v16  ;;  %v1955_v31 = vrot.slane %v1953_v34, 5  ;;  %v2103_v41 = vshrl.u32 %v6149_v23, 16 }
 0x1dd   : > { %2121 = vrot.lane.b32.xlu1 %v2100_v22, %s9933_s29  ;;  %v1950_v12 = vor.u32 %v1949_v29, %v8080_v30  ;;  %v1965_v40 = vrot.slane %v1963_v17, 5  ;;  %v1969_v11 = vrot.slane %v1967_v27, 4  ;;  %v2106_v52 = vshll.u32 %v6149_v23, 16 }
 0x1de   : > { %2119 = vrot.lane.b32.xlu0 %v2091_v37, %s9933_s29  ;;  %v8168_v55 = vrot.slane %v2103_v41, 7  ;;  %v1957_v59 = vshrl.u32 %v6139_v36, 16  ;;  %v6122_v13 = vcombine.high %v8062_v8, %v8062_v8  ;;  %v1631_v47 = vshrl.u32 %v8077_v32, 16 }
 0x1df   : > { %v1951_v0 = vrot.slane %v1950_v12, 4  ;;  %v1970_v51 = vor.u32 %v1969_v11, %v1965_v40  ;;  %v2101_v35 = vrot.slane %v8142_v14, 4  ;;  %v1564_v30 = vmul.bf16 %v7745_v54, %v7880_v60 }
 0x1e0   : > { %v2108_v28 = vor.u32 %v2106_v52, %v8168_v55  ;;  %v1959_v7 = vrot.slane %v1957_v59, 4  ;;  %v1633_v38 = vrot.slane %v1631_v47, 4  ;;  %v1718_v16 = vmul.bf16 %v7870_v1, %v7880_v60 }
 0x1e1   : > { %1819 = vrot.lane.b32.xlu1 %v1790_v53, %s9935_s5  ;;  %v1971_v36 = vrot.slane %v1970_v51, 4  ;;  %v1637_v8 = vshll.u32 %v6122_v13, 16  ;;  %v6123_v33 = vcombine.low %v1564_v30, %v1564_v30  ;;  %v6124_v32 = vcombine.high %v1564_v30, %v1564_v30 }
 0x1e2   : > { %1817 = vrot.lane.b32.xlu0 %v1781_v58, %s9935_s5  ;;  %v1960_v19 = vor.u32 %v1959_v7, %v1955_v31  ;;  %v1634_v14 = vor.u32 %v1633_v38, %v8109_v20  ;;  %v1956_v23 = vsel %vm7898_vm7, %v1951_v0, %v1955_v31  ;;  %v2109_v22 = vsel %vm7955_vm11, %v2101_v35, %v2108_v28 }
 0x1e3   : > { %v1647_v37 = vshll.u32 %v6123_v33, 16  ;;  %v1651_v46 = vshrl.u32 %v6123_v33, 16  ;;  %v1657_v34 = vshll.u32 %v6124_v32, 16  ;;  %v6131_v17 = vcombine.low %v1718_v16, %v1718_v16 }
 0x1e4   : > { %v1961_v29 = vrot.slane %v1960_v19, 4  ;;  %v1976_v27 = vsel %vm7898_vm7, %v1971_v36, %v8126_v24  ;;  %v1639_v53 = vrot.slane %v1637_v8, 5  ;;  %v1635_v41 = vrot.slane %v1634_v14, 4 }
 0x1e5   : > { %1990 = vrot.lane.b32.xlu1 %v1956_v23, %s9951_s8  ;;  %v8190_v58 = vrot.slane %v1647_v37, 5  ;;  %v1653_v20 = vrot.slane %v1651_v46, 4  ;;  %v1659_v12 = vrot.slane %v1657_v34, 5  ;;  %v1791_v31 = vrot.slane %v8147_v56, 4 }
 0x1e6   : > { %1994 = vrot.lane.b32.xlu0 %v1976_v27, %s9951_s8  ;;  %v1793_v11 = vshrl.u32 %v6131_v17, 16  ;;  %v1641_v59 = vshrl.u32 %v6122_v13, 16  ;;  %v6132_v47 = vcombine.high %v1718_v16, %v1718_v16  ;;  %v8197_v0 = vpack.c.bf16 %v7872_v42, %v7872_v42 }
 0x1e7   : > { %v1654_v52 = vor.u32 %v1653_v20, %v8190_v58  ;;  %v1966_v24 = vsel %vm7898_vm7, %v1961_v29, %v1965_v40  ;;  %v1369_v35 = vmul.bf16 %v7777_v21, %v7844_v18  ;;  %v1370_v56 = vmul.bf16 %v7816_v57, %v7831_v6 }
 0x1e8   : > { %v8201_v51 = vrot.slane %v1793_v11, 7  ;;  %v1796_v13 = vshll.u32 %v6131_v17, 16  ;;  %v1643_v28 = vrot.slane %v1641_v59, 4  ;;  %v1802_v7 = vshrl.u32 %v6132_v47, 16  ;;  %1863 = vst.msk [vmem:[#allocation2 + $0x58] sm:$0xf] %vm860_vm0, %v8197_v0 }
 0x1e9   : > { %2123 = vrot.lane.b32.xlu1 %v2109_v22, %s9933_s29  ;;  %v1655_v30 = vrot.slane %v1654_v52, 4  ;;  %v1640_v42 = vsel %vm7898_vm7, %v1635_v41, %v1639_v53  ;;  %v2110_v40 = vrot.slane %v8168_v55, 4  ;;  %v6104_v18 = vcombine.high %v1369_v35, %v1369_v35 }
 0x1ea   : > { %1992 = vrot.lane.b32.xlu0 %v1966_v24, %s9951_s8  ;;  %v6105_v38 = vcombine.low %v1370_v56, %v1370_v56  ;;  %v1798_v6 = vor.u32 %v1796_v13, %v8201_v51  ;;  %v1644_v16 = vor.u32 %v1643_v28, %v1639_v53  ;;  %v6106_v36 = vcombine.high %v1370_v56, %v1370_v56 }
 0x1eb   : > { %v1371_v8 = vmul.bf16 %v7839_v4, %v7882_v25  ;;  %v1660_v33 = vsel %vm7898_vm7, %v1655_v30, %v1659_v12  ;;  %v1805_v32 = vshll.u32 %v6132_v47, 16  ;;  %v1403_v19 = vshrl.u32 %v6104_v18, 16 }
 0x1ec   : > { %v1412_v14 = vshrl.u32 %v6105_v38, 16  ;;  %v1799_v55 = vsel %vm7955_vm11, %v1791_v31, %v1798_v6  ;;  %v1804_v37 = vrot.slane %v1802_v7, 7  ;;  %v1415_v46 = vshll.u32 %v6105_v38, 16 }
 0x1ed   : > { %1671 = vrot.lane.b32.xlu1 %v1640_v42, %s9933_s29  ;;  %v1421_v34 = vshrl.u32 %v6106_v36, 16  ;;  %v1645_v23 = vrot.slane %v1644_v16, 4  ;;  %v1405_v22 = vrot.slane %v1403_v19, 7  ;;  %v6103_v25 = vcombine.low %v1369_v35, %v1369_v35 }
 0x1ee   : > { %1675 = vrot.lane.b32.xlu0 %v1660_v33, %s9933_s29  ;;  %v1414_v29 = vrot.slane %v1412_v14, 7  ;;  %v1424_v27 = vshll.u32 %v6106_v36, 16  ;;  %v1406_v53 = vshll.u32 %v6104_v18, 16  ;;  %v6107_v20 = vcombine.low %v1371_v8, %v1371_v8 }
 0x1ef   : > { %v1423_v17 = vrot.slane %v1421_v34, 7  ;;  %v1410_v41 = vrot.slane %v1405_v22, 4  ;;  %v1395_v52 = vshrl.u32 %v6103_v25, 16  ;;  %v1800_v31 = vrot.slane %v8201_v51, 4 }
 0x1f0   : > { %v1417_v12 = vor.u32 %v1415_v46, %v1414_v29  ;;  %v1419_v11 = vrot.slane %v1414_v29, 4  ;;  %v1807_v59 = vor.u32 %v1805_v32, %v1804_v37  ;;  %v1430_v24 = vshrl.u32 %v6107_v20, 16 }
 0x1f1   : > { %1821 = vrot.lane.b32.xlu1 %v1799_v55, %s9935_s5  ;;  %v1426_v47 = vor.u32 %v1424_v27, %v1423_v17  ;;  %v1397_v56 = vrot.slane %v1395_v52, 7  ;;  %v1408_v30 = vor.u32 %v1406_v53, %v1405_v22  ;;  %v1433_v7 = vshll.u32 %v6107_v20, 16 }
 0x1f2   : > { %2125 = vrot.lane.b32.xlu0 %v2110_v40, %s9933_s29  ;;  %v1418_v35 = vsel %vm7955_vm11, %v1410_v41, %v1417_v12  ;;  %v1432_v28 = vrot.slane %v1430_v24, 7  ;;  %v1372_v51 = vmul.bf16 %v7818_v9, %v7880_v60  ;;  %v1650_v42 = vsel %vm7898_vm7, %v1645_v23, %v8190_v58  ;;  %v1465_v58 = vld [vmem:[#allocation2 + $0xc] sm:$0xf] }
 0x1f3   : > { %1469 = vst.msk [vmem:[#allocation2 + $0x24] sm:$0xf] %vm860_vm0, %v1418_v35  ;;  %v1427_v13 = vsel %vm7955_vm11, %v1419_v11, %v1426_v47  ;;  %v1401_v40 = vrot.slane %v1397_v56, 4  ;;  %v6108_v18 = vcombine.high %v1371_v8, %v1371_v8  ;;  %v1398_v38 = vshll.u32 %v6103_v25, 16 }
 0x1f4   : > { %1470 = vst.msk [vmem:[#allocation2 + $0x30] sm:$0xf] %vm860_vm0, %v1427_v13  ;;  %v1808_v6 = vsel %vm7955_vm11, %v1800_v31, %v1807_v59  ;;  %v1428_v16 = vrot.slane %v1423_v17, 4  ;;  %v1435_v36 = vor.u32 %v1433_v7, %v1432_v28  ;;  %v6109_v33 = vcombine.low %v1372_v51, %v1372_v51 }
 0x1f5   : > { %1673 = vrot.lane.b32.xlu1 %v1650_v42, %s9933_s29  ;;  %v1409_v8 = vsel %vm7955_vm11, %v1401_v40, %v1408_v30  ;;  %v1439_v32 = vshrl.u32 %v6108_v18, 16  ;;  %v1400_v19 = vor.u32 %v1398_v38, %v1397_v56  ;;  %v1437_v46 = vrot.slane %v1432_v28, 4  ;;  %v1688_v30 = vld [vmem:[#allocation2] sm:$0x8]  ;;  %s5923_s29 = sshll.u32 %s7653_s30, 4  ;;  %s9846_s29 = int_to_ptr.vmem [resolvable:$true] %s5923_s29 }
 0x1f6   : > { %1823 = vrot.lane.b32.xlu0 %v1808_v6, %s9935_s5  ;;  %1468 = vst.msk [vmem:[#allocation2 + $0x18] sm:$0xf] %vm860_vm0, %v1409_v8  ;;  %v1436_v14 = vsel %vm7955_vm11, %v1428_v16, %v1435_v36  ;;  %v1448_v55 = vshrl.u32 %v6109_v33, 16  ;;  %v1442_v34 = vshll.u32 %v6108_v18, 16  ;;  %v1451_v29 = vshll.u32 %v6109_v33, 16 }
 0x1f7   : > { %1471 = vst.msk [vmem:[#allocation2 + $0x3c] sm:$0xf] %vm860_vm0, %v1436_v14  ;;  %v1441_v37 = vrot.slane %v1439_v32, 7  ;;  %v1466_v23 = vsel %vm8242_vm13, %v1400_v19, %v1465_v58 }
 0x1f8   : > { %v1450_v22 = vrot.slane %v1448_v55, 7  ;;  %1467 = vst [vmem:[#allocation2 + $0xc] sm:$0xf] %v1466_v23 }
 0x1f9   : > { %2159 = vrot.lane.b32.xlu1 %v8197_v0, %s9935_s5  ;;  %v1446_v25 = vrot.slane %v1441_v37, 4  ;;  %v1444_v17 = vor.u32 %v1442_v34, %v1441_v37  ;;  %v6921_v0 = vld [vmem:[%s9902_s11 + $0x78] sm:$0xff]   ;;  %s10029_s5 = smov 64  }
 0x1fa   : > { %v1453_v27 = vor.u32 %v1451_v29, %v1450_v22  ;;  %6508 = vmatprep.subr.bf16.mxu1 %v6921_v0 }
 0x1fb   : > { %v1445_v53 = vsel %vm7955_vm11, %v1437_v46, %v1444_v17 }
 0x1fc   : > { %v1454_v20 = vsel %vm7955_vm11, %v1446_v25, %v1453_v27  ;;  %1472 = vst.msk [vmem:[#allocation2 + $0x48] sm:$0xf] %vm860_vm0, %v1445_v53  ;;  %v2015_v27 = vld [vmem:[#allocation2 + $0x58] sm:$0xf] }
 0x1fd   : > { %1473 = vst.msk [vmem:[#allocation2 + $0x54] sm:$0xf] %vm860_vm0, %v1454_v20 }
 0x20a   : > { %v2150_v41 = vpop.permute.xlu0 %2149 }
 0x20e   : > { %v1497_v12 = vpop.permute.xlu0 %1496  ;;  %v2152_v11 = vpop.permute.xlu1 %2151 }
 0x20f   : > { %1516 = vst.msk [vmem:[#allocation2 + $0x24] sm:$0xf] %vm1513_vm14, %v1497_v12 }
 0x212   : > { %v1499_v52 = vpop.permute.xlu1 %1498  ;;  %v1493_v31 = vpop.permute.xlu0 %1492 }
 0x213   : > { %1517 = vst.msk [vmem:[#allocation2 + $0x30] sm:$0xf] %vm1513_vm14, %v1499_v52  ;;  %1514 = vst.msk [vmem:[#allocation2 + $0xc] sm:$0xf] %vm1513_vm14, %v1493_v31  ;;  %v6922_v52 = vld [vmem:[%s9902_s11 + $0x38] sm:$0xff]  }
 0x216   : > { %v2148_v59 = vpop.permute.xlu1 %2147  ;;  %v8269_v47 = vpop.permute.xlu0 %2153 }
 0x21a   : > { %v1495_v24 = vpop.permute.xlu1 %1494  ;;  %v1501_v35 = vpop.permute.xlu0 %1500 }
 0x21b   : > { %1515 = vst.msk [vmem:[#allocation2 + $0x18] sm:$0xf] %vm1513_vm14, %v1495_v24  ;;  %1518 = vst.msk [vmem:[#allocation2 + $0x3c] sm:$0xf] %vm1513_vm14, %v1501_v35 }
 0x21e   : > { %v8277_v13 = vpop.permute.xlu1 %2157  ;;  %v1662_v28 = vpop.permute.xlu0 %1661 }
 0x21f   : > { %v1689_v7 = vsel %vm8273_vm2, %v1662_v28, %v1688_v30 }
 0x220   : > { %1690 = vst [vmem:[#allocation2] sm:$0x8] %v1689_v7 }
 0x222   : > { %v1505_v51 = vpop.permute.xlu1 %1504  ;;  %v8281_v42 = vpop.permute.xlu0 %2155 }
 0x223   : > { %1520 = vst.msk [vmem:[#allocation2 + $0x54] sm:$0xf] %vm1513_vm14, %v1505_v51 }
 0x226   : > { %v1503_v40 = vpop.permute.xlu0 %1502 }
 0x227   : > { %1519 = vst.msk [vmem:[#allocation2 + $0x48] sm:$0xf] %vm1513_vm14, %v1503_v40  ;;  %v1835_v16 = vld [vmem:[#allocation2] sm:$0xf] }
 0x228   : > { %v2116_v18 = vpop.permute.xlu1 %2115 }
 0x22c   : > { %v1810_v6 = vpop.permute.xlu1 %1809 }
 0x22d   : > { %v1836_v36 = vsel %vm8287_vm6, %v1810_v6, %v1835_v16 }
 0x22e   : > { %1837 = vst [vmem:[#allocation2] sm:$0xf] %v1836_v36 }
 0x230   : > { %v1816_v33 = vpop.permute.xlu0 %1815  ;;  %v2114_v58 = vpop.permute.xlu1 %2113 }
 0x234   : > { %v2112_v8 = vpop.permute.xlu0 %2111 }
 0x235   : > { %v1987_v32 = vpop.permute.xlu1 %1986 }
 0x236   : > { %2008 = vst.msk [vmem:[#allocation2 + $0x1c] sm:$0xf] %vm1513_vm14, %v1987_v32 }
 0x237   : > { %2137 = vst.msk [vmem:[#allocation2 + $0x1c] sm:$0xf] %vm1691_vm8, %v2116_v18 }
 0x238   : > { %2170 = vst.msk [vmem:[#allocation2 + $0x1c] sm:$0xf] %vm1833_vm5, %v2152_v11  ;;  %v1812_v19 = vpop.permute.xlu0 %1811 }
 0x239   : > { %v1814_v14 = vpop.permute.xlu1 %1813 }
 0x23c   : > { %v1668_v55 = vpop.permute.xlu0 %1667 }
 0x23d   : > { %1694 = vst.msk [vmem:[#allocation2 + $0x24] sm:$0xf] %vm1691_vm8, %v1668_v55 }
 0x23e   : > { %1841 = vst.msk [vmem:[#allocation2 + $0x24] sm:$0xf] %vm1833_vm5, %v1816_v33 }
 0x23f   : > { %v1983_v37 = vpop.permute.xlu1 %1982 }
 0x240   : > { %2006 = vst.msk [vmem:[#allocation2 + $0x4] sm:$0xf] %vm1513_vm14, %v1983_v37  ;;  %v1664_v46 = vpop.permute.xlu0 %1663 }
 0x241   : > { %2135 = vst.msk [vmem:[#allocation2 + $0x4] sm:$0xf] %vm1691_vm8, %v2112_v8  ;;  %1692 = vst.msk [vmem:[#allocation2 + $0xc] sm:$0xf] %vm1691_vm8, %v1664_v46 }
 0x242   : > { %2168 = vst.msk [vmem:[#allocation2 + $0x4] sm:$0xf] %vm1833_vm5, %v2148_v59  ;;  %1839 = vst.msk [vmem:[#allocation2 + $0xc] sm:$0xf] %vm1833_vm5, %v1812_v19 }
 0x243   : > { %v1985_v34 = vpop.permute.xlu1 %1984 }
 0x244   : > { %2007 = vst.msk [vmem:[#allocation2 + $0x10] sm:$0xf] %vm1513_vm14, %v1985_v34  ;;  %v1989_v23 = vpop.permute.xlu0 %1988 }
 0x245   : > { %2136 = vst.msk [vmem:[#allocation2 + $0x10] sm:$0xf] %vm1691_vm8, %v2114_v58 }
 0x246   : > { %2009 = vst.msk [vmem:[#allocation2 + $0x28] sm:$0xf] %vm1513_vm14, %v1989_v23 }
 0x247   : > { %2169 = vst.msk [vmem:[#allocation2 + $0x10] sm:$0xf] %vm1833_vm5, %v2150_v41  ;;  %v1666_v22 = vpop.permute.xlu1 %1665 }
 0x248   : > { %1693 = vst.msk [vmem:[#allocation2 + $0x18] sm:$0xf] %vm1691_vm8, %v1666_v22  ;;  %v1670_v29 = vpop.permute.xlu0 %1669 }
 0x249   : > { %1840 = vst.msk [vmem:[#allocation2 + $0x18] sm:$0xf] %vm1833_vm5, %v1814_v14  ;;  %v2284_v41 = vld [vmem:[#allocation2] sm:$0xff] }
 0x24a   : > { %1695 = vst.msk [vmem:[#allocation2 + $0x30] sm:$0xf] %vm1691_vm8, %v1670_v29 }
 0x24b   : > { %v1997_v17 = vpop.permute.xlu1 %1996 }
 0x24c   : > { %v2016_v53 = vsel %vm8312_vm12, %v1997_v17, %v2015_v27  ;;  %v2118_v20 = vpop.permute.xlu0 %2117  ;;  %v6923_v27 = vld [vmem:[%s9902_s11 + $0x70] sm:$0xff]  }
 0x24d   : > { %2017 = vst [vmem:[#allocation2 + $0x58] sm:$0xf] %v2016_v53  ;;  %2138 = vst.msk [vmem:[#allocation2 + $0x28] sm:$0xf] %vm1691_vm8, %v2118_v20  ;;  %v6924_v53 = vld [vmem:[%s9902_s11 + $0x30] sm:$0xff]   ;;  %v6925_v20 = vld [vmem:[%s9902_s11 + $0x68] sm:$0xff]  }
 0x24e   : > { %v2286_v0 = vld [vmem:[#allocation2 + $0xc] sm:$0xff]  ;;  %2171 = vst.msk [vmem:[#allocation2 + $0x28] sm:$0xf] %vm1833_vm5, %v8269_v47 }
 0x24f   : > { %v6160_v12 = vcombine.high %v2284_v41, %v2286_v0  ;;  %v6159_v11 = vcombine.low %v2284_v41, %v2286_v0  ;;  %v2122_v31 = vpop.permute.xlu1 %2121  ;;  %v6926_v41 = vld [vmem:[%s9902_s11 + $0x28] sm:$0xff]   ;;  %v6927_v0 = vld [vmem:[%s9902_s11 + $0x60] sm:$0xff]  }
 0x250   : > { %v2120_v59 = vpop.permute.xlu0 %2119  ;;  %v2288_v30 = vld [vmem:[#allocation2 + $0x18] sm:$0xff] }
 0x251   : > { %2556 = vmatprep.mubr.bf16.mxu1 %v6160_v12  ;;  %v6928_v12 = vld [vmem:[%s9902_s11 + $0x20] sm:$0xff]  }
 0x252   : > { %2557 = vmatmul.mubr.bf16.vlgmr.msra.gmra.mxu1 %v6159_v11  ;;  %v6929_v11 = vld [vmem:[%s9902_s11 + $0x58] sm:$0xff]  }
 0x253   : > { %6509 = vmatpush3.bf16.msra.mxu1 %v6922_v52  ;;  %v1820_v24 = vpop.permute.xlu1 %1819  ;;  %v6930_v52 = vld [vmem:[%s9902_s11 + $0x18] sm:$0xff]  }
 0x254   : > { %v1818_v35 = vpop.permute.xlu0 %1817  ;;  %v2144_v8 = vld [vmem:[#allocation2 + $0x58] sm:$0x1]  ;;  %6510 = vmatprep.subr.bf16.mxu1 %v6923_v27 }
 0x255   : > { %v2290_v28 = vld [vmem:[#allocation2 + $0x24] sm:$0xff]  ;;  %1842 = vst.msk [vmem:[#allocation2 + $0x30] sm:$0xf] %vm1833_vm5, %v1818_v35 }
 0x256   : > { %v6163_v7 = vcombine.high %v2288_v30, %v2290_v28  ;;  %v6162_v47 = vcombine.low %v2288_v30, %v2290_v28  ;;  %v6934_v35 = vld [vmem:[%s9902_s11 + $0x8] sm:$0xff]   ;;  %v6935_v30 = vld [vmem:[%s9902_s11 + $0x40] sm:$0xff]  }
 0x257   : > { %v1991_v51 = vpop.permute.xlu1 %1990  ;;  %6511 = vmatpush3.bf16.msra.mxu1 %v6924_v53  ;;  %v6936_v28 = vld [vmem:[%s9902_s11] sm:$0xff]  }
 0x258   : > { %2010 = vst.msk [vmem:[#allocation2 + $0x34] sm:$0xf] %vm1513_vm14, %v1991_v51  ;;  %v1995_v40 = vpop.permute.xlu0 %1994  ;;  %2564 = vmatprep.mubr.bf16.mxu1 %v6163_v7  ;;  %6512 = vmatprep.subr.bf16.mxu1 %v6925_v20  ;;  %v8392_v51 = vsub.s32 0, %v7695_v50 }
 0x259   : > { %2139 = vst.msk [vmem:[#allocation2 + $0x34] sm:$0xf] %vm1691_vm8, %v2120_v59  ;;  %v6932_v59 = vld [vmem:[%s9902_s11 + $0x10] sm:$0xff]  }
 0x25a   : > { %2012 = vst.msk [vmem:[#allocation2 + $0x4c] sm:$0xf] %vm1513_vm14, %v1995_v40  ;;  %2565 = vmatmul.mubr.bf16.gmra.mxu1 %v6162_v47  ;;  %10026 = vst [vmem:[#allocation38_spill] sm:$0xff] %v8392_v51  ;;  %v2678_v40 = vld [vmem:[%s10027_s28] sm:$0x3] }
 0x25b   : > { %2172 = vst.msk [vmem:[#allocation2 + $0x34] sm:$0xf] %vm1833_vm5, %v8281_v42  ;;  %v2124_v18 = vpop.permute.xlu1 %2123  ;;  %v10023_v42 = vmov 0  ;;  %6513 = vmatpush3.bf16.msra.mxu1 %v6926_v41 }
 0x25c   : > { %2141 = vst.msk [vmem:[#allocation2 + $0x4c] sm:$0xf] %vm1691_vm8, %v2124_v18  ;;  %v1993_v6 = vpop.permute.xlu0 %1992  ;;  %v10024_v42 = vsel %vm8339_vm15, 4294967295, %v10023_v42  ;;  %6514 = vmatprep.subr.bf16.mxu1 %v6927_v0  ;;  %v8398_v18 = vsub.s32 1, %v7695_v50 }
 0x25d   : > { %2011 = vst.msk [vmem:[#allocation2 + $0x40] sm:$0xf] %vm1513_vm14, %v1993_v6  ;;  %10025 = vst [vmem:[#allocation37_spill] sm:$0xff] %v10024_v42 }
 0x25e   : > { %2140 = vst.msk [vmem:[#allocation2 + $0x40] sm:$0xf] %vm1691_vm8, %v2122_v31  ;;  %v6931_v31 = vld [vmem:[%s9902_s11 + $0x50] sm:$0xff]  }
 0x25f   : > { %2173 = vst.msk [vmem:[#allocation2 + $0x40] sm:$0xf] %vm1833_vm5, %v8277_v13  ;;  %v1672_v16 = vpop.permute.xlu1 %1671  ;;  %6515 = vmatpush3.bf16.msra.mxu1 %v6928_v12 }
 0x260   : > { %1696 = vst.msk [vmem:[#allocation2 + $0x3c] sm:$0xf] %vm1691_vm8, %v1672_v16  ;;  %v1676_v36 = vpop.permute.xlu0 %1675  ;;  %6516 = vmatprep.subr.bf16.mxu1 %v6929_v11  ;;  %v8400_v16 = vld [vmem:[#allocation14] ss:$0 sm:$0xff] }
 0x261   : > { %1843 = vst.msk [vmem:[#allocation2 + $0x3c] sm:$0xf] %vm1833_vm5, %v1820_v24  ;;  %v6933_v24 = vld [vmem:[%s9902_s11 + $0x48] sm:$0xff]  }
 0x262   : > { %1698 = vst.msk [vmem:[#allocation2 + $0x54] sm:$0xf] %vm1691_vm8, %v1676_v36  ;;  %v2292_v19 = vld [vmem:[#allocation2 + $0x30] sm:$0xff] }
 0x263   : > { %v1822_v33 = vpop.permute.xlu1 %1821  ;;  %6517 = vmatpush3.bf16.msra.mxu1 %v6930_v52 }
 0x264   : > { %v2126_v58 = vpop.permute.xlu0 %2125  ;;  %6518 = vmatprep.subr.bf16.mxu1 %v6931_v31 }
 0x265   : > { %v2145_v13 = vsel %vm8339_vm15, %v2126_v58, %v2144_v8  ;;  %v2662_v8 = vld [vmem:[%s7653_s30] sm:$0xff] }
 0x266   : > { %2146 = vst [vmem:[#allocation2 + $0x58] sm:$0x1] %v2145_v13  ;;  %v2664_v13 = vld [vmem:[%s7653_s30 + $0x20] sm:$0xff] }
 0x267   : > { %v1674_v32 = vpop.permute.xlu1 %1673  ;;  %6519 = vmatpush3.bf16.msra.mxu1 %v6932_v59 }
 0x268   : > { %v2294_v14 = vld [vmem:[#allocation2 + $0x3c] sm:$0xff]  ;;  %1697 = vst.msk [vmem:[#allocation2 + $0x48] sm:$0xf] %vm1691_vm8, %v1674_v32  ;;  %v1824_v55 = vpop.permute.xlu0 %1823  ;;  %6520 = vmatprep.subr.bf16.mxu1 %v6933_v24  ;;  %v2666_v24 = vld [vmem:[%s7653_s30 + $0x40] sm:$0xff] }
 0x269   : > { %1844 = vst.msk [vmem:[#allocation2 + $0x48] sm:$0xf] %vm1833_vm5, %v1822_v33  ;;  %1845 = vst.msk [vmem:[#allocation2 + $0x54] sm:$0xf] %vm1833_vm5, %v1824_v55  ;;  %v6166_v37 = vcombine.high %v2292_v19, %v2294_v14  ;;  %v6165_v46 = vcombine.low %v2292_v19, %v2294_v14  ;;  %v8403_v33 = vrot.slane %v2678_v40, %v8392_v51  ;;  %v2706_v55 = vld [vmem:[%s9901_s10] sm:$0x3] }
 0x26a   : > { %v8409_v14 = vrot.slane %v2678_v40, %v8398_v18  ;;  %v8423_v41 = vrot.slane %v2706_v55, %v8398_v18 }
 0x26b   : > { %v2160_v34 = vpop.permute.xlu1 %2159  ;;  %2572 = vmatprep.mubr.bf16.mxu1 %v6166_v37  ;;  %6521 = vmatpush3.bf16.msra.mxu1 %v6934_v35  ;;  %v2668_v35 = vld [vmem:[%s7653_s30 + $0x60] sm:$0xff] }
 0x26c   : > { %2174 = vst.msk [vmem:[#allocation2 + $0x4c] sm:$0xf] %vm1833_vm5, %v2160_v34  ;;  %2573 = vmatmul.mubr.bf16.gmra.mxu1 %v6165_v46  ;;  %6522 = vmatprep.subr.bf16.mxu1 %v6935_v30  ;;  %v8415_v34 = vrot.slane %v2706_v55, %v8392_v51 }
 0x26f   : > { %6523 = vmatpush3.bf16.msra.mxu1 %v6936_v28 }
 0x270   : > { %v2298_v23 = vld [vmem:[#allocation2 + $0x54] sm:$0xff] }
 0x273   : > { %v2296_v22 = vld [vmem:[#allocation2 + $0x48] sm:$0xff] }
 0x274   : > { %v6169_v29 = vcombine.high %v2296_v22, %v2298_v23  ;;  %v6168_v17 = vcombine.low %v2296_v22, %v2298_v23  ;;  %v2690_v23 = vmul.f32 %v8403_v33, %v2662_v8  ;;  %v2692_v22 = vmul.f32 %v8403_v33, %v2664_v13 }
 0x275   : > { %v2694_v8 = vmul.f32 %v8403_v33, %v2666_v24  ;;  %v2696_v13 = vmul.f32 %v8403_v33, %v2668_v35 }
 0x276   : > { %2580 = vmatprep.mubr.bf16.mxu1 %v6169_v29  ;;  %v2718_v11 = vadd.f32 %v8415_v34, %v2690_v23  ;;  %v2720_v52 = vadd.f32 %v8415_v34, %v2692_v22 }
 0x277   : > { %2581 = vmatmul.mubr.bf16.gmra.mxu1 %v6168_v17 }
 0x27a   : > { %v6722_v7 = vpop.f32.mrf.mxu0 }
 0x27c   : > { %v2623_v6 = vpop.f32.mrf.mxu0 }
 0x27e   : > { %v6723_v37 = vpop.f32.mrf.mxu0 }
 0x280   : > { %v2626_v0 = vpop.f32.mrf.mxu0 }
 0x312   : > { %v6478_v47 = vpop.f32.mrf.mxu1 }
 0x314   : > { %v6479_v36 = vpop.f32.mrf.mxu1 }
 0x315   : > { %v6480_v58 = vadd.f32 %v6479_v36, %v6478_v47  ;;  %v2734_v36 = vmax.f32 %v2718_v11, 0.0 }
 0x316   : > { %v6481_v32 = vpop.f32.mrf.mxu1 }
 0x317   : > { %v2559_v19 = vadd.f32 %v6480_v58, %v8400_v16  ;;  %v2736_v58 = vmax.f32 %v2720_v52, 0.0 }
 0x318   : > { %v6482_v46 = vpop.f32.mrf.mxu1 }
 0x319   : > { %v2624_v29 = vadd.f32 %v2623_v6, %v2559_v19  ;;  %v6483_v17 = vadd.f32 %v6482_v46, %v6481_v32 }
 0x31a   : > { %v6484_v27 = vpop.f32.mrf.mxu1 }
 0x31b   : > { %2654 = vst [vmem:[%s7653_s30 + $0x8] sm:$0xff] %v2624_v29  ;;  %v2562_v53 = vadd.f32 %v6483_v17, %v8400_v16  ;;  %v2691_v20 = vmul.f32 %v8409_v14, %v2624_v29  ;;  %v2750_v17 = vpack.c.bf16 %v2736_v58, %v2734_v36  ;;  %v2670_v36 = vld [vmem:[%s7653_s30 + $0x80] sm:$0xff] }
 0x31c   : > { %v6485_v12 = vpop.f32.mrf.mxu1  ;;  %v2672_v58 = vld [vmem:[%s7653_s30 + $0xa0] sm:$0xff] }
 0x31d   : > { %v2627_v31 = vadd.f32 %v2626_v0, %v2562_v53  ;;  %v6486_v59 = vadd.f32 %v6485_v12, %v6484_v27  ;;  %v2719_v40 = vadd.f32 %v8423_v41, %v2691_v20  ;;  %v2722_v27 = vadd.f32 %v8415_v34, %v2694_v8 }
 0x31e   : > { %v6487_v30 = vpop.f32.mrf.mxu1  ;;  %v2724_v53 = vadd.f32 %v8415_v34, %v2696_v13 }
 0x31f   : > { %2655 = vst [vmem:[%s7653_s30 + $0x28] sm:$0xff] %v2627_v31  ;;  %v2567_v28 = vadd.f32 %v6486_v59, %v8400_v16  ;;  %v2693_v47 = vmul.f32 %v8409_v14, %v2627_v31  ;;  %v2735_v23 = vmax.f32 %v2719_v40, 0.0  ;;  %v2738_v11 = vmax.f32 %v2722_v27, 0.0  ;;  %v6726_v59 = vpop.f32.mrf.mxu0 }
 0x320   : > { %v6488_v6 = vpop.f32.mrf.mxu1  ;;  %v2740_v52 = vmax.f32 %v2724_v53, 0.0 }
 0x321   : > { %v2632_v32 = vadd.f32 %v6722_v7, %v2567_v28  ;;  %v6489_v19 = vadd.f32 %v6488_v6, %v6487_v30  ;;  %v2721_v55 = vadd.f32 %v8423_v41, %v2693_v47  ;;  %v2639_v47 = vpop.f32.mrf.mxu0 }
 0x322   : > { %v2752_v30 = vpack.c.bf16 %v2740_v52, %v2738_v11 }
 0x323   : > { %2656 = vst [vmem:[%s7653_s30 + $0x48] sm:$0xff] %v2632_v32  ;;  %v2570_v46 = vadd.f32 %v6489_v19, %v8400_v16  ;;  %v2737_v22 = vmax.f32 %v2721_v55, 0.0  ;;  %v2695_v29 = vmul.f32 %v8409_v14, %v2632_v32  ;;  %v6727_v32 = vpop.f32.mrf.mxu0  ;;  %v2698_v55 = vmul.f32 %v8403_v33, %v2670_v36 }
 0x325   : > { %v2635_v20 = vadd.f32 %v6723_v37, %v2570_v46  ;;  %v2751_v0 = vpack.c.bf16 %v2737_v22, %v2735_v23  ;;  %v2723_v12 = vadd.f32 %v8423_v41, %v2695_v29  ;;  %v2700_v46 = vmul.f32 %v8403_v33, %v2672_v58  ;;  %v2642_v27 = vpop.f32.mrf.mxu0 }
 0x326   : > { %v2726_v53 = vadd.f32 %v8415_v34, %v2698_v55 }
 0x327   : > { %2657 = vst [vmem:[%s7653_s30 + $0x68] sm:$0xff] %v2635_v20  ;;  %2925 = vmatprep.mubr.bf16.mxu1 %v2751_v0  ;;  %v2697_v7 = vmul.f32 %v8409_v14, %v2635_v20  ;;  %v2739_v24 = vmax.f32 %v2723_v12, 0.0  ;;  %v2728_v20 = vadd.f32 %v8415_v34, %v2700_v46 }
 0x328   : > { %2926 = vmatmul.mubr.bf16.vlgmr.msra.gmra.mxu1 %v2750_v17 }
 0x329   : > { %v2725_v31 = vadd.f32 %v8423_v41, %v2697_v7 }
 0x32b   : > { %v2741_v35 = vmax.f32 %v2725_v31, 0.0 }
 0x32c   : > { %v6490_v28 = vpop.f32.mrf.mxu1 }
 0x32d   : > { %v2753_v37 = vpack.c.bf16 %v2741_v35, %v2739_v24  ;;  %v2742_v24 = vmax.f32 %v2726_v53, 0.0  ;;  %v2744_v35 = vmax.f32 %v2728_v20, 0.0 }
 0x32e   : > { %v6491_v40 = vpop.f32.mrf.mxu1 }
 0x32f   : > { %2933 = vmatprep.mubr.bf16.mxu1 %v2753_v37  ;;  %v6492_v6 = vadd.f32 %v6491_v40, %v6490_v28  ;;  %v2676_v28 = vld [vmem:[%s7653_s30 + $0xe0] sm:$0xff]  ;;  %v2754_v46 = vpack.c.bf16 %v2744_v35, %v2742_v24  ;;  %v8487_v35 = vld [vmem:[%s9904_s13] ss:$0 sm:$0xff] }
 0x330   : > { %2934 = vmatmul.mubr.bf16.gmra.mxu1 %v2752_v30  ;;  %v6493_v8 = vpop.f32.mrf.mxu1  ;;  %v2674_v30 = vld [vmem:[%s7653_s30 + $0xc0] sm:$0xff] }
 0x331   : > { %v2575_v13 = vadd.f32 %v6492_v6, %v8400_v16 }
 0x332   : > { %v6494_v19 = vpop.f32.mrf.mxu1 }
 0x333   : > { %v2640_v23 = vadd.f32 %v2639_v47, %v2575_v13  ;;  %v6495_v22 = vadd.f32 %v6494_v19, %v6493_v8  ;;  %v2702_v8 = vmul.f32 %v8403_v33, %v2674_v30  ;;  %v2704_v13 = vmul.f32 %v8403_v33, %v2676_v28 }
 0x335   : > { %2658 = vst [vmem:[%s7653_s30 + $0x88] sm:$0xff] %v2640_v23  ;;  %v2578_v29 = vadd.f32 %v6495_v22, %v8400_v16  ;;  %v2699_v17 = vmul.f32 %v8409_v14, %v2640_v23 }
 0x337   : > { %v2643_v0 = vadd.f32 %v2642_v27, %v2578_v29  ;;  %v6496_v7 = vpop.f32.mrf.mxu1  ;;  %v2727_v52 = vadd.f32 %v8423_v41, %v2699_v17  ;;  %v2730_v17 = vadd.f32 %v8415_v34, %v2702_v8  ;;  %v2732_v27 = vadd.f32 %v8415_v34, %v2704_v13  ;;  %v6938_v34 = vld [vmem:[%s9906_s15 + $0x88] sm:$0xff]  }
 0x338   : > { %6728 = vmatprep.subr.bf16.mxu1 %v6938_v34 }
 0x339   : > { %2659 = vst [vmem:[%s7653_s30 + $0xa8] sm:$0xff] %v2643_v0  ;;  %v6497_v12 = vpop.f32.mrf.mxu1  ;;  %v2701_v11 = vmul.f32 %v8409_v14, %v2643_v0  ;;  %v2743_v36 = vmax.f32 %v2727_v52, 0.0  ;;  %v2748_v0 = vmax.f32 %v2732_v27, 0.0  ;;  %6729 = vmatpush3.bf16.msra.mxu1 %v6938_v34 }
 0x33a   : > { %v6498_v31 = vadd.f32 %v6497_v12, %v6496_v7 }
 0x33b   : > { %v6499_v37 = vpop.f32.mrf.mxu1  ;;  %v2729_v47 = vadd.f32 %v8423_v41, %v2701_v11 }
 0x33c   : > { %v2583_v40 = vadd.f32 %v6498_v31, %v8400_v16 }
 0x33d   : > { %v6500_v6 = vpop.f32.mrf.mxu1  ;;  %v2745_v58 = vmax.f32 %v2729_v47, 0.0  ;;  %v8493_v47 = vld [vmem:[%s9905_s14] ss:$0 sm:$0xff] }
 0x33e   : > { %v2648_v19 = vadd.f32 %v6726_v59, %v2583_v40  ;;  %v6501_v55 = vadd.f32 %v6500_v6, %v6499_v37  ;;  %v2746_v59 = vmax.f32 %v2730_v17, 0.0 }
 0x33f   : > { %v2755_v23 = vpack.c.bf16 %v2745_v58, %v2743_v36 }
 0x340   : > { %2660 = vst [vmem:[%s7653_s30 + $0xc8] sm:$0xff] %v2648_v19  ;;  %v2586_v22 = vadd.f32 %v6501_v55, %v8400_v16  ;;  %v2703_v29 = vmul.f32 %v8409_v14, %v2648_v19  ;;  %v2756_v11 = vpack.c.bf16 %v2748_v0, %v2746_v59 }
 0x341   : > { %2941 = vmatprep.mubr.bf16.mxu1 %v2755_v23 }
 0x342   : > { %v2651_v53 = vadd.f32 %v6727_v32, %v2586_v22  ;;  %2942 = vmatmul.mubr.bf16.gmra.mxu1 %v2754_v46  ;;  %v2731_v33 = vadd.f32 %v8423_v41, %v2703_v29 }
 0x344   : > { %2661 = vst [vmem:[%s7653_s30 + $0xe8] sm:$0xff] %v2651_v53  ;;  %v2705_v20 = vmul.f32 %v8409_v14, %v2651_v53  ;;  %v2747_v12 = vmax.f32 %v2731_v33, 0.0  ;;  %v6939_v14 = vld [vmem:[%s9906_s15 + $0x80] sm:$0xff]  }
 0x345   : > { %6730 = vmatprep.subr.bf16.mxu1 %v6939_v14 }
 0x346   : > { %v2733_v7 = vadd.f32 %v8423_v41, %v2705_v20  ;;  %6731 = vmatpush3.bf16.msra.mxu1 %v6939_v14  ;;  %v8482_v41 = vld [vmem:[%s9903_s12] ss:$0 sm:$0xff] }
 0x348   : > { %v2749_v16 = vmax.f32 %v2733_v7, 0.0 }
 0x34a   : > { %v2757_v52 = vpack.c.bf16 %v2749_v16, %v2747_v12 }
 0x34c   : > { %2949 = vmatprep.mubr.bf16.mxu1 %v2757_v52 }
 0x34d   : > { %2950 = vmatmul.mubr.bf16.gmra.mxu1 %v2756_v11 }
 0x3e8   : > { %v6524_v32 = vpop.f32.mrf.mxu1 }
 0x3ea   : > { %v6525_v31 = vpop.f32.mrf.mxu1 }
 0x3eb   : > { %v6526_v24 = vadd.f32 %v6525_v31, %v6524_v32 }
 0x3ec   : > { %v6527_v30 = vpop.f32.mrf.mxu1 }
 0x3ed   : > { %v2928_v28 = vadd.f32 %v6526_v24, %v8482_v41 }
 0x3ee   : > { %v6528_v37 = vpop.f32.mrf.mxu1 }
 0x3ef   : > { %v2965_v40 = vmul.f32 %v8487_v35, %v2928_v28  ;;  %v6529_v6 = vadd.f32 %v6528_v37, %v6527_v30 }
 0x3f0   : > { %v6530_v36 = vpop.f32.mrf.mxu1 }
 0x3f1   : > { %v2931_v58 = vadd.f32 %v6529_v6, %v8482_v41  ;;  %v2980_v8 = vadd.f32 %v8493_v47, %v2965_v40 }
 0x3f2   : > { %v6531_v13 = vpop.f32.mrf.mxu1 }
 0x3f3   : > { %v2966_v19 = vmul.f32 %v8487_v35, %v2931_v58  ;;  %v6532_v55 = vadd.f32 %v6531_v13, %v6530_v36  ;;  %v2988_v46 = vmax.f32 %v2980_v8, 0.0 }
 0x3f4   : > { %v6533_v23 = vpop.f32.mrf.mxu1 }
 0x3f5   : > { %v2936_v22 = vadd.f32 %v6532_v55, %v8482_v41  ;;  %v6433_v29 = vpack.c.bf16 %v2988_v46, %v2988_v46  ;;  %v2981_v17 = vadd.f32 %v8493_v47, %v2966_v19 }
 0x3f6   : > { %v6534_v27 = vpop.f32.mrf.mxu1 }
 0x3f7   : > { %v2967_v53 = vmul.f32 %v8487_v35, %v2936_v22  ;;  %v6535_v20 = vadd.f32 %v6534_v27, %v6533_v23  ;;  %3117 = vrot.lane.b32.xlu1 %v6433_v29, %s9951_s8  ;;  %3415 = vst.msk [vmem:[#allocation2 + $0x4] sm:$0xf] %vm860_vm0, %v6433_v29  ;;  %v2989_v33 = vmax.f32 %v2981_v17, 0.0 }
 0x3f9   : > { %v2939_v59 = vadd.f32 %v6535_v20, %v8482_v41  ;;  %v6434_v0 = vpack.c.bf16 %v2989_v33, %v2989_v33  ;;  %v2996_v7 = vpack.c.bf16 %v2989_v33, %v2988_v46  ;;  %v2982_v12 = vadd.f32 %v8493_v47, %v2967_v53 }
 0x3fb   : > { %v2968_v16 = vmul.f32 %v8487_v35, %v2939_v59  ;;  %3686 = vrot.lane.b32.xlu1 %v6434_v0, %s10028_s4  ;;  %v8509_v11 = vmul.bf16 %v2996_v7, %v7777_v21  ;;  %v3714_v52 = vmul.bf16 %v2996_v7, %v7743_v44  ;;  %3416 = vst.msk [vmem:[#allocation2 + $0x10] sm:$0xf] %vm860_vm0, %v6434_v0  ;;  %v2990_v34 = vmax.f32 %v2982_v12, 0.0 }
 0x3fc   : > { %v3145_v14 = vmul.bf16 %v2996_v7, %v7755_v61  ;;  %v3277_v32 = vmul.bf16 %v2996_v7, %v7791_v39  ;;  %v3560_v31 = vmul.bf16 %v2996_v7, %v7757_v62 }
 0x3fd   : > { %v8518_v24 = vcombine.low %v8509_v11, %v8509_v11  ;;  %v6260_v30 = vcombine.high %v3714_v52, %v3714_v52  ;;  %v6435_v28 = vpack.c.bf16 %v2990_v34, %v2990_v34  ;;  %v2983_v37 = vadd.f32 %v8493_v47, %v2968_v16 }
 0x3fe   : > { %v6226_v40 = vcombine.low %v3145_v14, %v3145_v14  ;;  %v8521_v6 = vcombine.low %v3277_v32, %v3277_v32  ;;  %v6251_v8 = vcombine.low %v3560_v31, %v3560_v31  ;;  %v6252_v12 = vcombine.high %v3560_v31, %v3560_v31 }
 0x3ff   : > { %v3737_v36 = vshrl.u32 %v6260_v30, 16  ;;  %v3740_v58 = vshll.u32 %v6260_v30, 16  ;;  %3688 = vrot.lane.b32.xlu0 %v6435_v28, %s10028_s4  ;;  %3417 = vst.msk [vmem:[#allocation2 + $0x1c] sm:$0xf] %vm860_vm0, %v6435_v28  ;;  %3119 = vrot.lane.b32.xlu1 %v6434_v0, %s9951_s8  ;;  %v3023_v13 = vshrl.u32 %v8518_v24, 16  ;;  %v2991_v19 = vmax.f32 %v2983_v37, 0.0 }
 0x400   : > { %v3170_v55 = vshll.u32 %v6226_v40, 16  ;;  %v3173_v46 = vshrl.u32 %v6226_v40, 16  ;;  %v3302_v29 = vshrl.u32 %v8521_v6, 16  ;;  %v8536_v0 = vcombine.high %v3145_v14, %v3145_v14  ;;  %v6943_v14 = vld [vmem:[%s9906_s15 + $0x78] sm:$0xff]  }
 0x401   : > { %v3739_v23 = vrot.slane %v3737_v36, 4  ;;  %v3742_v22 = vrot.slane %v3740_v58, 5  ;;  %v8528_v17 = vpack.c.bf16 %v2991_v19, %v2990_v34  ;;  %v6436_v27 = vpack.c.bf16 %v2991_v19, %v2991_v19  ;;  %6548 = vmatprep.subr.bf16.mxu0 %v6943_v14  ;;  %v6946_v14 = vld [vmem:[%s9906_s15 + $0x30] sm:$0xff]  }
 0x402   : > { %v8530_v53 = vrot.slane %v3170_v55, 5  ;;  %v8532_v20 = vrot.slane %v3173_v46, 4  ;;  %v6536_v59 = vpop.f32.mrf.mxu1  ;;  %v8539_v16 = vmul.bf16 %v2996_v7, %v7806_v45  ;;  %v8541_v52 = vrot.slane %v3023_v13, 7  ;;  %v6944_v7 = vld [vmem:[%s9906_s15 + $0x38] sm:$0xff]  }
 0x403   : > { %3121 = vrot.lane.b32.xlu0 %v6435_v28, %s9951_s8  ;;  %v3715_v34 = vmul.bf16 %v8528_v17, %v7755_v61  ;;  %3690 = vrot.lane.b32.xlu1 %v6436_v27, %s10028_s4  ;;  %3418 = vst.msk [vmem:[#allocation2 + $0x28] sm:$0xf] %vm860_vm0, %v6436_v27  ;;  %v3305_v30 = vshll.u32 %v8521_v6, 16  ;;  %v3585_v37 = vshrl.u32 %v6251_v8, 16  ;;  %v3743_v31 = vor.u32 %v3742_v22, %v3739_v23 }
 0x404   : > { %v6537_v28 = vpop.f32.mrf.mxu1  ;;  %v8556_v36 = vrot.slane %v3302_v29, 7  ;;  %v3590_v58 = vshrl.u32 %v6252_v12, 16  ;;  %v3593_v8 = vshll.u32 %v6252_v12, 16  ;;  %v8566_v23 = vmul.bf16 %v8528_v17, %v7802_v43  ;;  %6549 = vmatpush3.bf16.msra.mxu0 %v6944_v7 }
 0x405   : > { %v6261_v13 = vcombine.low %v3715_v34, %v3715_v34  ;;  %v8558_v19 = vcombine.high %v3715_v34, %v3715_v34  ;;  %v6538_v6 = vadd.f32 %v6537_v28, %v6536_v59  ;;  %v6259_v46 = vrot.slane %v3585_v37, 11  ;;  %v6945_v37 = vld [vmem:[%s9906_s15 + $0x70] sm:$0xff]  }
 0x406   : > { %v6539_v55 = vpop.f32.mrf.mxu1  ;;  %v8562_v33 = vrot.slane %v3590_v58, 7  ;;  %v6244_v22 = vcombine.high %v8539_v16, %v8539_v16  ;;  %v6235_v12 = vcombine.high %v3277_v32, %v3277_v32  ;;  %v3307_v43 = vor.u32 %v3305_v30, %v8556_v36  ;;  %6550 = vmatprep.subr.bf16.mxu0 %v6945_v37 }
 0x407   : > { %3243 = vrot.lane.b32.xlu0 %v8530_v53, %s10029_s5  ;;  %v3746_v29 = vshll.u32 %v6261_v13, 16  ;;  %v3750_v34 = vshrl.u32 %v6261_v13, 16  ;;  %v3756_v59 = vshll.u32 %v8558_v19, 16  ;;  %3123 = vrot.lane.b32.xlu1 %v6436_v27, %s9951_s8  ;;  %v2944_v28 = vadd.f32 %v6538_v6, %v8482_v41 }
 0x408   : > { %v6540_v58 = vpop.f32.mrf.mxu1  ;;  %v3595_v7 = vor.u32 %v3593_v8, %v8562_v33  ;;  %v8582_v13 = vcombine.low %v8566_v23, %v8566_v23  ;;  %v3457_v40 = vshll.u32 %v6244_v22, 16  ;;  %v3744_v27 = vrot.slane %v3743_v31, 4  ;;  %6551 = vmatpush3.bf16.msra.mxu0 %v6946_v14 }
 0x409   : > { %v3748_v32 = vrot.slane %v3746_v29, 5  ;;  %v3752_v45 = vrot.slane %v3750_v34, 4  ;;  %v8585_v39 = vrot.slane %v3756_v59, 5  ;;  %v3760_v62 = vshrl.u32 %v8558_v19, 16  ;;  %v6947_v19 = vld [vmem:[%s9906_s15 + $0x68] sm:$0xff]  }
 0x40a   : > { %v6541_v44 = vadd.f32 %v6540_v58, %v6539_v55  ;;  %v3596_v6 = vsel %vm7955_vm11, %v6259_v46, %v3595_v7  ;;  %v8594_v31 = vrot.slane %v3457_v40, 5  ;;  %v3461_v30 = vshrl.u32 %v6244_v22, 16  ;;  %v6948_v55 = vld [vmem:[%s9906_s15 + $0x28] sm:$0xff]   ;;  %6552 = vmatprep.subr.bf16.mxu0 %v6947_v19  ;;  %v6949_v19 = vld [vmem:[%s9906_s15 + $0x60] sm:$0xff]  }
 0x40b   : > { %v3753_v8 = vor.u32 %v3752_v45, %v3748_v32  ;;  %v3749_v61 = vsel %vm7898_vm7, %v3744_v27, %v3748_v32  ;;  %3371 = vrot.lane.b32.xlu1 %v3307_v43, %s10028_s4  ;;  %3652 = vrot.lane.b32.xlu0 %v3596_v6, %s10029_s5  ;;  %v2969_v45 = vmul.f32 %v8487_v35, %v2944_v28  ;;  %v3467_v43 = vshll.u32 %v8582_v13, 16 }
 0x40c   : > { %3812 = vst.msk [vmem:[#allocation2 + $0x8] sm:$0xf] %vm860_vm0, %v3749_v61  ;;  %v2947_v46 = vadd.f32 %v6541_v44, %v8482_v41  ;;  %v3310_v29 = vshrl.u32 %v6235_v12, 16  ;;  %v3463_v22 = vrot.slane %v3461_v30, 4  ;;  %v3308_v59 = vrot.slane %v8556_v36, 4  ;;  %6553 = vmatpush3.bf16.msra.mxu0 %v6948_v55  ;;  %v6950_v55 = vld [vmem:[%s9906_s15 + $0x20] sm:$0xff]  }
 0x40d   : > { %v3754_v40 = vrot.slane %v3753_v8, 4  ;;  %v6542_v34 = vpop.f32.mrf.mxu1  ;;  %v3313_v37 = vshll.u32 %v6235_v12, 16  ;;  %v8610_v58 = vrot.slane %v3467_v43, 5  ;;  %v8616_v44 = vmul.bf16 %v8528_v17, %v7762_v2  ;;  %6554 = vmatprep.subr.bf16.mxu0 %v6949_v19 }
 0x40e   : > { %v8608_v14 = vmul.f32 %v8487_v35, %v2947_v46  ;;  %v8612_v61 = vrot.slane %v3310_v29, 7  ;;  %v3464_v36 = vor.u32 %v3463_v22, %v8594_v31  ;;  %v3179_v7 = vshll.u32 %v8536_v0, 16 }
 0x40f   : > { %v3759_v28 = vsel %vm7898_vm7, %v3754_v40, %v8585_v39  ;;  %v6543_v12 = vpop.f32.mrf.mxu1  ;;  %v3183_v27 = vshrl.u32 %v8536_v0, 16  ;;  %v8628_v8 = vcombine.low %v8616_v44, %v8616_v44  ;;  %v2984_v30 = vadd.f32 %v8493_v47, %v2969_v45 }
 0x410   : > { %3813 = vst.msk [vmem:[#allocation2 + $0x14] sm:$0xf] %vm860_vm0, %v3759_v28  ;;  %v3315_v32 = vor.u32 %v3313_v37, %v8612_v61  ;;  %v6544_v6 = vadd.f32 %v6543_v12, %v6542_v34  ;;  %v3465_v0 = vrot.slane %v3464_v36, 4  ;;  %v8637_v43 = vrot.slane %v3179_v7, 5  ;;  %6555 = vmatpush3.bf16.msra.mxu0 %v6950_v55 }
 0x411   : > { %v6545_v46 = vpop.f32.mrf.mxu1  ;;  %v3185_v29 = vrot.slane %v3183_v27, 4  ;;  %v3561_v40 = vmul.bf16 %v8528_v17, %v7777_v21  ;;  %v3189_v22 = vshll.u32 %v8628_v8, 16  ;;  %v8645_v37 = vmax.f32 %v2984_v30, 0.0 }
 0x412   : > { %v3316_v34 = vsel %vm7955_vm11, %v3308_v59, %v3315_v32  ;;  %v2952_v45 = vadd.f32 %v6544_v6, %v8482_v41  ;;  %v8647_v28 = vrot.slane %v3760_v62, 4  ;;  %v3470_v36 = vsel %vm7898_vm7, %v3465_v0, %v8610_v58 }
 0x413   : > { %3373 = vrot.lane.b32.xlu0 %v3316_v34, %s10028_s4  ;;  %v3186_v12 = vor.u32 %v3185_v29, %v8637_v43  ;;  %v6546_v7 = vpop.f32.mrf.mxu1  ;;  %v6253_v27 = vcombine.low %v3561_v40, %v3561_v40  ;;  %3528 = vrot.lane.b32.xlu1 %v3470_v36, %s9951_s8  ;;  %v8656_v32 = vrot.slane %v3189_v22, 5  ;;  %v6437_v62 = vpack.c.bf16 %v8645_v37, %v8645_v37 }
 0x414   : > { %v2971_v59 = vmul.f32 %v8487_v35, %v2952_v45  ;;  %v6547_v6 = vadd.f32 %v6546_v7, %v6545_v46  ;;  %v3597_v19 = vrot.slane %v8562_v33, 4  ;;  %v6254_v34 = vcombine.high %v3561_v40, %v3561_v40  ;;  %v6951_v46 = vld [vmem:[%s9906_s15 + $0x58] sm:$0xff]  }
 0x415   : > { %v3187_v30 = vrot.slane %v3186_v12, 4  ;;  %v3599_v0 = vshrl.u32 %v6253_v27, 16  ;;  %3419 = vst.msk [vmem:[#allocation2 + $0x34] sm:$0xf] %vm860_vm0, %v6437_v62  ;;  %v3602_v55 = vshll.u32 %v6253_v27, 16  ;;  %v6243_v36 = vcombine.low %v8539_v16, %v8539_v16  ;;  %v6952_v33 = vld [vmem:[%s9906_s15 + $0x18] sm:$0xff]   ;;  %6556 = vmatprep.subr.bf16.mxu0 %v6951_v46 }
 0x416   : > { %v2955_v29 = vadd.f32 %v6547_v6, %v8482_v41  ;;  %v3278_v45 = vmul.bf16 %v8528_v17, %v7794_v10  ;;  %v3608_v16 = vshrl.u32 %v6254_v34, 16  ;;  %v2986_v12 = vadd.f32 %v8493_v47, %v2971_v59  ;;  %6557 = vmatpush3.bf16.msra.mxu0 %v6952_v33  ;;  %v6953_v59 = vld [vmem:[%s9906_s15 + $0x50] sm:$0xff]  }
 0x417   : > { %v3192_v40 = vsel %vm7898_vm7, %v3187_v30, %v8656_v32  ;;  %3692 = vrot.lane.b32.xlu0 %v6437_v62, %s10028_s4  ;;  %v3601_v41 = vrot.slane %v3599_v0, 7  ;;  %v6937_v22 = vld [vmem:[#allocation2 + $0x8] ss:$12 sps:$4 sm:$0xff]   ;;  %v3611_v27 = vshll.u32 %v6254_v34, 16  ;;  %v3448_v6 = vshrl.u32 %v6243_v36, 16  ;;  %6558 = vmatprep.subr.bf16.mxu0 %v6953_v59 }
 0x418   : > { %3247 = vrot.lane.b32.xlu1 %v3192_v40, %s10029_s5  ;;  %v2972_v7 = vmul.f32 %v8487_v35, %v2955_v29  ;;  %v3451_v21 = vshll.u32 %v6243_v36, 16  ;;  %6732 = vmatprep.mubr.msk.bf16.mxu1 %vm2511_vm9, %v6937_v22  ;;  %v8681_v30 = vrot.slane %v3608_v16, 7  ;;  %v6236_v51 = vcombine.low %v3278_v45, %v3278_v45  ;;  %v6954_v35 = vld [vmem:[%s9906_s15 + $0x10] sm:$0xff]   ;;  %v6956_v16 = vld [vmem:[%s9906_s15 + $0x8] sm:$0xff]  }
 0x419   : > { %v3604_v10 = vor.u32 %v3602_v55, %v3601_v41  ;;  %v3606_v50 = vrot.slane %v3601_v41, 4  ;;  %v3763_v0 = vor.u32 %v8647_v28, %v8585_v39  ;;  %v3450_v29 = vrot.slane %v3448_v6, 4  ;;  %v6955_v39 = vld [vmem:[%s9906_s15 + $0x48] sm:$0xff]  }
 0x41a   : > { %v2987_v34 = vadd.f32 %v8493_v47, %v2972_v7  ;;  %v3453_v55 = vrot.slane %v3451_v21, 5  ;;  %v3613_v46 = vor.u32 %v3611_v27, %v8681_v30  ;;  %v3319_v33 = vshrl.u32 %v6236_v51, 16  ;;  %6559 = vmatpush3.bf16.msra.mxu0 %v6954_v35 }
 0x41b   : > { %v3605_v36 = vsel %vm7955_vm11, %v3597_v19, %v3604_v10  ;;  %3125 = vrot.lane.b32.xlu0 %v6437_v62, %s9951_s8  ;;  %v10030_v40 = vor.u32 %v8532_v20, %v8530_v53  ;;  %v3322_v10 = vshll.u32 %v6236_v51, 16  ;;  %v2994_v19 = vmax.f32 %v2986_v12, 0.0  ;;  %6560 = vmatprep.subr.bf16.mxu0 %v6955_v39 }
 0x41c   : > { %v8702_v28 = vmax.f32 %v2987_v34, 0.0  ;;  %3654 = vrot.lane.b32.xlu1 %v3605_v36, %s10029_s5  ;;  %v3454_v21 = vor.u32 %v3453_v55, %v3450_v29  ;;  %v3614_v62 = vsel %vm7955_vm11, %v3606_v50, %v3613_v46  ;;  %v8707_v22 = vrot.slane %v3319_v33, 7  ;;  %v6957_v34 = vld [vmem:[%s9906_s15 + $0x40] sm:$0xff]  }
 0x41d   : > { %v3177_v41 = vrot.slane %v10030_v40, 4  ;;  %v2985_v53 = vadd.f32 %v8493_v47, %v8608_v14  ;;  %v8713_v20 = vcombine.high %v8566_v23, %v8566_v23  ;;  %v8721_v12 = vpack.c.bf16 %v2994_v19, %v2994_v19  ;;  %v6958_v55 = vld [vmem:[%s9906_s15] sm:$0xff]  }
 0x41e   : > { %v3455_v7 = vrot.slane %v3454_v21, 4  ;;  %v8719_v51 = vpack.c.bf16 %v8702_v28, %v2994_v19  ;;  %v3471_v50 = vshrl.u32 %v8582_v13, 16  ;;  %v3324_v47 = vor.u32 %v3322_v10, %v8707_v22  ;;  %6561 = vmatpush3.bf16.msra.mxu0 %v6956_v16 }
 0x41f   : > { %v2993_v14 = vmax.f32 %v2985_v53, 0.0  ;;  %v3477_v23 = vshll.u32 %v8713_v20, 16  ;;  %v6237_v27 = vcombine.high %v3278_v45, %v3278_v45  ;;  %v3317_v59 = vrot.slane %v8612_v61, 4  ;;  %3421 = vst.msk [vmem:[#allocation2 + $0x4c] sm:$0xf] %vm860_vm0, %v8721_v12  ;;  %6562 = vmatprep.subr.bf16.mxu0 %v6957_v34 }
 0x420   : > { %3656 = vrot.lane.b32.xlu1 %v3614_v62, %s10029_s5  ;;  %v3460_v6 = vsel %vm7898_vm7, %v3455_v7, %v8594_v31  ;;  %v3717_v35 = vmul.bf16 %v8719_v51, %v7766_v3  ;;  %v3473_v13 = vrot.slane %v3471_v50, 4  ;;  %v3764_v45 = vrot.slane %v3763_v0, 4 }
 0x421   : > { %3526 = vrot.lane.b32.xlu0 %v3460_v6, %s9951_s8  ;;  %v3182_v31 = vsel %vm7898_vm7, %v3177_v41, %v8637_v43  ;;  %v8743_v61 = vpack.c.bf16 %v2993_v14, %v8645_v37  ;;  %v6438_v29 = vpack.c.bf16 %v2993_v14, %v2993_v14  ;;  %v3325_v36 = vsel %vm7955_vm11, %v3317_v59, %v3324_v47 }
 0x422   : > { %v6265_v46 = vcombine.low %v3717_v35, %v3717_v35  ;;  %v6266_v0 = vcombine.high %v3717_v35, %v3717_v35  ;;  %v3474_v33 = vor.u32 %v3473_v13, %v8610_v58  ;;  %v8754_v37 = vrot.slane %v3477_v23, 5  ;;  %6563 = vmatpush3.bf16.msra.mxu0 %v6958_v55 }
 0x423   : > { %v3716_v43 = vmul.bf16 %v8743_v61, %v7762_v2  ;;  %3420 = vst.msk [vmem:[#allocation2 + $0x40] sm:$0xf] %vm860_vm0, %v6438_v29  ;;  %v3326_v40 = vrot.slane %v8707_v22, 4  ;;  %v3328_v41 = vshrl.u32 %v6237_v27, 16 }
 0x424   : > { %3375 = vrot.lane.b32.xlu1 %v3325_v36, %s10028_s4  ;;  %v3786_v39 = vshll.u32 %v6265_v46, 16  ;;  %v3790_v21 = vshrl.u32 %v6265_v46, 16  ;;  %v3796_v10 = vshll.u32 %v6266_v0, 16  ;;  %v3800_v19 = vshrl.u32 %v6266_v0, 16 }
 0x425   : > { %3245 = vrot.lane.b32.xlu0 %v3182_v31, %s10029_s5  ;;  %v6263_v58 = vcombine.low %v3716_v43, %v3716_v43  ;;  %v6264_v62 = vcombine.high %v3716_v43, %v3716_v43  ;;  %v3475_v53 = vrot.slane %v3474_v33, 4  ;;  %v8759_v16 = vrot.slane %v3328_v41, 7 }
 0x426   : > { %v3788_v7 = vrot.slane %v3786_v39, 5  ;;  %v3792_v50 = vrot.slane %v3790_v21, 4  ;;  %v3798_v47 = vrot.slane %v3796_v10, 5  ;;  %v3802_v14 = vrot.slane %v3800_v19, 4  ;;  %v3818_v21 = vld [vmem:[#allocation2 + $0x50] sm:$0xf] }
 0x427   : > { %v3766_v22 = vshll.u32 %v6263_v58, 16  ;;  %v3770_v23 = vshrl.u32 %v6263_v58, 16  ;;  %v3776_v6 = vshll.u32 %v6264_v62, 16  ;;  %v3780_v59 = vshrl.u32 %v6264_v62, 16 }
 0x428   : > { %v3793_v35 = vor.u32 %v3792_v50, %v3788_v7  ;;  %v3803_v13 = vor.u32 %v3802_v14, %v3798_v47  ;;  %3696 = vrot.lane.b32.xlu1 %v8721_v12, %s10028_s4  ;;  %v3480_v34 = vsel %vm7898_vm7, %v3475_v53, %v8754_v37  ;;  %v3331_v31 = vshll.u32 %v6237_v27, 16 }
 0x429   : > { %v3768_v36 = vrot.slane %v3766_v22, 5  ;;  %v3772_v55 = vrot.slane %v3770_v23, 4  ;;  %v3778_v46 = vrot.slane %v3776_v6, 5  ;;  %v3782_v0 = vrot.slane %v3780_v59, 4  ;;  %3694 = vrot.lane.b32.xlu0 %v6438_v29, %s10028_s4 }
 0x42a   : > { %v3794_v33 = vrot.slane %v3793_v35, 4  ;;  %v3804_v43 = vrot.slane %v3803_v13, 4  ;;  %v3333_v41 = vor.u32 %v3331_v31, %v8759_v16  ;;  %v3279_v39 = vmul.bf16 %v8743_v61, %v7842_v26 }
 0x42b   : > { %v3769_v10 = vsel %vm7898_vm7, %v3764_v45, %v3768_v36  ;;  %v3773_v19 = vor.u32 %v3772_v55, %v3768_v36  ;;  %v3783_v58 = vor.u32 %v3782_v0, %v3778_v46  ;;  %v8774_v27 = vcombine.high %v8616_v44, %v8616_v44 }
 0x42c   : > { %v3799_v62 = vsel %vm7898_vm7, %v3794_v33, %v3798_v47  ;;  %v3819_v53 = vsel %vm7945_vm10, %v3804_v43, %v3818_v21  ;;  %3814 = vst.msk [vmem:[#allocation2 + $0x20] sm:$0xf] %vm860_vm0, %v3769_v10  ;;  %3129 = vrot.lane.b32.xlu1 %v8721_v12, %s9951_s8  ;;  %v3334_v45 = vsel %vm7955_vm11, %v3326_v40, %v3333_v41  ;;  %v3193_v22 = vshrl.u32 %v8628_v8, 16 }
 0x42d   : > { %v8785_v50 = vcombine.low %v3279_v39, %v3279_v39  ;;  %3817 = vst.msk [vmem:[#allocation2 + $0x44] sm:$0xf] %vm860_vm0, %v3799_v62  ;;  %3820 = vst [vmem:[#allocation2 + $0x50] sm:$0xf] %v3819_v53  ;;  %v3774_v44 = vrot.slane %v3773_v19, 4  ;;  %v3784_v14 = vrot.slane %v3783_v58, 4  ;;  %3127 = vrot.lane.b32.xlu0 %v6438_v29, %s9951_s8  ;;  %v6239_v47 = vcombine.high %v3279_v39, %v3279_v39 }
 0x42e   : > { %v3199_v6 = vshll.u32 %v8774_v27, 16  ;;  %v3425_v12 = vmul.bf16 %v8743_v61, %v7826_v63  ;;  %v3481_v40 = vshrl.u32 %v8713_v20, 16  ;;  %v3195_v31 = vrot.slane %v3193_v22, 4 }
 0x42f   : > { %v3337_v23 = vshrl.u32 %v8785_v50, 16  ;;  %v3779_v59 = vsel %vm7898_vm7, %v3774_v44, %v3778_v46  ;;  %v3789_v35 = vsel %vm7898_vm7, %v3784_v14, %v3788_v7  ;;  %v3346_v13 = vshrl.u32 %v6239_v47, 16 }
 0x430   : > { %v3349_v29 = vshll.u32 %v6239_v47, 16  ;;  %3815 = vst.msk [vmem:[#allocation2 + $0x2c] sm:$0xf] %vm860_vm0, %v3779_v59  ;;  %3816 = vst.msk [vmem:[#allocation2 + $0x38] sm:$0xf] %vm860_vm0, %v3789_v35  ;;  %3530 = vrot.lane.b32.xlu1 %v3480_v34, %s9951_s8  ;;  %v3201_v36 = vrot.slane %v3199_v6, 5  ;;  %v6247_v55 = vcombine.low %v3425_v12, %v3425_v12  ;;  %v8807_v46 = vcombine.high %v3425_v12, %v3425_v12 }
 0x431   : > { %v8802_v8 = vrot.slane %v3337_v23, 7  ;;  %3377 = vrot.lane.b32.xlu0 %v3334_v45, %s10028_s4  ;;  %v8805_v20 = vrot.slane %v3346_v13, 7  ;;  %v3483_v7 = vrot.slane %v3481_v40, 4  ;;  %v3147_v0 = vmul.bf16 %v8743_v61, %v7766_v3 }
 0x432   : > { %v3196_v43 = vor.u32 %v3195_v31, %v8656_v32  ;;  %v3487_v34 = vshll.u32 %v6247_v55, 16  ;;  %v3491_v41 = vshrl.u32 %v6247_v55, 16  ;;  %v3497_v21 = vshll.u32 %v8807_v46, 16 }
 0x433   : > { %v3344_v33 = vrot.slane %v8802_v8, 4  ;;  %v3351_v39 = vor.u32 %v3349_v29, %v8805_v20  ;;  %v3484_v10 = vor.u32 %v3483_v7, %v8754_v37  ;;  %v6230_v19 = vcombine.low %v3147_v0, %v3147_v0 }
 0x434   : > { %v3197_v58 = vrot.slane %v3196_v43, 4  ;;  %v3489_v62 = vrot.slane %v3487_v34, 5  ;;  %v3493_v53 = vrot.slane %v3491_v41, 4  ;;  %v6231_v45 = vcombine.high %v3147_v0, %v3147_v0 }
 0x435   : > { %v3352_v44 = vsel %vm7955_vm11, %v3344_v33, %v3351_v39  ;;  %v8818_v14 = vrot.slane %v3497_v21, 5  ;;  %v3485_v47 = vrot.slane %v3484_v10, 4  ;;  %v3209_v32 = vshll.u32 %v6230_v19, 16 }
 0x436   : > { %3381 = vrot.lane.b32.xlu1 %v3352_v44, %s10028_s4  ;;  %v3202_v22 = vsel %vm7898_vm7, %v3197_v58, %v3201_v36  ;;  %v3494_v23 = vor.u32 %v3493_v53, %v3489_v62  ;;  %v3213_v6 = vshrl.u32 %v6230_v19, 16  ;;  %v3219_v37 = vshll.u32 %v6231_v45, 16 }
 0x437   : > { %v10031_v12 = vshll.u32 %v8518_v24, 16  ;;  %v6940_v59 = vld [vmem:[#allocation2 + $0x20] ss:$12 sps:$4 sm:$0xff]   ;;  %3249 = vrot.lane.b32.xlu0 %v3202_v22, %s10029_s5  ;;  %v3211_v35 = vrot.slane %v3209_v32, 5  ;;  %v3203_v13 = vshrl.u32 %v8774_v27, 16  ;;  %v8832_v29 = vmul.bf16 %v8719_v51, %v7745_v54 }
 0x438   : > { %v3495_v31 = vrot.slane %v3494_v23, 4  ;;  %v3215_v55 = vrot.slane %v3213_v6, 4  ;;  %v3221_v7 = vrot.slane %v3219_v37, 5  ;;  %v3223_v0 = vshrl.u32 %v6231_v45, 16  ;;  %6733 = vmatmul.mubr.msk.bf16.vlgmr.msra.gmra.mxu1 %vm2511_vm9, %v6940_v59  ;;  %v6941_v43 = vld [vmem:[#allocation2 + $0x38] ss:$12 sps:$4 sm:$0xff]  }
 0x439   : > { %v8826_v40 = vor.u32 %v10031_v12, %v8541_v52  ;;  %v3490_v24 = vsel %vm7898_vm7, %v3485_v47, %v3489_v62  ;;  %v3205_v33 = vrot.slane %v3203_v13, 4  ;;  %v8839_v34 = vcombine.low %v8832_v29, %v8832_v29  ;;  %6736 = vmatprep.mubr.msk.bf16.mxu1 %vm2511_vm9, %v6941_v43  ;;  %v6942_v23 = vld [vmem:[#allocation2 + $0x50] ss:$12 sps:$4 sm:$0xff]  }
 0x43a   : > { %v3562_v27 = vmul.bf16 %v8743_v61, %v7816_v57  ;;  %v3500_v41 = vsel %vm7898_vm7, %v3495_v31, %v8818_v14  ;;  %v3216_v39 = vor.u32 %v3215_v55, %v3211_v35  ;;  %v3225_v21 = vrot.slane %v3223_v0, 4 }
 0x43b   : > { %v3563_v10 = vmul.bf16 %v8719_v51, %v7839_v4  ;;  %3534 = vrot.lane.b32.xlu1 %v3500_v41, %s9951_s8  ;;  %3532 = vrot.lane.b32.xlu0 %v3490_v24, %s9951_s8  ;;  %v3206_v19 = vor.u32 %v3205_v33, %v3201_v36  ;;  %v3229_v58 = vshll.u32 %v8839_v34, 16  ;;  %v3003_v45 = vmul.bf16 %v8719_v51, %v7818_v9 }
 0x43c   : > { %v6255_v62 = vcombine.low %v3562_v27, %v3562_v27  ;;  %v6256_v53 = vcombine.high %v3562_v27, %v3562_v27  ;;  %v3217_v44 = vrot.slane %v3216_v39, 4  ;;  %v3226_v47 = vor.u32 %v3225_v21, %v3221_v7 }
 0x43d   : > { %v6257_v32 = vcombine.low %v3563_v10, %v3563_v10  ;;  %v3207_v22 = vrot.slane %v3206_v19, 4  ;;  %v8854_v6 = vrot.slane %v3229_v58, 5  ;;  %v3426_v36 = vmul.bf16 %v8719_v51, %v7829_v5 }
 0x43e   : > { %v3617_v37 = vshrl.u32 %v6255_v62, 16  ;;  %v3222_v12 = vsel %vm7898_vm7, %v3217_v44, %v3221_v7  ;;  %v3620_v59 = vshll.u32 %v6255_v62, 16  ;;  %v3626_v13 = vshrl.u32 %v6256_v53, 16 }
 0x43f   : > { %v3635_v31 = vshrl.u32 %v6257_v32, 16  ;;  %3253 = vrot.lane.b32.xlu1 %v3222_v12, %s10029_s5  ;;  %v3212_v55 = vsel %vm7898_vm7, %v3207_v22, %v3211_v35  ;;  %v3227_v0 = vrot.slane %v3226_v47, 4  ;;  %v3638_v33 = vshll.u32 %v6257_v32, 16 }
 0x440   : > { %v3619_v24 = vrot.slane %v3617_v37, 7  ;;  %3251 = vrot.lane.b32.xlu0 %v3212_v55, %s10029_s5  ;;  %v3628_v43 = vrot.slane %v3626_v13, 7  ;;  %v3629_v41 = vshll.u32 %v6256_v53, 16  ;;  %v6250_v39 = vcombine.high %v3426_v36, %v3426_v36  ;;  %6737 = vmatmul.mubr.msk.bf16.gmra.mxu1 %vm2511_vm9, %v6942_v23 }
 0x441   : > { %v8864_v27 = vrot.slane %v3635_v31, 7  ;;  %v3232_v7 = vsel %vm7898_vm7, %v3227_v0, %v8854_v6  ;;  %v3615_v21 = vrot.slane %v8681_v30, 4  ;;  %v3340_v47 = vshll.u32 %v8785_v50, 16 }
 0x442   : > { %v3622_v19 = vor.u32 %v3620_v59, %v3619_v24  ;;  %v3624_v35 = vrot.slane %v3619_v24, 4  ;;  %v3631_v62 = vor.u32 %v3629_v41, %v3628_v43  ;;  %v3517_v44 = vshll.u32 %v6250_v39, 16 }
 0x443   : > { %v3640_v58 = vor.u32 %v3638_v33, %v8864_v27  ;;  %3255 = vrot.lane.b32.xlu1 %v3232_v7, %s10029_s5  ;;  %v3633_v32 = vrot.slane %v3628_v43, 4  ;;  %v3521_v22 = vshrl.u32 %v6250_v39, 16  ;;  %v6258_v23 = vcombine.high %v3563_v10, %v3563_v10 }
 0x444   : > { %v3623_v53 = vsel %vm7955_vm11, %v3615_v21, %v3622_v19  ;;  %v8878_v37 = vmul.bf16 %v8528_v17, %v7816_v57  ;;  %v8880_v30 = vcombine.low %v3003_v45, %v3003_v45  ;;  %v8883_v12 = vrot.slane %v3517_v44, 5  ;;  %v6965_v17 = vld [vmem:[%s9910_s19 + $0x78] sm:$0xff]  }
 0x445   : > { %3658 = vrot.lane.b32.xlu0 %v3623_v53, %s10029_s5  ;;  %v3342_v50 = vor.u32 %v3340_v47, %v8802_v8  ;;  %v3641_v59 = vsel %vm7955_vm11, %v3633_v32, %v3640_v58  ;;  %v3632_v13 = vsel %vm7955_vm11, %v3624_v35, %v3631_v62  ;;  %v3523_v31 = vrot.slane %v3521_v22, 4  ;;  %6594 = vmatprep.subr.bf16.mxu0 %v6965_v17  ;;  %v3090_v32 = vld [vmem:[#allocation2 + $0xc] sm:$0xf] }
 0x446   : > { %v3644_v10 = vshrl.u32 %v6258_v23, 16  ;;  %v3647_v45 = vshll.u32 %v6258_v23, 16  ;;  %v6249_v55 = vcombine.low %v3426_v36, %v3426_v36  ;;  %v3501_v0 = vshrl.u32 %v8807_v46, 16 }
 0x447   : > { %v3280_v24 = vmul.bf16 %v8719_v51, %v7870_v1  ;;  %3662 = vrot.lane.b32.xlu1 %v3641_v59, %s10029_s5  ;;  %v3524_v8 = vor.u32 %v3523_v31, %v8883_v12  ;;  %v8900_v43 = vpack.c.bf16 %v8702_v28, %v8702_v28  ;;  %v6233_v41 = vcombine.high %v8832_v29, %v8832_v29 }
 0x448   : > { %v3646_v33 = vrot.slane %v3644_v10, 7  ;;  %v3503_v36 = vrot.slane %v3501_v0, 4  ;;  %v3507_v46 = vshll.u32 %v6249_v55, 16  ;;  %v3511_v7 = vshrl.u32 %v6249_v55, 16 }
 0x449   : > { %3660 = vrot.lane.b32.xlu0 %v3632_v13, %s10029_s5  ;;  %v6240_v39 = vcombine.low %v3280_v24, %v3280_v24  ;;  %v3525_v51 = vrot.slane %v3524_v8, 4  ;;  %v3335_v21 = vrot.slane %v8759_v16, 4  ;;  %v3642_v19 = vrot.slane %v8864_v27, 4  ;;  %3422 = vst.msk [vmem:[#allocation2 + $0x58] sm:$0xf] %vm860_vm0, %v8900_v43 }
 0x44a   : > { %v3233_v28 = vshrl.u32 %v8839_v34, 16  ;;  %v3649_v35 = vor.u32 %v3647_v45, %v3646_v33  ;;  %v3504_v29 = vor.u32 %v3503_v36, %v8818_v14  ;;  %v3509_v47 = vrot.slane %v3507_v46, 5 }
 0x44b   : > { %v3355_v58 = vshrl.u32 %v6240_v39, 16  ;;  %v3358_v62 = vshll.u32 %v6240_v39, 16  ;;  %3540 = vrot.lane.b32.xlu1 %v3525_v51, %s9951_s8  ;;  %v3343_v44 = vsel %vm7955_vm11, %v3335_v21, %v3342_v50  ;;  %v3513_v53 = vrot.slane %v3511_v7, 4 }
 0x44c   : > { %v3235_v16 = vrot.slane %v3233_v28, 4  ;;  %v8917_v22 = vshll.u32 %v6233_v41, 16  ;;  %v8919_v34 = vcombine.high %v3280_v24, %v3280_v24  ;;  %v3091_v14 = vsel %vm8242_vm13, %v8826_v40, %v3090_v32 }
 0x44d   : > { %3379 = vrot.lane.b32.xlu0 %v3343_v44, %s10028_s4  ;;  %v8915_v27 = vrot.slane %v3355_v58, 7  ;;  %v3505_v23 = vrot.slane %v3504_v29, 4  ;;  %v3514_v59 = vor.u32 %v3513_v53, %v3509_v47  ;;  %3092 = vst [vmem:[#allocation2 + $0xc] sm:$0xf] %v3091_v14  ;;  %v6213_v13 = vcombine.high %v8509_v11, %v8509_v11 }
 0x44e   : > { %v3236_v50 = vor.u32 %v3235_v16, %v8854_v6  ;;  %v3002_v31 = vmul.bf16 %v8743_v61, %v7839_v4  ;;  %v3650_v10 = vsel %vm7955_vm11, %v3642_v19, %v3649_v35  ;;  %v3353_v17 = vrot.slane %v8805_v20, 4 }
 0x44f   : > { %v3360_v45 = vor.u32 %v3358_v62, %v8915_v27  ;;  %3664 = vrot.lane.b32.xlu1 %v3650_v10, %s10029_s5  ;;  %v3510_v40 = vsel %vm7898_vm7, %v3505_v23, %v3509_v47  ;;  %v3651_v6 = vrot.slane %v3646_v33, 4  ;;  %v3515_v55 = vrot.slane %v3514_v59, 4 }
 0x450   : > { %v3364_v0 = vshrl.u32 %v8919_v34, 16  ;;  %v3237_v11 = vrot.slane %v3236_v50, 4  ;;  %v3241_v61 = vrot.slane %v8917_v22, 5  ;;  %v3367_v24 = vshll.u32 %v8919_v34, 16 }
 0x451   : > { %3536 = vrot.lane.b32.xlu0 %v3510_v40, %s9951_s8  ;;  %v3031_v8 = vshrl.u32 %v6213_v13, 16  ;;  %v3361_v20 = vsel %vm7955_vm11, %v3353_v17, %v3360_v45  ;;  %v3029_v41 = vrot.slane %v8541_v52, 4  ;;  %v6214_v36 = vcombine.low %v8878_v37, %v8878_v37 }
 0x452   : > { %v6215_v33 = vcombine.high %v8878_v37, %v8878_v37  ;;  %v3034_v39 = vshll.u32 %v6213_v13, 16  ;;  %v6216_v7 = vcombine.low %v3002_v31, %v3002_v31  ;;  %v6217_v51 = vcombine.high %v3002_v31, %v3002_v31 }
 0x453   : > { %v3033_v46 = vrot.slane %v3031_v8, 7  ;;  %3383 = vrot.lane.b32.xlu1 %v3361_v20, %s10028_s4  ;;  %v3520_v21 = vsel %vm7898_vm7, %v3515_v55, %v8883_v12  ;;  %v3366_v19 = vrot.slane %v3364_v0, 7  ;;  %v3040_v28 = vshrl.u32 %v6214_v36, 16 }
 0x454   : > { %v3049_v35 = vshrl.u32 %v6215_v33, 16  ;;  %v3043_v29 = vshll.u32 %v6214_v36, 16  ;;  %v3052_v58 = vshll.u32 %v6215_v33, 16  ;;  %v3058_v62 = vshrl.u32 %v6216_v7, 16 }
 0x455   : > { %3666 = vrot.lane.b32.xlu0 %v3651_v6, %s10029_s5  ;;  %v3036_v52 = vor.u32 %v3034_v39, %v3033_v46  ;;  %v3042_v37 = vrot.slane %v3040_v28, 7  ;;  %v3061_v47 = vshll.u32 %v6216_v7, 16  ;;  %v3067_v53 = vshrl.u32 %v6217_v51, 16 }
 0x456   : > { %v3051_v44 = vrot.slane %v3049_v35, 7  ;;  %v3060_v32 = vrot.slane %v3058_v62, 7  ;;  %v3076_v22 = vshrl.u32 %v8880_v30, 16  ;;  %v3079_v12 = vshll.u32 %v8880_v30, 16 }
 0x457   : > { %v3037_v16 = vsel %vm7955_vm11, %v3029_v41, %v3036_v52  ;;  %3698 = vrot.lane.b32.xlu1 %v8900_v43, %s10028_s4  ;;  %v3038_v34 = vrot.slane %v3033_v46, 4  ;;  %v3045_v14 = vor.u32 %v3043_v29, %v3042_v37  ;;  %v3047_v23 = vrot.slane %v3042_v37, 4 }
 0x458   : > { %3093 = vst.msk [vmem:[#allocation2 + $0x18] sm:$0xf] %vm860_vm0, %v3037_v16  ;;  %v3054_v59 = vor.u32 %v3052_v58, %v3051_v44  ;;  %v3056_v50 = vrot.slane %v3051_v44, 4  ;;  %v3063_v13 = vor.u32 %v3061_v47, %v3060_v32  ;;  %v3069_v31 = vrot.slane %v3067_v53, 7 }
 0x459   : > { %3538 = vrot.lane.b32.xlu0 %v3520_v21, %s9951_s8  ;;  %v3078_v10 = vrot.slane %v3076_v22, 7  ;;  %v3046_v17 = vsel %vm7955_vm11, %v3038_v34, %v3045_v14  ;;  %v3065_v45 = vrot.slane %v3060_v32, 4  ;;  %v3070_v43 = vshll.u32 %v6217_v51, 16  ;;  %v3267_v51 = vld [vmem:[#allocation2] sm:$0x8] }
 0x45a   : > { %v3055_v30 = vsel %vm7955_vm11, %v3047_v23, %v3054_v59  ;;  %3094 = vst.msk [vmem:[#allocation2 + $0x24] sm:$0xf] %vm860_vm0, %v3046_v17  ;;  %v3064_v40 = vsel %vm7955_vm11, %v3056_v50, %v3063_v13  ;;  %v3074_v6 = vrot.slane %v3069_v31, 4  ;;  %v3242_v0 = vsel %vm7898_vm7, %v3237_v11, %v3241_v61  ;;  %v6966_v13 = vld [vmem:[%s9910_s19 + $0x38] sm:$0xff]   ;;  %v6967_v17 = vld [vmem:[%s9910_s19 + $0x70] sm:$0xff]  }
 0x45b   : > { %3095 = vst.msk [vmem:[#allocation2 + $0x30] sm:$0xf] %vm860_vm0, %v3055_v30  ;;  %v3081_v55 = vor.u32 %v3079_v12, %v3078_v10  ;;  %v3362_v8 = vrot.slane %v8915_v27, 4  ;;  %v3369_v20 = vor.u32 %v3367_v24, %v3366_v19  ;;  %3096 = vst.msk [vmem:[#allocation2 + $0x3c] sm:$0xf] %vm860_vm0, %v3064_v40  ;;  %v3072_v41 = vor.u32 %v3070_v43, %v3069_v31  ;;  %v6968_v43 = vld [vmem:[%s9910_s19 + $0x30] sm:$0xff]  }
 0x45c   : > { %v6969_v40 = vld [vmem:[%s9910_s19 + $0x68] sm:$0xff]  }
 0x45d   : > { %3257 = vrot.lane.b32.xlu0 %v3242_v0, %s10029_s5  ;;  %v3082_v36 = vsel %vm7955_vm11, %v3074_v6, %v3081_v55  ;;  %v3073_v33 = vsel %vm7955_vm11, %v3065_v45, %v3072_v41  ;;  %v3370_v11 = vsel %vm7955_vm11, %v3362_v8, %v3369_v20  ;;  %v6972_v55 = vld [vmem:[%s9910_s19 + $0x28] sm:$0xff]   ;;  %v6974_v8 = vld [vmem:[%s9910_s19 + $0x60] sm:$0xff]  }
 0x45e   : > { %3098 = vst.msk [vmem:[#allocation2 + $0x54] sm:$0xf] %vm860_vm0, %v3082_v36  ;;  %3097 = vst.msk [vmem:[#allocation2 + $0x48] sm:$0xf] %vm860_vm0, %v3073_v33  ;;  %v6975_v20 = vld [vmem:[%s9910_s19 + $0x20] sm:$0xff]   ;;  %v6976_v33 = vld [vmem:[%s9910_s19 + $0x58] sm:$0xff]  }
 0x461   : > { %3385 = vrot.lane.b32.xlu0 %v3370_v11, %s10028_s4  ;;  %v6977_v11 = vld [vmem:[%s9910_s19 + $0x18] sm:$0xff]  }
 0x469   : > { %v3118_v27 = vpop.permute.xlu1 %3117 }
 0x46a   : > { %3138 = vst.msk [vmem:[#allocation2 + $0xc] sm:$0xf] %vm1513_vm14, %v3118_v27 }
 0x46d   : > { %v3687_v61 = vpop.permute.xlu1 %3686 }
 0x471   : > { %v3689_v24 = vpop.permute.xlu0 %3688  ;;  %v3120_v46 = vpop.permute.xlu1 %3119 }
 0x472   : > { %3139 = vst.msk [vmem:[#allocation2 + $0x18] sm:$0xf] %vm1513_vm14, %v3120_v46  ;;  %v6979_v46 = vld [vmem:[%s9910_s19 + $0x10] sm:$0xff]  }
 0x475   : > { %v3122_v39 = vpop.permute.xlu0 %3121  ;;  %v3691_v7 = vpop.permute.xlu1 %3690 }
 0x476   : > { %3140 = vst.msk [vmem:[#allocation2 + $0x24] sm:$0xf] %vm1513_vm14, %v3122_v39 }
 0x479   : > { %v3244_v21 = vpop.permute.xlu0 %3243  ;;  %v3124_v19 = vpop.permute.xlu1 %3123 }
 0x47a   : > { %v3268_v28 = vsel %vm8273_vm2, %v3244_v21, %v3267_v51  ;;  %3141 = vst.msk [vmem:[#allocation2 + $0x30] sm:$0xf] %vm1513_vm14, %v3124_v19  ;;  %v6984_v21 = vld [vmem:[%s9910_s19 + $0x8] sm:$0xff]  }
 0x47b   : > { %3269 = vst [vmem:[#allocation2] sm:$0x8] %v3268_v28  ;;  %v6985_v28 = vld [vmem:[%s9910_s19 + $0x40] sm:$0xff]  }
 0x47d   : > { %v3653_v35 = vpop.permute.xlu0 %3652  ;;  %v3372_v52 = vpop.permute.xlu1 %3371 }
 0x482   : > { %v3395_v29 = vld [vmem:[#allocation2] sm:$0xf] }
 0x483   : > { %v3396_v58 = vsel %vm8287_vm6, %v3372_v52, %v3395_v29  ;;  %v6986_v52 = vld [vmem:[%s9910_s19] sm:$0xff]   ;;  %v3557_v29 = vld [vmem:[#allocation2 + $0x58] sm:$0xf] }
 0x484   : > { %3397 = vst [vmem:[#allocation2] sm:$0xf] %v3396_v58 }
 0x485   : > { %v3374_v62 = vpop.permute.xlu0 %3373  ;;  %v3529_v37 = vpop.permute.xlu1 %3528 }
 0x486   : > { %3551 = vst.msk [vmem:[#allocation2 + $0x10] sm:$0xf] %vm1513_vm14, %v3529_v37 }
 0x489   : > { %v8991_v44 = vpop.permute.xlu0 %3692 }
 0x48a   : > { %v3248_v47 = vpop.permute.xlu1 %3247 }
 0x48b   : > { %3271 = vst.msk [vmem:[#allocation2 + $0x18] sm:$0xf] %vm1691_vm8, %v3248_v47 }
 0x48d   : > { %v3126_v53 = vpop.permute.xlu0 %3125 }
 0x48e   : > { %v3655_v16 = vpop.permute.xlu1 %3654  ;;  %3142 = vst.msk [vmem:[#allocation2 + $0x3c] sm:$0xf] %vm1513_vm14, %v3126_v53 }
 0x48f   : > { %3677 = vst.msk [vmem:[#allocation2 + $0x10] sm:$0xf] %vm1691_vm8, %v3655_v16 }
 0x490   : > { %3708 = vst.msk [vmem:[#allocation2 + $0x10] sm:$0xf] %vm1833_vm5, %v3689_v24 }
 0x492   : > { %v3657_v32 = vpop.permute.xlu1 %3656 }
 0x493   : > { %v3527_v22 = vpop.permute.xlu0 %3526 }
 0x494   : > { %3550 = vst.msk [vmem:[#allocation2 + $0x4] sm:$0xf] %vm1513_vm14, %v3527_v22 }
 0x495   : > { %3676 = vst.msk [vmem:[#allocation2 + $0x4] sm:$0xf] %vm1691_vm8, %v3653_v35 }
 0x496   : > { %3707 = vst.msk [vmem:[#allocation2 + $0x4] sm:$0xf] %vm1833_vm5, %v3687_v61  ;;  %v3376_v12 = vpop.permute.xlu1 %3375  ;;  %v6978_v61 = vld [vmem:[%s9910_s19 + $0x50] sm:$0xff]  }
 0x497   : > { %3399 = vst.msk [vmem:[#allocation2 + $0x18] sm:$0xf] %vm1833_vm5, %v3376_v12  ;;  %v3246_v34 = vpop.permute.xlu0 %3245 }
 0x498   : > { %3270 = vst.msk [vmem:[#allocation2 + $0xc] sm:$0xf] %vm1691_vm8, %v3246_v34 }
 0x499   : > { %3398 = vst.msk [vmem:[#allocation2 + $0xc] sm:$0xf] %vm1833_vm5, %v3374_v62 }
 0x49a   : > { %v9003_v14 = vpop.permute.xlu1 %3696 }
 0x49b   : > { %v3695_v23 = vpop.permute.xlu0 %3694 }
 0x49d   : > { %v6959_v31 = vld [vmem:[#allocation2 + $0x4] ss:$12 sps:$4 sm:$0xff]  }
 0x49e   : > { %v3130_v59 = vpop.permute.xlu1 %3129  ;;  %4092 = vmatprep.mubr.bf16.mxu0 %v6959_v31  ;;  %v4202_v31 = vld [vmem:[%s7653_s30 + $0x28] sm:$0xff] }
 0x49f   : > { %3144 = vst.msk [vmem:[#allocation2 + $0x54] sm:$0xf] %vm1513_vm14, %v3130_v59  ;;  %v3128_v50 = vpop.permute.xlu0 %3127  ;;  %v9082_v59 = vld [vmem:[%s9908_s17] sm:$0x7] }
 0x4a0   : > { %3143 = vst.msk [vmem:[#allocation2 + $0x48] sm:$0xf] %vm1513_vm14, %v3128_v50  ;;  %v6961_v10 = vld [vmem:[#allocation2] ss:$12 sps:$4 sm:$0xff]  }
 0x4a1   : > { %4093 = vmatmul.mubr.bf16.vlgmr.msra.gmra.mxu0 %v6961_v10 }
 0x4a2   : > { %v3531_v30 = vpop.permute.xlu1 %3530  ;;  %6595 = vmatpush3.bf16.msra.mxu0 %v6966_v13 }
 0x4a3   : > { %3552 = vst.msk [vmem:[#allocation2 + $0x1c] sm:$0xf] %vm1513_vm14, %v3531_v30  ;;  %v3378_v45 = vpop.permute.xlu0 %3377  ;;  %6596 = vmatprep.subr.bf16.mxu0 %v6967_v17  ;;  %v9089_v17 = vrot.slane %v9082_v59, %v8398_v18  ;;  %v4199_v30 = vld [vmem:[%s7653_s30 + $0x8] sm:$0xff] }
 0x4a4   : > { %3678 = vst.msk [vmem:[#allocation2 + $0x1c] sm:$0xf] %vm1691_vm8, %v3657_v32 }
 0x4a5   : > { %3709 = vst.msk [vmem:[#allocation2 + $0x1c] sm:$0xf] %vm1833_vm5, %v3691_v7  ;;  %v6983_v7 = vld [vmem:[%s9910_s19 + $0x48] sm:$0xff]  }
 0x4a6   : > { %6597 = vmatpush3.bf16.msra.mxu0 %v6968_v43  ;;  %v4243_v43 = vmul.f32 %v9089_v17, %v4202_v31 }
 0x4a7   : > { %6598 = vmatprep.subr.bf16.mxu0 %v6969_v40  ;;  %v10032_v40 = vld [vmem:[#allocation38_spill] sm:$0xff] }
 0x4a8   : > { %v3382_v6 = vpop.permute.xlu1 %3381 }
 0x4a9   : > { %v3250_v0 = vpop.permute.xlu0 %3249 }
 0x4aa   : > { %3272 = vst.msk [vmem:[#allocation2 + $0x24] sm:$0xf] %vm1691_vm8, %v3250_v0  ;;  %6599 = vmatpush3.bf16.msra.mxu0 %v6972_v55  ;;  %v4240_v0 = vmul.f32 %v9089_v17, %v4199_v30  ;;  %v4213_v30 = vld [vmem:[%s7653_s30 + $0xa0] sm:$0xff] }
 0x4ab   : > { %3400 = vst.msk [vmem:[#allocation2 + $0x24] sm:$0xf] %vm1833_vm5, %v3378_v45  ;;  %6600 = vmatprep.subr.bf16.mxu0 %v6974_v8  ;;  %v9096_v45 = vld [vmem:[%s9909_s18] sm:$0x7] }
 0x4ac   : > { %v9106_v8 = vrot.slane %v9096_v45, %v8398_v18  ;;  %v4205_v18 = vld [vmem:[%s7653_s30 + $0x48] sm:$0xff] }
 0x4ad   : > { %v3535_v41 = vpop.permute.xlu1 %3534  ;;  %v3533_v36 = vpop.permute.xlu0 %3532 }
 0x4ae   : > { %3554 = vst.msk [vmem:[#allocation2 + $0x34] sm:$0xf] %vm1513_vm14, %v3535_v41  ;;  %3553 = vst.msk [vmem:[#allocation2 + $0x28] sm:$0xf] %vm1513_vm14, %v3533_v36  ;;  %6601 = vmatpush3.bf16.msra.mxu0 %v6975_v20  ;;  %v4198_v20 = vld [vmem:[%s7653_s30] sm:$0xff]  ;;  %v4284_v36 = vadd.f32 %v9106_v8, %v4243_v43 }
 0x4af   : > { %6602 = vmatprep.subr.bf16.mxu0 %v6976_v33  ;;  %v4201_v41 = vld [vmem:[%s7653_s30 + $0x20] sm:$0xff]  ;;  %v9114_v33 = vrot.slane %v9096_v45, %v10032_v40 }
 0x4b1   : > { %v3254_v27 = vpop.permute.xlu1 %3253 }
 0x4b2   : > { %3274 = vst.msk [vmem:[#allocation2 + $0x3c] sm:$0xf] %vm1691_vm8, %v3254_v27  ;;  %v3252_v24 = vpop.permute.xlu0 %3251  ;;  %6603 = vmatpush3.bf16.msra.mxu0 %v6977_v11  ;;  %v6964_v47 = vld [vmem:[#allocation2 + $0x18] ss:$12 sps:$4 sm:$0xff]  }
 0x4b3   : > { %3402 = vst.msk [vmem:[#allocation2 + $0x3c] sm:$0xf] %vm1833_vm5, %v3382_v6  ;;  %6604 = vmatprep.subr.bf16.mxu0 %v6978_v61  ;;  %v9101_v6 = vrot.slane %v9082_v59, %v10032_v40  ;;  %v4208_v61 = vld [vmem:[%s7653_s30 + $0x68] sm:$0xff] }
 0x4b4   : > { %3273 = vst.msk [vmem:[#allocation2 + $0x30] sm:$0xf] %vm1691_vm8, %v3252_v24  ;;  %v4281_v24 = vadd.f32 %v9106_v8, %v4240_v0 }
 0x4b5   : > { %v3256_v39 = vpop.permute.xlu1 %3255  ;;  %v4239_v11 = vmul.f32 %v9101_v6, %v4198_v20  ;;  %v4242_v27 = vmul.f32 %v9101_v6, %v4201_v41  ;;  %v4254_v41 = vmul.f32 %v9101_v6, %v4213_v30 }
 0x4b6   : > { %3275 = vst.msk [vmem:[#allocation2 + $0x48] sm:$0xf] %vm1691_vm8, %v3256_v39  ;;  %6605 = vmatpush3.bf16.msra.mxu0 %v6979_v46  ;;  %v4308_v46 = vmax.f32 %v4284_v36, 0.0  ;;  %v4249_v39 = vmul.f32 %v9089_v17, %v4208_v61  ;;  %v4220_v36 = vld [vmem:[%s7653_s30 + $0xe8] sm:$0xff] }
 0x4b7   : > { %v3659_v51 = vpop.permute.xlu0 %3658  ;;  %6606 = vmatprep.subr.bf16.mxu0 %v6983_v7  ;;  %v4280_v7 = vadd.f32 %v9114_v33, %v4239_v11 }
 0x4b8   : > { %3679 = vst.msk [vmem:[#allocation2 + $0x28] sm:$0xf] %vm1691_vm8, %v3659_v51  ;;  %v4283_v51 = vadd.f32 %v9114_v33, %v4242_v27  ;;  %v4217_v27 = vld [vmem:[%s7653_s30 + $0xc8] sm:$0xff] }
 0x4b9   : > { %3710 = vst.msk [vmem:[#allocation2 + $0x28] sm:$0xf] %vm1833_vm5, %v8991_v44  ;;  %v3663_v19 = vpop.permute.xlu1 %3662 }
 0x4ba   : > { %6607 = vmatpush3.bf16.msra.mxu0 %v6984_v21  ;;  %v4204_v21 = vld [vmem:[%s7653_s30 + $0x40] sm:$0xff] }
 0x4bb   : > { %v3661_v35 = vpop.permute.xlu0 %3660  ;;  %6608 = vmatprep.subr.bf16.mxu0 %v6985_v28 }
 0x4bc   : > { %3680 = vst.msk [vmem:[#allocation2 + $0x34] sm:$0xf] %vm1691_vm8, %v3661_v35 }
 0x4bd   : > { %3711 = vst.msk [vmem:[#allocation2 + $0x34] sm:$0xf] %vm1833_vm5, %v3695_v23  ;;  %v3541_v58 = vpop.permute.xlu1 %3540 }
 0x4be   : > { %v3558_v62 = vsel %vm8312_vm12, %v3541_v58, %v3557_v29  ;;  %6609 = vmatpush3.bf16.msra.mxu0 %v6986_v52  ;;  %v4305_v52 = vmax.f32 %v4281_v24, 0.0  ;;  %v4246_v29 = vmul.f32 %v9089_v17, %v4205_v18  ;;  %v4261_v24 = vmul.f32 %v9089_v17, %v4220_v36 }
 0x4bf   : > { %v3380_v37 = vpop.permute.xlu0 %3379  ;;  %3559 = vst [vmem:[#allocation2 + $0x58] sm:$0xf] %v3558_v62  ;;  %v4290_v62 = vadd.f32 %v9106_v8, %v4249_v39  ;;  %v4295_v39 = vadd.f32 %v9114_v33, %v4254_v41  ;;  %v9185_v41 = vld [vmem:[%s9907_s16] ss:$0 sm:$0xff]  ;;  %6646 = vmatprep.subr.bf16.mxu0 %v7001_v48 }
 0x4c0   : > { %3401 = vst.msk [vmem:[#allocation2 + $0x30] sm:$0xf] %vm1833_vm5, %v3380_v37  ;;  %v6962_v44 = vld [vmem:[#allocation2 + $0x1c] ss:$12 sps:$4 sm:$0xff]   ;;  %v4329_v58 = vpack.c.bf16 %v4308_v46, %v4305_v52  ;;  %v4304_v37 = vmax.f32 %v4280_v7, 0.0 }
 0x4c1   : > { %v3665_v53 = vpop.permute.xlu1 %3664  ;;  %4100 = vmatprep.mubr.bf16.mxu0 %v6962_v44  ;;  %v4307_v44 = vmax.f32 %v4283_v51, 0.0  ;;  %v4258_v51 = vmul.f32 %v9089_v17, %v4217_v27 }
 0x4c2   : > { %4101 = vmatmul.mubr.bf16.gmra.mxu0 %v6964_v47  ;;  %v4245_v47 = vmul.f32 %v9101_v6, %v4204_v21 }
 0x4c3   : > { %v3537_v16 = vpop.permute.xlu0 %3536  ;;  %v4299_v52 = vadd.f32 %v9106_v8, %v4258_v51 }
 0x4c4   : > { %3555 = vst.msk [vmem:[#allocation2 + $0x40] sm:$0xf] %vm1513_vm14, %v3537_v16  ;;  %v4214_v16 = vld [vmem:[%s7653_s30 + $0xa8] sm:$0xff] }
 0x4c5   : > { %3681 = vst.msk [vmem:[#allocation2 + $0x40] sm:$0xf] %vm1691_vm8, %v3663_v19  ;;  %v3384_v32 = vpop.permute.xlu1 %3383  ;;  %v4207_v19 = vld [vmem:[%s7653_s30 + $0x60] sm:$0xff] }
 0x4c6   : > { %3712 = vst.msk [vmem:[#allocation2 + $0x40] sm:$0xf] %vm1833_vm5, %v9003_v14  ;;  %3403 = vst.msk [vmem:[#allocation2 + $0x48] sm:$0xf] %vm1833_vm5, %v3384_v32  ;;  %v3683_v22 = vld [vmem:[#allocation2 + $0x58] sm:$0x1]  ;;  %v4287_v32 = vadd.f32 %v9106_v8, %v4246_v29 }
 0x4c7   : > { %v3667_v12 = vpop.permute.xlu0 %3666  ;;  %v6973_v13 = vld [vmem:[#allocation2 + $0x30] ss:$12 sps:$4 sm:$0xff]  }
 0x4c8   : > { %v3684_v34 = vsel %vm8339_vm15, %v3667_v12, %v3683_v22  ;;  %v4211_v22 = vld [vmem:[%s7653_s30 + $0x88] sm:$0xff]  ;;  %v4314_v12 = vmax.f32 %v4290_v62, 0.0 }
 0x4c9   : > { %3685 = vst [vmem:[#allocation2 + $0x58] sm:$0x1] %v3684_v34  ;;  %v3699_v50 = vpop.permute.xlu1 %3698  ;;  %v4255_v34 = vmul.f32 %v9089_v17, %v4214_v16  ;;  %v4252_v31 = vmul.f32 %v9089_v17, %v4211_v22  ;;  %v6988_v17 = vld [vmem:[%s9910_s19 + $0xb0] sm:$0xff]   ;;  %v6994_v22 = vld [vmem:[%s9910_s19 + $0x80] sm:$0xff]  }
 0x4ca   : > { %v6992_v16 = vld [vmem:[%s9910_s19 + $0x90] sm:$0xff]  }
 0x4cb   : > { %v3539_v23 = vpop.permute.xlu0 %3538  ;;  %v4296_v40 = vadd.f32 %v9106_v8, %v4255_v34  ;;  %v4293_v11 = vadd.f32 %v9106_v8, %v4252_v31  ;;  %v4219_v34 = vld [vmem:[%s7653_s30 + $0xe0] sm:$0xff] }
 0x4cc   : > { %3556 = vst.msk [vmem:[#allocation2 + $0x4c] sm:$0xf] %vm1513_vm14, %v3539_v23  ;;  %v4328_v23 = vpack.c.bf16 %v4307_v44, %v4304_v37  ;;  %v4323_v37 = vmax.f32 %v4299_v52, 0.0 }
 0x4cd   : > { %3682 = vst.msk [vmem:[#allocation2 + $0x4c] sm:$0xf] %vm1691_vm8, %v3665_v53  ;;  %v6970_v14 = vld [vmem:[#allocation2 + $0x34] ss:$12 sps:$4 sm:$0xff]   ;;  %v4248_v53 = vmul.f32 %v9101_v6, %v4207_v19  ;;  %v4320_v61 = vmax.f32 %v4296_v40, 0.0  ;;  %v4317_v7 = vmax.f32 %v4293_v11, 0.0  ;;  %v4302_v19 = vadd.f32 %v9106_v8, %v4261_v24 }
 0x4ce   : > { %3713 = vst.msk [vmem:[#allocation2 + $0x4c] sm:$0xf] %vm1833_vm5, %v3699_v50  ;;  %4108 = vmatprep.mubr.bf16.mxu0 %v6970_v14  ;;  %v4286_v50 = vadd.f32 %v9114_v33, %v4245_v47  ;;  %v6989_v8 = vld [vmem:[%s9910_s19 + $0xa8] sm:$0xff]   ;;  %v6990_v47 = vld [vmem:[%s9910_s19 + $0xa0] sm:$0xff]  }
 0x4cf   : > { %v3258_v10 = vpop.permute.xlu0 %3257  ;;  %4109 = vmatmul.mubr.bf16.gmra.mxu0 %v6973_v13  ;;  %v4289_v14 = vadd.f32 %v9114_v33, %v4248_v53  ;;  %v4311_v13 = vmax.f32 %v4287_v32, 0.0  ;;  %v4335_v21 = vpack.c.bf16 %v4320_v61, %v4317_v7  ;;  %v4326_v29 = vmax.f32 %v4302_v19, 0.0  ;;  %v6991_v53 = vld [vmem:[%s9910_s19 + $0x98] sm:$0xff]   ;;  %v6993_v32 = vld [vmem:[%s9910_s19 + $0x88] sm:$0xff]  }
 0x4d0   : > { %3276 = vst.msk [vmem:[#allocation2 + $0x54] sm:$0xf] %vm1691_vm8, %v3258_v10  ;;  %v4210_v10 = vld [vmem:[%s7653_s30 + $0x80] sm:$0xff] }
 0x4d1   : > { %v4332_v43 = vpack.c.bf16 %v4314_v12, %v4311_v13  ;;  %v4313_v0 = vmax.f32 %v4289_v14, 0.0  ;;  %v4251_v20 = vmul.f32 %v9101_v6, %v4210_v10  ;;  %v4338_v44 = vpack.c.bf16 %v4326_v29, %v4323_v37  ;;  %v4216_v12 = vld [vmem:[%s7653_s30 + $0xc0] sm:$0xff] }
 0x4d3   : > { %v3386_v55 = vpop.permute.xlu0 %3385  ;;  %v4292_v46 = vadd.f32 %v9114_v33, %v4251_v20 }
 0x4d4   : > { %3404 = vst.msk [vmem:[#allocation2 + $0x54] sm:$0xf] %vm1833_vm5, %v3386_v55  ;;  %v4310_v55 = vmax.f32 %v4286_v50, 0.0  ;;  %v4260_v50 = vmul.f32 %v9101_v6, %v4219_v34 }
 0x4d5   : > { %v6980_v28 = vld [vmem:[#allocation2 + $0x4c] ss:$12 sps:$4 sm:$0xff]  }
 0x4d6   : > { %4116 = vmatprep.mubr.bf16.mxu0 %v6980_v28  ;;  %v4331_v18 = vpack.c.bf16 %v4313_v0, %v4310_v55  ;;  %v4316_v28 = vmax.f32 %v4292_v46, 0.0  ;;  %v4301_v13 = vadd.f32 %v9114_v33, %v4260_v50  ;;  %v10033_v55 = vld [vmem:[#allocation28_spill] sm:$0xff] }
 0x4d7   : > { %v4234_v0 = vsub.s32 2, %v10033_v55 }
 0x4d8   : > { %v4325_v10 = vmax.f32 %v4301_v13, 0.0 }
 0x4d9   : > { %v9189_v27 = vrot.slane %v9082_v59, %v4234_v0  ;;  %v9195_v51 = vrot.slane %v9096_v45, %v4234_v0 }
 0x4db   : > { %v6982_v35 = vld [vmem:[#allocation2 + $0x48] ss:$12 sps:$4 sm:$0xff]  }
 0x4dc   : > { %4117 = vmatmul.mubr.bf16.gmra.mxu0 %v6982_v35  ;;  %v4319_v35 = vmax.f32 %v4295_v39, 0.0 }
 0x4dd   : > { %4571 = vmatprep.mubr.bf16.mxu0 %v4329_v58  ;;  %v6987_v58 = vld [vmem:[%s9910_s19 + $0xb8] sm:$0xff]  }
 0x4de   : > { %v4334_v62 = vpack.c.bf16 %v4319_v35, %v4316_v28  ;;  %6740 = vmatprep.subr.bf16.mxu1 %v6987_v58 }
 0x4df   : > { %6741 = vmatpush3.bf16.msra.mxu1 %v6987_v58 }
 0x4e0   : > { %6742 = vmatprep.subr.bf16.mxu1 %v6988_v17 }
 0x4e3   : > { %6743 = vmatpush3.bf16.msra.mxu1 %v6988_v17 }
 0x4e4   : > { %4572 = vmatmul.mubr.bf16.vlgmr.msra.gmra.mxu0 %v4328_v23  ;;  %6744 = vmatprep.subr.bf16.mxu1 %v6989_v8  ;;  %v4257_v23 = vmul.f32 %v9101_v6, %v4216_v12 }
 0x4e5   : > { %4579 = vmatprep.mubr.bf16.mxu0 %v4332_v43 }
 0x4e6   : > { %v4298_v14 = vadd.f32 %v9114_v33, %v4257_v23 }
 0x4e7   : > { %6745 = vmatpush3.bf16.msra.mxu1 %v6989_v8 }
 0x4e8   : > { %6746 = vmatprep.subr.bf16.mxu1 %v6990_v47  ;;  %v4322_v31 = vmax.f32 %v4298_v14, 0.0 }
 0x4ea   : > { %v4337_v30 = vpack.c.bf16 %v4325_v10, %v4322_v31 }
 0x4eb   : > { %6747 = vmatpush3.bf16.msra.mxu1 %v6990_v47 }
 0x4ec   : > { %4580 = vmatmul.mubr.bf16.gmra.mxu0 %v4331_v18  ;;  %6748 = vmatprep.subr.bf16.mxu1 %v6991_v53 }
 0x4ed   : > { %4587 = vmatprep.mubr.bf16.mxu0 %v4335_v21 }
 0x4ef   : > { %6749 = vmatpush3.bf16.msra.mxu1 %v6991_v53 }
 0x4f0   : > { %6750 = vmatprep.subr.bf16.mxu1 %v6992_v16 }
 0x4f3   : > { %6751 = vmatpush3.bf16.msra.mxu1 %v6992_v16 }
 0x4f4   : > { %4588 = vmatmul.mubr.bf16.gmra.mxu0 %v4334_v62  ;;  %6752 = vmatprep.subr.bf16.mxu1 %v6993_v32 }
 0x4f5   : > { %4595 = vmatprep.mubr.bf16.mxu0 %v4338_v44 }
 0x4f7   : > { %6753 = vmatpush3.bf16.msra.mxu1 %v6993_v32 }
 0x4f8   : > { %6754 = vmatprep.subr.bf16.mxu1 %v6994_v22  ;;  %v6734_v43 = vpop.f32.mrf.mxu1 }
 0x4fa   : > { %v4159_v20 = vpop.f32.mrf.mxu1 }
 0x4fb   : > { %6755 = vmatpush3.bf16.msra.mxu1 %v6994_v22 }
 0x4fc   : > { %4596 = vmatmul.mubr.bf16.gmra.mxu0 %v4337_v30  ;;  %v6735_v61 = vpop.f32.mrf.mxu1 }
 0x4fe   : > { %v4162_v21 = vpop.f32.mrf.mxu1 }
 0x500   : > { %v6738_v22 = vpop.f32.mrf.mxu1 }
 0x502   : > { %v4175_v14 = vpop.f32.mrf.mxu1 }
 0x504   : > { %v6739_v0 = vpop.f32.mrf.mxu1 }
 0x561   : > { %v6564_v40 = vpop.f32.mrf.mxu0 }
 0x563   : > { %v6565_v6 = vpop.f32.mrf.mxu0 }
 0x564   : > { %v6566_v36 = vadd.f32 %v6565_v6, %v6564_v40 }
 0x565   : > { %v6567_v11 = vpop.f32.mrf.mxu0 }
 0x566   : > { %v4095_v33 = vadd.f32 %v6566_v36, %v9185_v41 }
 0x567   : > { %v6568_v24 = vpop.f32.mrf.mxu0 }
 0x568   : > { %v4160_v18 = vadd.f32 %v4159_v20, %v4095_v33  ;;  %v6569_v46 = vadd.f32 %v6568_v24, %v6567_v11  ;;  %v4178_v24 = vpop.f32.mrf.mxu1 }
 0x56a   : > { %4190 = vst [vmem:[%s7653_s30 + $0x10] sm:$0xff] %v4160_v18  ;;  %v4098_v39 = vadd.f32 %v6569_v46, %v9185_v41  ;;  %v4241_v7 = vmul.f32 %v9189_v27, %v4160_v18 }
 0x56c   : > { %v4163_v19 = vadd.f32 %v4162_v21, %v4098_v39  ;;  %v4282_v59 = vadd.f32 %v9195_v51, %v4241_v7 }
 0x56e   : > { %4191 = vst [vmem:[%s7653_s30 + $0x30] sm:$0xff] %v4163_v19  ;;  %v4244_v28 = vmul.f32 %v9189_v27, %v4163_v19  ;;  %v4306_v52 = vmax.f32 %v4282_v59, 0.0 }
 0x570   : > { %v4285_v35 = vadd.f32 %v9195_v51, %v4244_v28 }
 0x572   : > { %v4309_v29 = vmax.f32 %v4285_v35, 0.0 }
 0x574   : > { %v4330_v58 = vpack.c.bf16 %v4309_v29, %v4306_v52 }
 0x576   : > { %6756 = vmatprep.mubr.bf16.mxu1 %v4330_v58 }
 0x582   : > { %v6570_v62 = vpop.f32.mrf.mxu0 }
 0x584   : > { %v6571_v37 = vpop.f32.mrf.mxu0 }
 0x585   : > { %v6572_v44 = vadd.f32 %v6571_v37, %v6570_v62 }
 0x586   : > { %v6573_v45 = vpop.f32.mrf.mxu0 }
 0x587   : > { %v4103_v17 = vadd.f32 %v6572_v44, %v9185_v41 }
 0x588   : > { %v6574_v8 = vpop.f32.mrf.mxu0 }
 0x589   : > { %v4168_v47 = vadd.f32 %v6734_v43, %v4103_v17  ;;  %v6575_v53 = vadd.f32 %v6574_v8, %v6573_v45 }
 0x58b   : > { %4192 = vst [vmem:[%s7653_s30 + $0x50] sm:$0xff] %v4168_v47  ;;  %v4106_v16 = vadd.f32 %v6575_v53, %v9185_v41  ;;  %v4247_v32 = vmul.f32 %v9189_v27, %v4168_v47 }
 0x58d   : > { %v4171_v12 = vadd.f32 %v6735_v61, %v4106_v16  ;;  %v4288_v50 = vadd.f32 %v9195_v51, %v4247_v32 }
 0x58f   : > { %4193 = vst [vmem:[%s7653_s30 + $0x70] sm:$0xff] %v4171_v12  ;;  %v6576_v34 = vpop.f32.mrf.mxu0  ;;  %v4250_v23 = vmul.f32 %v9189_v27, %v4171_v12  ;;  %v4312_v43 = vmax.f32 %v4288_v50, 0.0 }
 0x591   : > { %v6577_v13 = vpop.f32.mrf.mxu0  ;;  %v4291_v31 = vadd.f32 %v9195_v51, %v4250_v23  ;;  %v6997_v23 = vld [vmem:[%s9914_s23 + $0x80] sm:$0xff]  }
 0x592   : > { %v6578_v10 = vadd.f32 %v6577_v13, %v6576_v34 }
 0x593   : > { %v6579_v30 = vpop.f32.mrf.mxu0  ;;  %v4315_v40 = vmax.f32 %v4291_v31, 0.0 }
 0x594   : > { %v4111_v55 = vadd.f32 %v6578_v10, %v9185_v41 }
 0x595   : > { %v6580_v20 = vpop.f32.mrf.mxu0  ;;  %v4333_v6 = vpack.c.bf16 %v4315_v40, %v4312_v43  ;;  %v9234_v40 = vld [vmem:[%s9911_s20] ss:$0 sm:$0xff] }
 0x596   : > { %v4176_v36 = vadd.f32 %v4175_v14, %v4111_v55  ;;  %v6581_v11 = vadd.f32 %v6580_v20, %v6579_v30 }
 0x597   : > { %6757 = vmatmul.mubr.bf16.vlgmr.msra.gmra.mxu1 %v4333_v6 }
 0x598   : > { %4194 = vst [vmem:[%s7653_s30 + $0x90] sm:$0xff] %v4176_v36  ;;  %v4114_v33 = vadd.f32 %v6581_v11, %v9185_v41  ;;  %v4253_v61 = vmul.f32 %v9189_v27, %v4176_v36  ;;  %v9240_v11 = vld [vmem:[%s9912_s21] ss:$0 sm:$0xff] }
 0x59a   : > { %v4179_v18 = vadd.f32 %v4178_v24, %v4114_v33  ;;  %v4294_v39 = vadd.f32 %v9195_v51, %v4253_v61 }
 0x59c   : > { %4195 = vst [vmem:[%s7653_s30 + $0xb0] sm:$0xff] %v4179_v18  ;;  %v4256_v46 = vmul.f32 %v9189_v27, %v4179_v18  ;;  %v6582_v7 = vpop.f32.mrf.mxu0  ;;  %v4318_v59 = vmax.f32 %v4294_v39, 0.0 }
 0x59e   : > { %v4297_v21 = vadd.f32 %v9195_v51, %v4256_v46  ;;  %v6583_v19 = vpop.f32.mrf.mxu0  ;;  %v9246_v46 = vld [vmem:[%s10034_s7] ss:$0 sm:$0xff]  ;;  %s9844_s7 = scalar_lea.hbm %s10047_s27, %s6449_s22 }
 0x59f   : > { %v6584_v28 = vadd.f32 %v6583_v19, %v6582_v7 }
 0x5a0   : > { %v4321_v35 = vmax.f32 %v4297_v21, 0.0  ;;  %v6585_v52 = vpop.f32.mrf.mxu0 }
 0x5a1   : > { %v4119_v29 = vadd.f32 %v6584_v28, %v9185_v41 }
 0x5a2   : > { %v4336_v58 = vpack.c.bf16 %v4321_v35, %v4318_v59  ;;  %v6586_v62 = vpop.f32.mrf.mxu0 }
 0x5a3   : > { %v4184_v37 = vadd.f32 %v6738_v22, %v4119_v29  ;;  %v6587_v44 = vadd.f32 %v6586_v62, %v6585_v52  ;;  %v6996_v22 = vld [vmem:[%s9914_s23 + $0x88] sm:$0xff]  }
 0x5a4   : > { %6760 = vmatprep.mubr.bf16.mxu1 %v4336_v58  ;;  %6764 = vmatprep.subr.bf16.mxu1 %v6996_v22 }
 0x5a5   : > { %4196 = vst [vmem:[%s7653_s30 + $0xd0] sm:$0xff] %v4184_v37  ;;  %v4122_v45 = vadd.f32 %v6587_v44, %v9185_v41  ;;  %v4259_v17 = vmul.f32 %v9189_v27, %v4184_v37  ;;  %v6610_v41 = vpop.f32.mrf.mxu0  ;;  %6765 = vmatpush3.bf16.msra.mxu1 %v6996_v22 }
 0x5a6   : > { %6766 = vmatprep.subr.bf16.mxu1 %v6997_v23 }
 0x5a7   : > { %v4187_v8 = vadd.f32 %v6739_v0, %v4122_v45  ;;  %v4300_v53 = vadd.f32 %v9195_v51, %v4259_v17 }
 0x5a9   : > { %4197 = vst [vmem:[%s7653_s30 + $0xf0] sm:$0xff] %v4187_v8  ;;  %v4262_v47 = vmul.f32 %v9189_v27, %v4187_v8  ;;  %v4324_v32 = vmax.f32 %v4300_v53, 0.0  ;;  %v6611_v27 = vpop.f32.mrf.mxu0  ;;  %6767 = vmatpush3.bf16.msra.mxu1 %v6997_v23 }
 0x5aa   : > { %v6612_v55 = vadd.f32 %v6611_v27, %v6610_v41 }
 0x5ab   : > { %v4303_v16 = vadd.f32 %v9195_v51, %v4262_v47  ;;  %v6613_v50 = vpop.f32.mrf.mxu0 }
 0x5ac   : > { %v4574_v24 = vadd.f32 %v6612_v55, %v9234_v40 }
 0x5ad   : > { %v4327_v12 = vmax.f32 %v4303_v16, 0.0  ;;  %v6614_v51 = vpop.f32.mrf.mxu0 }
 0x5ae   : > { %v6615_v33 = vadd.f32 %v6614_v51, %v6613_v50  ;;  %v10035_v51 = vld [vmem:[#allocation30_spill] sm:$0xff] }
 0x5af   : > { %v4339_v34 = vpack.c.bf16 %v4327_v12, %v4324_v32  ;;  %v6616_v14 = vpop.f32.mrf.mxu0 }
 0x5b0   : > { %v4577_v29 = vadd.f32 %v6615_v33, %v9234_v40 }
 0x5b1   : > { %6761 = vmatmul.mubr.bf16.gmra.mxu1 %v4339_v34  ;;  %v6617_v13 = vpop.f32.mrf.mxu0 }
 0x5b2   : > { %v6618_v30 = vadd.f32 %v6617_v13, %v6616_v14 }
 0x5b3   : > { %v6619_v31 = vpop.f32.mrf.mxu0 }
 0x5b4   : > { %v4582_v0 = vadd.f32 %v6618_v30, %v9234_v40 }
 0x5b5   : > { %v6620_v10 = vpop.f32.mrf.mxu0 }
 0x5b6   : > { %v6621_v6 = vadd.f32 %v6620_v10, %v6619_v31 }
 0x5b7   : > { %v6622_v43 = vpop.f32.mrf.mxu0 }
 0x5b8   : > { %v4585_v19 = vadd.f32 %v6621_v6, %v9234_v40 }
 0x5b9   : > { %v6623_v20 = vpop.f32.mrf.mxu0 }
 0x5bb   : > { %v6625_v18 = vpop.f32.mrf.mxu0 }
 0x5bd   : > { %v6626_v58 = vpop.f32.mrf.mxu0 }
 0x5bf   : > { %v6628_v32 = vpop.f32.mrf.mxu0 }
 0x5c1   : > { %v6629_v50 = vpop.f32.mrf.mxu0 }
 0x5c3   : > { %v6631_v55 = vpop.f32.mrf.mxu0 }
 0x657   : > { %v6758_v36 = vpop.f32.mrf.mxu1 }
 0x658   : > { %v4647_v61 = vadd.f32 %v6758_v36, %v4582_v0  ;;  %v10036_v0 = vld [vmem:[#allocation34_spill] sm:$0xff]  ;;  %v10037_v36 = vld [vmem:[#allocation32_spill] sm:$0xff] }
 0x659   : > { %v4638_v39 = vpop.f32.mrf.mxu1 }
 0x65a   : > { %v4678_v7 = vmul.f32 %v9240_v11, %v4647_v61  ;;  %v4639_v21 = vadd.f32 %v4638_v39, %v4574_v24  ;;  %v6624_v61 = vadd.f32 %v6623_v20, %v6622_v43  ;;  %v6630_v24 = vadd.f32 %v6629_v50, %v6628_v32 }
 0x65b   : > { %v6759_v28 = vpop.f32.mrf.mxu1 }
 0x65c   : > { %v4693_v59 = vadd.f32 %v9246_v46, %v4678_v7  ;;  %v4676_v35 = vmul.f32 %v9240_v11, %v4639_v21  ;;  %v4650_v52 = vadd.f32 %v6759_v28, %v4585_v19  ;;  %v10038_v21 = vld [vmem:[#allocation29_spill] sm:$0xff] }
 0x65d   : > { %v4641_v62 = vpop.f32.mrf.mxu1 }
 0x65e   : > { %v4701_v37 = vmax.f32 %v4693_v59, 0.0  ;;  %v4691_v44 = vadd.f32 %v9246_v46, %v4676_v35  ;;  %v4679_v45 = vmul.f32 %v9240_v11, %v4650_v52  ;;  %v4642_v17 = vadd.f32 %v4641_v62, %v4577_v29  ;;  %v6632_v52 = vpop.f32.mrf.mxu0 }
 0x660   : > { %v4699_v8 = vmax.f32 %v4691_v44, 0.0  ;;  %v4694_v47 = vadd.f32 %v9246_v46, %v4679_v45  ;;  %v4677_v53 = vmul.f32 %v9240_v11, %v4642_v17  ;;  %v6443_v16 = vpack.c.bf16 %v4701_v37, %v4701_v37 }
 0x661   : > { %v4598_v44 = vadd.f32 %v6630_v24, %v9234_v40  ;;  %v4590_v45 = vadd.f32 %v6624_v61, %v9234_v40 }
 0x662   : > { %v4702_v12 = vmax.f32 %v4694_v47, 0.0  ;;  %v4692_v34 = vadd.f32 %v9246_v46, %v4677_v53  ;;  %5399 = vrot.lane.b32.xlu0 %v6443_v16, %s10028_s4  ;;  %5128 = vst.msk [vmem:[#allocation2 + $0x1c] sm:$0xf] %vm860_vm0, %v6443_v16  ;;  %v6441_v22 = vpack.c.bf16 %v4699_v8, %v4699_v8  ;;  %v6633_v53 = vadd.f32 %v6632_v52, %v6631_v55 }
 0x664   : > { %v9260_v41 = vpack.c.bf16 %v4702_v12, %v4701_v37  ;;  %v4700_v23 = vmax.f32 %v4692_v34, 0.0  ;;  %4828 = vrot.lane.b32.xlu1 %v6441_v22, %s9951_s8  ;;  %5126 = vst.msk [vmem:[#allocation2 + $0x4] sm:$0xf] %vm860_vm0, %v6441_v22  ;;  %v6444_v27 = vpack.c.bf16 %v4702_v12, %v4702_v12  ;;  %v6627_v37 = vadd.f32 %v6626_v58, %v6625_v18 }
 0x666   : > { %v5426_v14 = vmul.bf16 %v9260_v41, %v10035_v51  ;;  %v9266_v13 = vpack.c.bf16 %v4700_v23, %v4699_v8  ;;  %v6442_v31 = vpack.c.bf16 %v4700_v23, %v4700_v23  ;;  %4832 = vrot.lane.b32.xlu0 %v6443_v16, %s9951_s8  ;;  %5129 = vst.msk [vmem:[#allocation2 + $0x28] sm:$0xf] %vm860_vm0, %v6444_v27 }
 0x667   : > { %v4989_v6 = vmul.bf16 %v9260_v41, %v10036_v0  ;;  %v4801_v0 = vld [vmem:[#allocation2 + $0xc] sm:$0xf] }
 0x668   : > { %v6378_v10 = vcombine.low %v5426_v14, %v5426_v14  ;;  %v9270_v30 = vcombine.high %v5426_v14, %v5426_v14  ;;  %5127 = vst.msk [vmem:[#allocation2 + $0x10] sm:$0xf] %vm860_vm0, %v6442_v31  ;;  %5401 = vrot.lane.b32.xlu1 %v6444_v27, %s10028_s4  ;;  %v9278_v33 = vmul.bf16 %v9266_v13, %v10037_v36 }
 0x669   : > { %v5425_v19 = vmul.bf16 %v9266_v13, %v10038_v21  ;;  %v9284_v28 = vmul.bf16 %v9266_v13, %v10035_v51  ;;  %v9290_v29 = vcombine.low %v4989_v6, %v4989_v6  ;;  %v6354_v23 = vcombine.high %v4989_v6, %v4989_v6 }
 0x66a   : > { %v5457_v39 = vshll.u32 %v6378_v10, 16  ;;  %v5461_v7 = vshrl.u32 %v6378_v10, 16  ;;  %v5467_v59 = vshll.u32 %v9270_v30, 16  ;;  %v6329_v35 = vcombine.low %v9278_v33, %v9278_v33 }
 0x66b   : > { %v6377_v8 = vcombine.high %v5425_v19, %v5425_v19  ;;  %v9296_v47 = vcombine.low %v9284_v28, %v9284_v28  ;;  %v5030_v18 = vshrl.u32 %v9290_v29, 16  ;;  %v5272_v10 = vmul.bf16 %v9260_v41, %v10037_v36 }
 0x66c   : > { %4834 = vrot.lane.b32.xlu1 %v6444_v27, %s9951_s8  ;;  %v5459_v43 = vrot.slane %v5457_v39, 5  ;;  %v5463_v20 = vrot.slane %v5461_v7, 4  ;;  %v4734_v62 = vshrl.u32 %v6329_v35, 16  ;;  %v9298_v16 = vrot.slane %v5467_v59, 5 }
 0x66d   : > { %v4737_v12 = vshll.u32 %v6329_v35, 16  ;;  %v5448_v34 = vshrl.u32 %v6377_v8, 16  ;;  %v5451_v22 = vshll.u32 %v6377_v8, 16  ;;  %v4881_v50 = vshll.u32 %v9296_v47, 16 }
 0x66e   : > { %v5464_v17 = vor.u32 %v5463_v20, %v5459_v43  ;;  %v9300_v32 = vrot.slane %v4734_v62, 7  ;;  %v9306_v14 = vrot.slane %v5030_v18, 7  ;;  %v4601_v36 = vadd.f32 %v6633_v53, %v9234_v40 }
 0x66f   : > { %v5450_v61 = vrot.slane %v5448_v34, 4  ;;  %v5453_v24 = vrot.slane %v5451_v22, 5  ;;  %v9316_v7 = vrot.slane %v4881_v50, 5  ;;  %v4593_v19 = vadd.f32 %v6627_v37, %v9234_v40 }
 0x670   : > { %5397 = vrot.lane.b32.xlu1 %v6442_v31, %s10028_s4  ;;  %v5465_v58 = vrot.slane %v5464_v17, 4  ;;  %v4739_v27 = vor.u32 %v4737_v12, %v9300_v32  ;;  %v5039_v20 = vshrl.u32 %v6354_v23, 16  ;;  %v5037_v60 = vrot.slane %v9306_v14, 4 }
 0x671   : > { %v6762_v51 = vpop.f32.mrf.mxu1  ;;  %v5454_v59 = vor.u32 %v5453_v24, %v5450_v61  ;;  %4954 = vrot.lane.b32.xlu0 %v9316_v7, %s10029_s5  ;;  %v5042_v62 = vshll.u32 %v6354_v23, 16  ;;  %v9325_v17 = vcombine.low %v5272_v10, %v5272_v10 }
 0x672   : > { %v5470_v55 = vsel %vm7898_vm7, %v5465_v58, %v9298_v16  ;;  %v4663_v39 = vadd.f32 %v6762_v51, %v4598_v44  ;;  %v4802_v6 = vsel %vm8242_vm13, %v4739_v27, %v4801_v0  ;;  %v9329_v37 = vrot.slane %v5039_v20, 7  ;;  %v10040_v20 = vld [vmem:[#allocation33_spill] sm:$0xff] }
 0x673   : > { %5524 = vst.msk [vmem:[#allocation2 + $0x14] sm:$0xf] %vm860_vm0, %v5470_v55  ;;  %v4654_v21 = vpop.f32.mrf.mxu1  ;;  %4803 = vst [vmem:[#allocation2 + $0xc] sm:$0xf] %v4802_v6  ;;  %v5455_v8 = vrot.slane %v5454_v59, 4  ;;  %v5310_v18 = vshrl.u32 %v9325_v17, 16 }
 0x674   : > { %4830 = vrot.lane.b32.xlu1 %v6442_v31, %s9951_s8  ;;  %v4682_v35 = vmul.f32 %v9240_v11, %v4663_v39  ;;  %v4655_v52 = vadd.f32 %v4654_v21, %v4590_v45  ;;  %v6371_v31 = vcombine.high %v5272_v10, %v5272_v10  ;;  %v5044_v27 = vor.u32 %v5042_v62, %v9329_v37 }
 0x675   : > { %v6763_v44 = vpop.f32.mrf.mxu1  ;;  %v5460_v34 = vsel %vm7898_vm7, %v5455_v8, %v5459_v43  ;;  %v9338_v10 = vrot.slane %v5310_v18, 7  ;;  %v5471_v59 = vshrl.u32 %v9270_v30, 16 }
 0x676   : > { %v4697_v53 = vadd.f32 %v9246_v46, %v4682_v35  ;;  %v4680_v40 = vmul.f32 %v9240_v11, %v4655_v52  ;;  %v4666_v12 = vadd.f32 %v6763_v44, %v4601_v36  ;;  %v5319_v58 = vshrl.u32 %v6371_v31, 16  ;;  %5523 = vst.msk [vmem:[#allocation2 + $0x8] sm:$0xf] %vm860_vm0, %v5460_v34  ;;  %v10039_v36 = vld [vmem:[#allocation31_spill] sm:$0xff] }
 0x677   : > { %v4657_v45 = vpop.f32.mrf.mxu1  ;;  %v5045_v43 = vsel %vm7955_vm11, %v5037_v60, %v5044_v27  ;;  %v5322_v24 = vshll.u32 %v6371_v31, 16  ;;  %v5317_v21 = vrot.slane %v9338_v10, 4  ;;  %v4988_v60 = vmul.bf16 %v9266_v13, %v10040_v20 }
 0x678   : > { %v4705_v22 = vmax.f32 %v4697_v53, 0.0  ;;  %v4695_v23 = vadd.f32 %v9246_v46, %v4680_v40  ;;  %v4683_v50 = vmul.f32 %v9240_v11, %v4666_v12  ;;  %v4658_v51 = vadd.f32 %v4657_v45, %v4593_v19  ;;  %5088 = vrot.lane.b32.xlu0 %v5045_v43, %s10028_s4 }
 0x679   : > { %v9340_v55 = vrot.slane %v5319_v58, 7  ;;  %v5271_v19 = vmul.bf16 %v9266_v13, %v10039_v36  ;;  %v6351_v31 = vcombine.low %v4988_v60, %v4988_v60  ;;  %v5473_v12 = vrot.slane %v5471_v59, 4 }
 0x67a   : > { %v9342_v0 = vpack.c.bf16 %v4705_v22, %v4705_v22  ;;  %v4703_v61 = vmax.f32 %v4695_v23, 0.0  ;;  %v4698_v39 = vadd.f32 %v9246_v46, %v4683_v50  ;;  %v4681_v6 = vmul.f32 %v9240_v11, %v4658_v51 }
 0x67b   : > { %v5324_v52 = vor.u32 %v5322_v24, %v9340_v55  ;;  %v6369_v44 = vcombine.high %v5271_v19, %v5271_v19  ;;  %v5013_v18 = vshrl.u32 %v6351_v31, 16  ;;  %v5016_v50 = vshll.u32 %v6351_v31, 16 }
 0x67c   : > { %5132 = vst.msk [vmem:[#allocation2 + $0x4c] sm:$0xf] %vm860_vm0, %v9342_v0  ;;  %v9355_v35 = vpack.c.bf16 %v4703_v61, %v4703_v61  ;;  %v4706_v62 = vmax.f32 %v4698_v39, 0.0  ;;  %v4696_v11 = vadd.f32 %v9246_v46, %v4681_v6  ;;  %v5474_v39 = vor.u32 %v5473_v12, %v9298_v16 }
 0x67d   : > { %v5325_v30 = vsel %vm7955_vm11, %v5317_v21, %v5324_v52  ;;  %v5301_v45 = vshrl.u32 %v6369_v44, 16  ;;  %v6995_v23 = vld [vmem:[#allocation2 + $0x8] ss:$12 sps:$4 sm:$0xff]   ;;  %v9378_v27 = vrot.slane %v5013_v18, 7  ;;  %v6352_v21 = vcombine.high %v4988_v60, %v4988_v60 }
 0x67e   : > { %5130 = vst.msk [vmem:[#allocation2 + $0x34] sm:$0xf] %vm860_vm0, %v9355_v35  ;;  %v9365_v8 = vpack.c.bf16 %v4706_v62, %v4705_v22  ;;  %v9367_v53 = vpack.c.bf16 %v4706_v62, %v4706_v62  ;;  %v4704_v40 = vmax.f32 %v4696_v11, 0.0  ;;  %5367 = vrot.lane.b32.xlu1 %v5325_v30, %s10029_s5  ;;  %v6368_v22 = vcombine.low %v5271_v19, %v5271_v19  ;;  %v10041_v18 = vld [vmem:[#allocation35_spill] sm:$0xff] }
 0x67f   : > { %v9382_v24 = vrot.slane %v5301_v45, 7  ;;  %6768 = vmatprep.mubr.msk.bf16.mxu1 %vm2511_vm9, %v6995_v23  ;;  %v5018_v6 = vor.u32 %v5016_v50, %v9378_v27  ;;  %v5304_v52 = vshll.u32 %v6369_v44, 16  ;;  %v9391_v20 = vmul.bf16 %v9260_v41, %v7816_v57 }
 0x680   : > { %v5428_v46 = vmul.bf16 %v9365_v8, %v7766_v3  ;;  %5133 = vst.msk [vmem:[#allocation2 + $0x58] sm:$0xf] %vm860_vm0, %v9367_v53  ;;  %v9374_v58 = vpack.c.bf16 %v4704_v40, %v4703_v61  ;;  %v9376_v34 = vpack.c.bf16 %v4704_v40, %v4704_v40  ;;  %v5296_v59 = vshrl.u32 %v6368_v22, 16 }
 0x681   : > { %v4857_v16 = vmul.bf16 %v9260_v41, %v7762_v2  ;;  %v5306_v60 = vor.u32 %v5304_v52, %v9382_v24  ;;  %v5313_v44 = vshll.u32 %v9325_v17, 16  ;;  %v5475_v22 = vrot.slane %v5474_v39, 4 }
 0x682   : > { %v6382_v51 = vcombine.low %v5428_v46, %v5428_v46  ;;  %v6383_v43 = vcombine.high %v5428_v46, %v5428_v46  ;;  %5131 = vst.msk [vmem:[#allocation2 + $0x40] sm:$0xf] %vm860_vm0, %v9376_v34  ;;  %v5427_v61 = vmul.bf16 %v9374_v58, %v7762_v2  ;;  %5082 = vrot.lane.b32.xlu1 %v5018_v6, %s10028_s4  ;;  %v6376_v50 = vrot.slane %v5296_v59, 11 }
 0x683   : > { %v5135_v46 = vmul.bf16 %v9260_v41, %v10041_v18  ;;  %v5019_v17 = vrot.slane %v9378_v27, 4 }
 0x684   : > { %v5497_v36 = vshll.u32 %v6382_v51, 16  ;;  %v5501_v19 = vshrl.u32 %v6382_v51, 16  ;;  %v5507_v62 = vshll.u32 %v6383_v43, 16  ;;  %v5511_v11 = vshrl.u32 %v6383_v43, 16 }
 0x685   : > { %v6380_v40 = vcombine.low %v5427_v61, %v5427_v61  ;;  %v5021_v51 = vshrl.u32 %v6352_v21, 16  ;;  %v6381_v2 = vcombine.high %v5427_v61, %v5427_v61  ;;  %v5307_v52 = vsel %vm7955_vm11, %v6376_v50, %v5306_v60  ;;  %v5529_v61 = vld [vmem:[#allocation2 + $0x50] sm:$0xf] }
 0x686   : > { %v9396_v30 = vrot.slane %v5497_v36, 5  ;;  %v5503_v31 = vrot.slane %v5501_v19, 4  ;;  %v5509_v12 = vrot.slane %v5507_v62, 5  ;;  %v5513_v45 = vrot.slane %v5511_v11, 4  ;;  %5363 = vrot.lane.b32.xlu0 %v5307_v52, %s10029_s5 }
 0x687   : > { %v5477_v6 = vshll.u32 %v6380_v40, 16  ;;  %v5315_v36 = vor.u32 %v5313_v44, %v9338_v10  ;;  %v5481_v42 = vshrl.u32 %v6380_v40, 16  ;;  %v5487_v41 = vshll.u32 %v6381_v2, 16 }
 0x688   : > { %v5504_v23 = vor.u32 %v5503_v31, %v9396_v30  ;;  %v5514_v43 = vor.u32 %v5513_v45, %v5509_v12  ;;  %v5491_v39 = vshrl.u32 %v6381_v2, 16  ;;  %v9410_v45 = vrot.slane %v5021_v51, 7 }
 0x689   : > { %v5479_v11 = vrot.slane %v5477_v6, 5  ;;  %v5483_v31 = vrot.slane %v5481_v42, 4  ;;  %v5024_v10 = vshll.u32 %v6352_v21, 16  ;;  %v5489_v60 = vrot.slane %v5487_v41, 5  ;;  %v7002_v21 = vld [vmem:[%s9914_s23 + $0x38] sm:$0xff]  }
 0x68a   : > { %v5505_v19 = vrot.slane %v5504_v23, 4  ;;  %v5515_v62 = vrot.slane %v5514_v43, 4  ;;  %v5493_v44 = vrot.slane %v5491_v39, 4  ;;  %v5308_v42 = vrot.slane %v9382_v24, 4  ;;  %6647 = vmatpush3.bf16.msra.mxu0 %v7002_v21 }
 0x68b   : > { %v5480_v27 = vsel %vm7898_vm7, %v5475_v22, %v5479_v11  ;;  %v5484_v18 = vor.u32 %v5483_v31, %v5479_v11  ;;  %v6345_v23 = vcombine.low %v4857_v16, %v4857_v16  ;;  %v9426_v50 = vcombine.high %v4857_v16, %v4857_v16 }
 0x68c   : > { %v5510_v59 = vsel %vm7898_vm7, %v5505_v19, %v5509_v12  ;;  %v5530_v40 = vsel %vm7945_vm10, %v5515_v62, %v5529_v61  ;;  %5525 = vst.msk [vmem:[#allocation2 + $0x20] sm:$0xf] %vm860_vm0, %v5480_v27  ;;  %v5026_v12 = vor.u32 %v5024_v10, %v9410_v45  ;;  %v5494_v22 = vor.u32 %v5493_v44, %v5489_v60  ;;  %v10042_v10 = vld [vmem:[#allocation36_spill] sm:$0xff] }
 0x68d   : > { %5528 = vst.msk [vmem:[#allocation2 + $0x44] sm:$0xf] %vm860_vm0, %v5510_v59  ;;  %5531 = vst [vmem:[#allocation2 + $0x50] sm:$0xf] %v5530_v40  ;;  %v6362_v51 = vcombine.low %v5135_v46, %v5135_v46  ;;  %v9428_v43 = vcombine.high %v5135_v46, %v5135_v46  ;;  %v5485_v2 = vrot.slane %v5484_v18, 4  ;;  %v5316_v24 = vsel %vm7955_vm11, %v5308_v42, %v5315_v36  ;;  %v7004_v42 = vld [vmem:[%s9914_s23 + $0x30] sm:$0xff]  }
 0x68e   : > { %v5027_v6 = vsel %vm7955_vm11, %v5019_v17, %v5026_v12  ;;  %v4900_v19 = vshll.u32 %v6345_v23, 16  ;;  %v4884_v52 = vshrl.u32 %v9296_v47, 16  ;;  %v5495_v62 = vrot.slane %v5494_v22, 4  ;;  %5365 = vrot.lane.b32.xlu1 %v5316_v24, %s10029_s5  ;;  %v7003_v12 = vld [vmem:[%s9914_s23 + $0x70] sm:$0xff]  }
 0x68f   : > { %5084 = vrot.lane.b32.xlu0 %v5027_v6, %s10028_s4  ;;  %v4904_v16 = vshrl.u32 %v6345_v23, 16  ;;  %v5178_v11 = vshll.u32 %v6362_v51, 16  ;;  %v5490_v46 = vsel %vm7898_vm7, %v5485_v2, %v5489_v60  ;;  %v4910_v17 = vshll.u32 %v9426_v50, 16  ;;  %6648 = vmatprep.subr.bf16.mxu0 %v7003_v12  ;;  %v7008_v12 = vld [vmem:[%s9914_s23 + $0x20] sm:$0xff]  }
 0x690   : > { %v9439_v41 = vrot.slane %v4900_v19, 5  ;;  %v5182_v39 = vshrl.u32 %v6362_v51, 16  ;;  %v5500_v47 = vsel %vm7898_vm7, %v5495_v62, %v9396_v30  ;;  %5526 = vst.msk [vmem:[#allocation2 + $0x2c] sm:$0xf] %vm860_vm0, %v5490_v46  ;;  %v5188_v61 = vshll.u32 %v9428_v43, 16  ;;  %6649 = vmatpush3.bf16.msra.mxu0 %v7004_v42 }
 0x691   : > { %v4906_v36 = vrot.slane %v4904_v16, 4  ;;  %v9446_v59 = vrot.slane %v5178_v11, 5  ;;  %5527 = vst.msk [vmem:[#allocation2 + $0x38] sm:$0xf] %vm860_vm0, %v5500_v47  ;;  %v5134_v40 = vmul.bf16 %v9266_v13, %v10042_v10  ;;  %v9455_v60 = vcombine.low %v9391_v20, %v9391_v20  ;;  %v7005_v16 = vld [vmem:[%s9914_s23 + $0x68] sm:$0xff]  }
 0x692   : > { %v5184_v31 = vrot.slane %v5182_v39, 4  ;;  %v4886_v23 = vrot.slane %v4884_v52, 4  ;;  %v9464_v48 = vrot.slane %v4910_v17, 5  ;;  %v9466_v21 = vrot.slane %v5188_v61, 5  ;;  %6650 = vmatprep.subr.bf16.mxu0 %v7005_v16 }
 0x693   : > { %v4907_v27 = vor.u32 %v4906_v36, %v9439_v41  ;;  %v6360_v44 = vcombine.low %v5134_v40, %v5134_v40  ;;  %v6361_v18 = vcombine.high %v5134_v40, %v5134_v40  ;;  %v5028_v6 = vrot.slane %v9410_v45, 4  ;;  %v7006_v45 = vld [vmem:[%s9914_s23 + $0x28] sm:$0xff]  }
 0x694   : > { %v5185_v30 = vor.u32 %v5184_v31, %v9446_v59  ;;  %v5033_v62 = vshll.u32 %v9290_v29, 16  ;;  %v6344_v52 = vcombine.high %v9284_v28, %v9284_v28  ;;  %v4887_v28 = vor.u32 %v4886_v23, %v9316_v7  ;;  %6651 = vmatpush3.bf16.msra.mxu0 %v7006_v45 }
 0x695   : > { %v4908_v13 = vrot.slane %v4907_v27, 4  ;;  %v5159_v51 = vshrl.u32 %v6360_v44, 16  ;;  %v5162_v2 = vshll.u32 %v6360_v44, 16  ;;  %v5168_v19 = vshll.u32 %v6361_v18, 16 }
 0x696   : > { %v5186_v22 = vrot.slane %v5185_v30, 4  ;;  %v5172_v17 = vshrl.u32 %v6361_v18, 16  ;;  %v4714_v39 = vmul.bf16 %v9365_v8, %v7818_v9  ;;  %v9491_v36 = vcombine.high %v9391_v20, %v9391_v20  ;;  %v7007_v9 = vld [vmem:[%s9914_s23 + $0x60] sm:$0xff]  }
 0x697   : > { %v4913_v24 = vsel %vm7898_vm7, %v4908_v13, %v9464_v48  ;;  %v5161_v46 = vrot.slane %v5159_v51, 4  ;;  %v5164_v29 = vrot.slane %v5162_v2, 5  ;;  %v6998_v47 = vld [vmem:[#allocation2 + $0x20] ss:$12 sps:$4 sm:$0xff]   ;;  %v5035_v31 = vor.u32 %v5033_v62, %v9306_v14  ;;  %6652 = vmatprep.subr.bf16.mxu0 %v7007_v9 }
 0x698   : > { %4960 = vrot.lane.b32.xlu0 %v4913_v24, %s10029_s5  ;;  %v5191_v11 = vsel %vm7898_vm7, %v5186_v22, %v9466_v21  ;;  %v6999_v10 = vld [vmem:[#allocation2 + $0x38] ss:$12 sps:$4 sm:$0xff]   ;;  %v9496_v40 = vmul.bf16 %v9365_v8, %v7829_v5  ;;  %v4751_v7 = vshrl.u32 %v9455_v60, 16  ;;  %v9504_v27 = vcombine.high %v9278_v33, %v9278_v33  ;;  %6769 = vmatmul.mubr.msk.bf16.vlgmr.msra.gmra.mxu1 %vm2511_vm9, %v6998_v47  ;;  %v7011_v47 = vld [vmem:[%s9914_s23 + $0x50] sm:$0xff]  }
 0x699   : > { %5241 = vrot.lane.b32.xlu1 %v5191_v11, %s9951_s8  ;;  %v5165_v61 = vor.u32 %v5164_v29, %v5161_v46  ;;  %v4890_v20 = vshll.u32 %v6344_v52, 16  ;;  %v4894_v30 = vshrl.u32 %v6344_v52, 16  ;;  %v5170_v44 = vrot.slane %v5168_v19, 5  ;;  %6772 = vmatprep.mubr.msk.bf16.mxu1 %vm2511_vm9, %v6999_v10  ;;  %v7010_v46 = vld [vmem:[%s9914_s23 + $0x18] sm:$0xff]  }
 0x69a   : > { %v5036_v5 = vsel %vm7955_vm11, %v5028_v6, %v5035_v31  ;;  %v5174_v18 = vrot.slane %v5172_v17, 4  ;;  %v4888_v33 = vrot.slane %v4887_v28, 4  ;;  %v9513_v42 = vcombine.low %v4714_v39, %v4714_v39  ;;  %v7009_v6 = vld [vmem:[%s9914_s23 + $0x58] sm:$0xff]   ;;  %6653 = vmatpush3.bf16.msra.mxu0 %v7008_v12 }
 0x69b   : > { %v5166_v14 = vrot.slane %v5165_v61, 4  ;;  %v4713_v23 = vmul.bf16 %v9374_v58, %v7839_v4  ;;  %v4754_v13 = vshll.u32 %v9455_v60, 16  ;;  %v6367_v51 = vcombine.high %v9496_v40, %v9496_v40  ;;  %v7000_v39 = vld [vmem:[#allocation2 + $0x50] ss:$12 sps:$4 sm:$0xff]   ;;  %6654 = vmatprep.subr.bf16.mxu0 %v7009_v6 }
 0x69c   : > { %v9525_v2 = vmul.bf16 %v9374_v58, %v7826_v63  ;;  %v4760_v24 = vshrl.u32 %v9491_v36, 16  ;;  %v4892_v19 = vrot.slane %v4890_v20, 5  ;;  %v4896_v62 = vrot.slane %v4894_v30, 4 }
 0x69d   : > { %5086 = vrot.lane.b32.xlu1 %v5036_v5, %s10028_s4  ;;  %v5171_v22 = vsel %vm7898_vm7, %v5166_v14, %v5170_v44  ;;  %v5273_v52 = vmul.bf16 %v9374_v58, %v7816_v57  ;;  %v9534_v16 = vrot.slane %v4751_v7, 7  ;;  %v4763_v45 = vshll.u32 %v9491_v36, 16 }
 0x69e   : > { %5237 = vrot.lane.b32.xlu0 %v5171_v22, %s9951_s8  ;;  %v4742_v63 = vshrl.u32 %v9504_v27, 16  ;;  %v5175_v11 = vor.u32 %v5174_v18, %v5170_v44  ;;  %v4787_v29 = vshrl.u32 %v9513_v42, 16  ;;  %v9542_v17 = vcombine.low %v4713_v23, %v4713_v23  ;;  %6655 = vmatpush3.bf16.msra.mxu0 %v7010_v46 }
 0x69f   : > { %v4893_v28 = vsel %vm7898_vm7, %v4888_v33, %v4892_v19  ;;  %v5274_v57 = vmul.bf16 %v9365_v8, %v7839_v4  ;;  %v5228_v61 = vshll.u32 %v6367_v51, 16  ;;  %v5232_v31 = vshrl.u32 %v6367_v51, 16  ;;  %6656 = vmatprep.subr.bf16.mxu0 %v7011_v47 }
 0x6a0   : > { %v6364_v10 = vcombine.low %v9525_v2, %v9525_v2  ;;  %v5192_v9 = vshrl.u32 %v9428_v43, 16  ;;  %v9556_v7 = vrot.slane %v4760_v24, 7  ;;  %v4745_v20 = vshll.u32 %v9504_v27, 16  ;;  %6773 = vmatmul.mubr.msk.bf16.gmra.mxu1 %vm2511_vm9, %v7000_v39  ;;  %v7012_v43 = vld [vmem:[%s9914_s23 + $0x10] sm:$0xff]   ;;  %v7014_v39 = vld [vmem:[%s9914_s23 + $0x8] sm:$0xff]  }
 0x6a1   : > { %5407 = vrot.lane.b32.xlu1 %v9342_v0, %s10028_s4  ;;  %v4897_v4 = vor.u32 %v4896_v62, %v4892_v19  ;;  %v9560_v30 = vcombine.high %v5273_v52, %v5273_v52  ;;  %v9563_v14 = vrot.slane %v4742_v63, 7  ;;  %v4790_v44 = vshll.u32 %v9513_v42, 16  ;;  %v7013_v19 = vld [vmem:[%s9914_s23 + $0x48] sm:$0xff]  }
 0x6a2   : > { %4956 = vrot.lane.b32.xlu0 %v4893_v28, %s10029_s5  ;;  %v5176_v5 = vrot.slane %v5175_v11, 4  ;;  %v4990_v18 = vmul.bf16 %v9374_v58, %v7842_v26  ;;  %v4789_v12 = vrot.slane %v4787_v29, 7  ;;  %v9571_v33 = vcombine.high %v4713_v23, %v4713_v23  ;;  %6657 = vmatpush3.bf16.msra.mxu0 %v7012_v43 }
 0x6a3   : > { %v4769_v22 = vshrl.u32 %v9542_v17, 16  ;;  %v6374_v51 = vcombine.low %v5274_v57, %v5274_v57  ;;  %v9576_v42 = vrot.slane %v5228_v61, 5  ;;  %v5234_v6 = vrot.slane %v5232_v31, 4  ;;  %6658 = vmatprep.subr.bf16.mxu0 %v7013_v19 }
 0x6a4   : > { %v5194_v24 = vrot.slane %v5192_v9, 4  ;;  %v5198_v26 = vshll.u32 %v6364_v10, 16  ;;  %v4898_v23 = vrot.slane %v4897_v4, 4  ;;  %v5337_v62 = vshrl.u32 %v9560_v30, 16  ;;  %v7015_v9 = vld [vmem:[%s9914_s23 + $0x40] sm:$0xff]  }
 0x6a5   : > { %4840 = vrot.lane.b32.xlu1 %v9342_v0, %s9951_s8  ;;  %v9586_v0 = vmul.bf16 %v9374_v58, %v7766_v3  ;;  %v4914_v63 = vshrl.u32 %v9426_v50, 16  ;;  %v5181_v11 = vsel %vm7898_vm7, %v5176_v5, %v9446_v59  ;;  %v9592_v46 = vcombine.low %v4990_v18, %v4990_v18 }
 0x6a6   : > { %5403 = vrot.lane.b32.xlu0 %v9355_v35, %s10028_s4  ;;  %v6356_v29 = vcombine.high %v4990_v18, %v4990_v18  ;;  %v6372_v28 = vcombine.low %v5273_v52, %v5273_v52  ;;  %v9597_v47 = vor.u32 %v4790_v44, %v4789_v12  ;;  %v4772_v3 = vshll.u32 %v9542_v17, 16  ;;  %6659 = vmatpush3.bf16.msra.mxu0 %v7014_v39 }
 0x6a7   : > { %v5346_v58 = vshrl.u32 %v6374_v51, 16  ;;  %v5202_v50 = vshrl.u32 %v6364_v10, 16  ;;  %v4778_v59 = vshrl.u32 %v9571_v33, 16  ;;  %v5235_v61 = vor.u32 %v5234_v6, %v9576_v42  ;;  %6660 = vmatprep.subr.bf16.mxu0 %v7015_v9 }
 0x6a8   : > { %v5195_v52 = vor.u32 %v5194_v24, %v9466_v21  ;;  %v6375_v31 = vcombine.high %v5274_v57, %v5274_v57  ;;  %v5200_v4 = vrot.slane %v5198_v26, 5  ;;  %v9609_v44 = vrot.slane %v5337_v62, 7 }
 0x6a9   : > { %5239 = vrot.lane.b32.xlu1 %v5181_v11, %s9951_s8  ;;  %v6347_v10 = vcombine.low %v9586_v0, %v9586_v0  ;;  %v4916_v5 = vrot.slane %v4914_v63, 4  ;;  %v4903_v18 = vsel %vm7898_vm7, %v4898_v23, %v9439_v41  ;;  %v5048_v21 = vshrl.u32 %v9592_v46, 16 }
 0x6aa   : > { %4836 = vrot.lane.b32.xlu0 %v9355_v35, %s9951_s8  ;;  %v5057_v57 = vshrl.u32 %v6356_v29, 16  ;;  %v5328_v43 = vshrl.u32 %v6372_v28, 16  ;;  %v7016_v35 = vld [vmem:[%s9914_s23] sm:$0xff]   ;;  %v9620_v12 = vrot.slane %v4769_v22, 7  ;;  %v5348_v24 = vrot.slane %v5346_v58, 7 }
 0x6ab   : > { %v5204_v26 = vrot.slane %v5202_v50, 4  ;;  %v5236_v19 = vrot.slane %v5235_v61, 4  ;;  %v5196_v41 = vrot.slane %v5195_v52, 4  ;;  %v5349_v23 = vshll.u32 %v6374_v51, 16  ;;  %6661 = vmatpush3.bf16.msra.mxu0 %v7016_v35 }
 0x6ac   : > { %v5355_v62 = vshrl.u32 %v6375_v31, 16  ;;  %v5344_v63 = vrot.slane %v9609_v44, 4  ;;  %v4917_v11 = vor.u32 %v4916_v5, %v9464_v48  ;;  %v4920_v22 = vshll.u32 %v6347_v10, 16 }
 0x6ad   : > { %4958 = vrot.lane.b32.xlu1 %v4903_v18, %s10029_s5  ;;  %v9630_v39 = vcombine.high %v9525_v2, %v9525_v2  ;;  %v5201_v58 = vsel %vm7898_vm7, %v5196_v41, %v5200_v4  ;;  %v9634_v50 = vrot.slane %v5048_v21, 7  ;;  %v9636_v61 = vrot.slane %v5057_v57, 7 }
 0x6ae   : > { %5405 = vrot.lane.b32.xlu0 %v9376_v34, %s10028_s4  ;;  %v9638_v51 = vrot.slane %v5328_v43, 7  ;;  %v5351_v52 = vor.u32 %v5349_v23, %v5348_v24  ;;  %v5060_v9 = vshll.u32 %v6356_v29, 16  ;;  %v5326_v48 = vrot.slane %v9340_v55, 4 }
 0x6af   : > { %v5205_v5 = vor.u32 %v5204_v26, %v5200_v4  ;;  %v5331_v18 = vshll.u32 %v6372_v28, 16  ;;  %v9642_v2 = vrot.slane %v5355_v62, 7  ;;  %v4924_v6 = vshrl.u32 %v6347_v10, 16 }
 0x6b0   : > { %v6366_v21 = vcombine.low %v9496_v40, %v9496_v40  ;;  %v5352_v57 = vsel %vm7955_vm11, %v5344_v63, %v5351_v52  ;;  %v4918_v43 = vrot.slane %v4917_v11, 4  ;;  %v4922_v35 = vrot.slane %v4920_v22, 5 }
 0x6b1   : > { %5251 = vrot.lane.b32.xlu1 %v5236_v19, %s9951_s8  ;;  %v5208_v29 = vshll.u32 %v9630_v39, 16  ;;  %v5055_v55 = vrot.slane %v9634_v50, 4  ;;  %v5062_v28 = vor.u32 %v5060_v9, %v9636_v61  ;;  %v5333_v4 = vor.u32 %v5331_v18, %v9638_v51 }
 0x6b2   : > { %4838 = vrot.lane.b32.xlu0 %v9376_v34, %s9951_s8  ;;  %v5358_v10 = vshll.u32 %v6375_v31, 16  ;;  %v5206_v40 = vrot.slane %v5205_v5, 4  ;;  %v5340_v26 = vshll.u32 %v9560_v30, 16  ;;  %v6348_v34 = vcombine.high %v9586_v0, %v9586_v0 }
 0x6b3   : > { %v9660_v19 = vmul.bf16 %v9365_v8, %v7870_v1  ;;  %v5353_v41 = vrot.slane %v5348_v24, 4  ;;  %v4926_v62 = vrot.slane %v4924_v6, 4  ;;  %v5218_v63 = vshll.u32 %v6366_v21, 16 }
 0x6b4   : > { %v5360_v23 = vor.u32 %v5358_v10, %v9642_v2  ;;  %v4780_v11 = vrot.slane %v4778_v59, 7  ;;  %v4923_v31 = vsel %vm7898_vm7, %v4918_v43, %v4922_v35  ;;  %v9666_v22 = vrot.slane %v5208_v29, 5 }
 0x6b5   : > { %5373 = vrot.lane.b32.xlu1 %v5352_v57, %s10029_s5  ;;  %v5222_v30 = vshrl.u32 %v6366_v21, 16  ;;  %v5063_v0 = vsel %vm7955_vm11, %v5055_v55, %v5062_v28  ;;  %v5334_v1 = vsel %vm7955_vm11, %v5326_v48, %v5333_v4  ;;  %v5335_v24 = vrot.slane %v9638_v51, 4 }
 0x6b6   : > { %5243 = vrot.lane.b32.xlu0 %v5201_v58, %s9951_s8  ;;  %v5342_v6 = vor.u32 %v5340_v26, %v9609_v44  ;;  %v5211_v59 = vsel %vm7898_vm7, %v5206_v40, %v9666_v22  ;;  %v5051_v58 = vshll.u32 %v9592_v46, 16  ;;  %v4930_v52 = vshll.u32 %v6348_v34, 16 }
 0x6b7   : > { %v6357_v9 = vcombine.low %v9660_v19, %v9660_v19  ;;  %v5361_v5 = vsel %vm7955_vm11, %v5353_v41, %v5360_v23  ;;  %v4927_v48 = vor.u32 %v4926_v62, %v4922_v35  ;;  %v9683_v18 = vrot.slane %v5218_v63, 5 }
 0x6b8   : > { %v9687_v44 = vmul.bf16 %v9365_v8, %v7745_v54  ;;  %v5224_v51 = vrot.slane %v5222_v30, 4  ;;  %v5212_v21 = vshrl.u32 %v9630_v39, 16  ;;  %v4749_v46 = vrot.slane %v9563_v14, 4 }
 0x6b9   : > { %5092 = vrot.lane.b32.xlu1 %v5063_v0, %s10028_s4  ;;  %v4756_v57 = vor.u32 %v4754_v13, %v9534_v16  ;;  %v4934_v43 = vshrl.u32 %v6348_v34, 16  ;;  %v4758_v35 = vrot.slane %v9534_v16, 4  ;;  %v4765_v29 = vor.u32 %v4763_v45, %v9556_v7 }
 0x6ba   : > { %4962 = vrot.lane.b32.xlu0 %v4923_v31, %s10029_s5  ;;  %v4740_v54 = vrot.slane %v9300_v32, 4  ;;  %v5066_v8 = vshrl.u32 %v6357_v9, 16  ;;  %v4747_v60 = vor.u32 %v4745_v20, %v9563_v14  ;;  %v4785_v13 = vrot.slane %v4780_v11, 4 }
 0x6bb   : > { %v4757_v39 = vsel %vm7955_vm11, %v4749_v46, %v4756_v57  ;;  %v6349_v16 = vcombine.low %v9687_v44, %v9687_v44  ;;  %v4766_v36 = vsel %vm7955_vm11, %v4758_v35, %v4765_v29  ;;  %v4767_v32 = vrot.slane %v9556_v7, 4 }
 0x6bc   : > { %4805 = vst.msk [vmem:[#allocation2 + $0x24] sm:$0xf] %vm860_vm0, %v4757_v39  ;;  %v4774_v45 = vor.u32 %v4772_v3, %v9620_v12  ;;  %v4932_v55 = vrot.slane %v4930_v52, 5  ;;  %4806 = vst.msk [vmem:[#allocation2 + $0x30] sm:$0xf] %vm860_vm0, %v4766_v36  ;;  %v4748_v27 = vsel %vm7955_vm11, %v4740_v54, %v4747_v60  ;;  %v4793_v20 = vsel %vm7955_vm11, %v4785_v13, %v9597_v47 }
 0x6bd   : > { %5245 = vrot.lane.b32.xlu1 %v5211_v59, %s9951_s8  ;;  %v4776_v14 = vrot.slane %v9620_v12, 4  ;;  %v4928_v28 = vrot.slane %v4927_v48, 4  ;;  %v4936_v7 = vrot.slane %v4934_v43, 4  ;;  %4804 = vst.msk [vmem:[#allocation2 + $0x18] sm:$0xf] %vm860_vm0, %v4748_v27  ;;  %v10043_v3 = vshll.u32 %v9571_v33, 16 }
 0x6be   : > { %5369 = vrot.lane.b32.xlu0 %v5334_v1, %s10029_s5  ;;  %4809 = vst.msk [vmem:[#allocation2 + $0x54] sm:$0xf] %vm860_vm0, %v4793_v20  ;;  %v4775_v17 = vsel %vm7955_vm11, %v4767_v32, %v4774_v45  ;;  %v5343_v10 = vsel %vm7955_vm11, %v5335_v24, %v5342_v6  ;;  %v5053_v47 = vor.u32 %v5051_v58, %v9634_v50  ;;  %v5214_v40 = vrot.slane %v5212_v21, 4 }
 0x6bf   : > { %v4783_v4 = vor.u32 %v10043_v3, %v4780_v11  ;;  %v5225_v12 = vor.u32 %v5224_v51, %v9683_v18  ;;  %4807 = vst.msk [vmem:[#allocation2 + $0x3c] sm:$0xf] %vm860_vm0, %v4775_v17  ;;  %v5068_v26 = vrot.slane %v5066_v8, 7  ;;  %v4940_v34 = vshll.u32 %v6349_v16, 16 }
 0x6c0   : > { %v4944_v41 = vshrl.u32 %v6349_v16, 16  ;;  %v5046_v33 = vrot.slane %v9329_v37, 4  ;;  %v4933_v50 = vsel %vm7898_vm7, %v4928_v28, %v4932_v55  ;;  %v5064_v62 = vrot.slane %v9636_v61, 4 }
 0x6c1   : > { %5375 = vrot.lane.b32.xlu1 %v5361_v5, %s10029_s5  ;;  %v4784_v23 = vsel %vm7955_vm11, %v4776_v14, %v4783_v4  ;;  %v5069_v63 = vshll.u32 %v6357_v9, 16  ;;  %v4937_v11 = vor.u32 %v4936_v7, %v4932_v55  ;;  %v5226_v30 = vrot.slane %v5225_v12, 4 }
 0x6c2   : > { %5371 = vrot.lane.b32.xlu0 %v5343_v10, %s10029_s5  ;;  %4808 = vst.msk [vmem:[#allocation2 + $0x48] sm:$0xf] %vm860_vm0, %v4784_v23  ;;  %v5054_v31 = vsel %vm7955_vm11, %v5046_v33, %v5053_v47  ;;  %v5215_v1 = vor.u32 %v5214_v40, %v9666_v22  ;;  %v4942_v24 = vrot.slane %v4940_v34, 5  ;;  %v4946_v37 = vrot.slane %v4944_v41, 4  ;;  %v5268_v41 = vld [vmem:[#allocation2 + $0x58] sm:$0xf] }
 0x6c3   : > { %v5071_v0 = vor.u32 %v5069_v63, %v5068_v26  ;;  %v4938_v59 = vrot.slane %v4937_v11, 4  ;;  %v6350_v61 = vcombine.high %v9687_v44, %v9687_v44  ;;  %v5231_v58 = vsel %vm7898_vm7, %v5226_v30, %v9576_v42 }
 0x6c4   : > { %v5216_v52 = vrot.slane %v5215_v1, 4  ;;  %v4947_v9 = vor.u32 %v4946_v37, %v4942_v24  ;;  %v6358_v22 = vcombine.high %v9660_v19, %v9660_v19  ;;  %v5362_v29 = vrot.slane %v9642_v2, 4  ;;  %v4978_v2 = vld [vmem:[#allocation2] sm:$0x8] }
 0x6c5   : > { %4964 = vrot.lane.b32.xlu1 %v4933_v50, %s10029_s5  ;;  %v5072_v6 = vsel %vm7955_vm11, %v5064_v62, %v5071_v0  ;;  %v4943_v5 = vsel %vm7898_vm7, %v4938_v59, %v4942_v24  ;;  %v4950_v48 = vshll.u32 %v6350_v61, 16  ;;  %v5073_v54 = vrot.slane %v5068_v26, 4 }
 0x6c6   : > { %5090 = vrot.lane.b32.xlu0 %v5054_v31, %s10028_s4  ;;  %v5221_v44 = vsel %vm7898_vm7, %v5216_v52, %v9683_v18  ;;  %v4948_v51 = vrot.slane %v4947_v9, 4  ;;  %v5075_v21 = vshrl.u32 %v6358_v22, 16  ;;  %v5078_v35 = vshll.u32 %v6358_v22, 16 }
 0x6c7   : > { %v4952_v42 = vrot.slane %v4950_v48, 5 }
 0x6c8   : > { %v5077_v57 = vrot.slane %v5075_v21, 7 }
 0x6c9   : > { %5094 = vrot.lane.b32.xlu1 %v5072_v6, %s10028_s4  ;;  %v4953_v19 = vsel %vm7898_vm7, %v4948_v51, %v4952_v42 }
 0x6ca   : > { %5249 = vrot.lane.b32.xlu0 %v5231_v58, %s9951_s8  ;;  %v5080_v8 = vor.u32 %v5078_v35, %v5077_v57 }
 0x6cc   : > { %v5081_v15 = vsel %vm7955_vm11, %v5073_v54, %v5080_v8 }
 0x6cd   : > { %4966 = vrot.lane.b32.xlu1 %v4943_v5, %s10029_s5 }
 0x6ce   : > { %5247 = vrot.lane.b32.xlu0 %v5221_v44, %s9951_s8 }
 0x6d1   : > { %5409 = vrot.lane.b32.xlu1 %v9367_v53, %s10028_s4 }
 0x6d2   : > { %4968 = vrot.lane.b32.xlu0 %v4953_v19, %s10029_s5 }
 0x6d4   : > { %v5400_v46 = vpop.permute.xlu0 %5399 }
 0x6d6   : > { %v4829_v43 = vpop.permute.xlu1 %4828  ;;  %5377 = vrot.lane.b32.xlu0 %v5362_v29, %s10029_s5  ;;  %s7213_s5 = scalar_lea.vmem %s9846_s29, 4096 }
 0x6d7   : > { %4849 = vst.msk [vmem:[#allocation2 + $0xc] sm:$0xf] %vm1513_vm14, %v4829_v43  ;;  %p7214_p13 = scmp.ne.s32.totalorder %s9846_s29, %s7213_s5 }
 0x6d8   : > { %v4833_v18 = vpop.permute.xlu0 %4832 }
 0x6d9   : > { %4851 = vst.msk [vmem:[#allocation2 + $0x24] sm:$0xf] %vm1513_vm14, %v4833_v18  ;;  %p7215_p5 = pnand %p7214_p13, %p10048_p2 }
 0x6da   : > { %v5402_v39 = vpop.permute.xlu1 %5401  ;;  %5096 = vrot.lane.b32.xlu0 %v5081_v15, %s10028_s4 }
 0x6db   : > { %p7216_p8 = pneg %p7215_p5 }
 0x6de   : > { %v4835_v53 = vpop.permute.xlu1 %4834 }
 0x6df   : > { %4852 = vst.msk [vmem:[#allocation2 + $0x30] sm:$0xf] %vm1513_vm14, %v4835_v53 }
 0x6e2   : > { %v5398_v60 = vpop.permute.xlu1 %5397 }
 0x6e3   : > { %v4955_v16 = vpop.permute.xlu0 %4954 }
 0x6e4   : > { %v4979_v36 = vsel %vm8273_vm2, %v4955_v16, %v4978_v2 }
 0x6e5   : > { %4980 = vst [vmem:[#allocation2] sm:$0x8] %v4979_v36 }
 0x6e6   : > { %v4831_v13 = vpop.permute.xlu1 %4830 }
 0x6e7   : > { %4850 = vst.msk [vmem:[#allocation2 + $0x18] sm:$0xf] %vm1513_vm14, %v4831_v13 }
 0x6ea   : > { %v5089_v27 = vpop.permute.xlu0 %5088 }
 0x6ec   : > { %v5106_v55 = vld [vmem:[#allocation2] sm:$0xf] }
 0x6f0   : > { %v5368_v32 = vpop.permute.xlu1 %5367 }
 0x6f4   : > { %v5083_v45 = vpop.permute.xlu1 %5082 }
 0x6f5   : > { %v5107_v49 = vsel %vm8287_vm6, %v5083_v45, %v5106_v55 }
 0x6f6   : > { %5108 = vst [vmem:[#allocation2] sm:$0xf] %v5107_v49 }
 0x6f8   : > { %v5364_v20 = vpop.permute.xlu0 %5363 }
 0x700   : > { %v5366_v28 = vpop.permute.xlu1 %5365 }
 0x701   : > { %v5085_v14 = vpop.permute.xlu0 %5084 }
 0x70a   : > { %v4961_v7 = vpop.permute.xlu0 %4960 }
 0x70b   : > { %4983 = vst.msk [vmem:[#allocation2 + $0x24] sm:$0xf] %vm1691_vm8, %v4961_v7  ;;  %v5242_v17 = vpop.permute.xlu1 %5241 }
 0x70c   : > { %5111 = vst.msk [vmem:[#allocation2 + $0x24] sm:$0xf] %vm1833_vm5, %v5089_v27 }
 0x70d   : > { %5263 = vst.msk [vmem:[#allocation2 + $0x1c] sm:$0xf] %vm1513_vm14, %v5242_v17 }
 0x70e   : > { %5389 = vst.msk [vmem:[#allocation2 + $0x1c] sm:$0xf] %vm1691_vm8, %v5368_v32 }
 0x70f   : > { %5420 = vst.msk [vmem:[#allocation2 + $0x1c] sm:$0xf] %vm1833_vm5, %v5402_v39  ;;  %v5087_v56 = vpop.permute.xlu1 %5086  ;;  %v6384_v39 = vld [vmem:[%s10045_s6] ss:$0 sm:$0xff]  ;;  %s7217_s6 = sshll.u32 %s7305_s26, 4  ;;  %s7218_s6 = int_to_ptr.vmem [resolvable:$false] %s7217_s6 }
 0x710   : > { %v5238_v38 = vpop.permute.xlu0 %5237  ;;  %s7219_s8 = scalar_lea.vmem %s7218_s6, 8192  ;;  %p7220_p7 = scmp.lt.s32.totalorder %s9846_s29, %s7218_s6 }
 0x711   : > { %5261 = vst.msk [vmem:[#allocation2 + $0x4] sm:$0xf] %vm1513_vm14, %v5238_v38  ;;  %p7221_p11 = scmp.lt.s32.totalorder %s7219_s8, %s7213_s5 }
 0x712   : > { %5387 = vst.msk [vmem:[#allocation2 + $0x4] sm:$0xf] %vm1691_vm8, %v5364_v20 }
 0x713   : > { %v9791_v3 = vpop.permute.xlu1 %5407  ;;  %5418 = vst.msk [vmem:[#allocation2 + $0x4] sm:$0xf] %vm1833_vm5, %v5398_v60  ;;  %p7222_p10 = por %p7221_p11, %p7220_p7 }
 0x714   : > { %v4957_v4 = vpop.permute.xlu0 %4956 }
 0x715   : > { %4981 = vst.msk [vmem:[#allocation2 + $0xc] sm:$0xf] %vm1691_vm8, %v4957_v4  ;;  %p7223_p3 = pnand %p7222_p10, %p7216_p8 }
 0x716   : > { %5109 = vst.msk [vmem:[#allocation2 + $0xc] sm:$0xf] %vm1833_vm5, %v5085_v14 }
 0x717   : > { %v4841_v10 = vpop.permute.xlu1 %4840 }
 0x718   : > { %4855 = vst.msk [vmem:[#allocation2 + $0x54] sm:$0xf] %vm1513_vm14, %v4841_v10  ;;  %v5404_v47 = vpop.permute.xlu0 %5403 }
 0x71b   : > { %v5240_v12 = vpop.permute.xlu1 %5239 }
 0x71c   : > { %5262 = vst.msk [vmem:[#allocation2 + $0x10] sm:$0xf] %vm1513_vm14, %v5240_v12  ;;  %v4837_v40 = vpop.permute.xlu0 %4836 }
 0x71d   : > { %5388 = vst.msk [vmem:[#allocation2 + $0x10] sm:$0xf] %vm1691_vm8, %v5366_v28  ;;  %v7017_v62 = vld [vmem:[#allocation2] ss:$12 sps:$4 sm:$0xff]  }
 0x71e   : > { %4853 = vst.msk [vmem:[#allocation2 + $0x3c] sm:$0xf] %vm1513_vm14, %v4837_v40 }
 0x71f   : > { %5419 = vst.msk [vmem:[#allocation2 + $0x10] sm:$0xf] %vm1833_vm5, %v5400_v46  ;;  %v4959_v26 = vpop.permute.xlu1 %4958 }
 0x720   : > { %4982 = vst.msk [vmem:[#allocation2 + $0x18] sm:$0xf] %vm1691_vm8, %v4959_v26  ;;  %v5406_v34 = vpop.permute.xlu0 %5405 }
 0x721   : > { %5110 = vst.msk [vmem:[#allocation2 + $0x18] sm:$0xf] %vm1833_vm5, %v5087_v56 }
 0x723   : > { %v5252_v23 = vpop.permute.xlu1 %5251 }
 0x724   : > { %v5269_v33 = vsel %vm8312_vm12, %v5252_v23, %v5268_v41  ;;  %v4839_v50 = vpop.permute.xlu0 %4838 }
 0x725   : > { %5270 = vst [vmem:[#allocation2 + $0x58] sm:$0xf] %v5269_v33  ;;  %4854 = vst.msk [vmem:[#allocation2 + $0x48] sm:$0xf] %vm1513_vm14, %v4839_v50 }
 0x726   : > { %v7019_v63 = vld [vmem:[#allocation2 + $0x4] ss:$12 sps:$4 sm:$0xff]  }
 0x727   : > { %v5374_v11 = vpop.permute.xlu1 %5373  ;;  %5803 = vmatprep.mubr.bf16.mxu0 %v7019_v63 }
 0x728   : > { %5804 = vmatmul.mubr.bf16.vlgmr.msra.gmra.mxu0 %v7017_v62  ;;  %v5244_v31 = vpop.permute.xlu0 %5243  ;;  %v7022_v58 = vld [vmem:[#allocation2 + $0x18] ss:$12 sps:$4 sm:$0xff]  }
 0x729   : > { %5264 = vst.msk [vmem:[#allocation2 + $0x28] sm:$0xf] %vm1513_vm14, %v5244_v31 }
 0x72b   : > { %v5093_v30 = vpop.permute.xlu1 %5092 }
 0x72c   : > { %v4963_v0 = vpop.permute.xlu0 %4962  ;;  %v5394_v51 = vld [vmem:[#allocation2 + $0x58] sm:$0x1] }
 0x72d   : > { %4984 = vst.msk [vmem:[#allocation2 + $0x30] sm:$0xf] %vm1691_vm8, %v4963_v0 }
 0x72f   : > { %v5246_v1 = vpop.permute.xlu1 %5245 }
 0x730   : > { %5265 = vst.msk [vmem:[#allocation2 + $0x34] sm:$0xf] %vm1513_vm14, %v5246_v1  ;;  %v5370_v25 = vpop.permute.xlu0 %5369 }
 0x731   : > { %5390 = vst.msk [vmem:[#allocation2 + $0x28] sm:$0xf] %vm1691_vm8, %v5370_v25 }
 0x732   : > { %5421 = vst.msk [vmem:[#allocation2 + $0x28] sm:$0xf] %vm1833_vm5, %v5404_v47 }
 0x733   : > { %v5376_v24 = vpop.permute.xlu1 %5375 }
 0x734   : > { %v5372_v37 = vpop.permute.xlu0 %5371 }
 0x735   : > { %5391 = vst.msk [vmem:[#allocation2 + $0x34] sm:$0xf] %vm1691_vm8, %v5372_v37 }
 0x736   : > { %5422 = vst.msk [vmem:[#allocation2 + $0x34] sm:$0xf] %vm1833_vm5, %v5406_v34 }
 0x737   : > { %v4965_v6 = vpop.permute.xlu1 %4964 }
 0x738   : > { %4985 = vst.msk [vmem:[#allocation2 + $0x3c] sm:$0xf] %vm1691_vm8, %v4965_v6  ;;  %v5091_v59 = vpop.permute.xlu0 %5090 }
 0x739   : > { %5113 = vst.msk [vmem:[#allocation2 + $0x3c] sm:$0xf] %vm1833_vm5, %v5093_v30  ;;  %5112 = vst.msk [vmem:[#allocation2 + $0x30] sm:$0xf] %vm1833_vm5, %v5091_v59  ;;  %v7020_v61 = vld [vmem:[#allocation2 + $0x1c] ss:$12 sps:$4 sm:$0xff]  }
 0x73a   : > { %5811 = vmatprep.mubr.bf16.mxu0 %v7020_v61 }
 0x73b   : > { %v5095_v52 = vpop.permute.xlu1 %5094  ;;  %5812 = vmatmul.mubr.bf16.gmra.mxu0 %v7022_v58 }
 0x73c   : > { %v5250_v9 = vpop.permute.xlu0 %5249 }
 0x73d   : > { %5267 = vst.msk [vmem:[#allocation2 + $0x4c] sm:$0xf] %vm1513_vm14, %v5250_v9 }
 0x73e   : > { %5393 = vst.msk [vmem:[#allocation2 + $0x4c] sm:$0xf] %vm1691_vm8, %v5376_v24 }
 0x73f   : > { %v4967_v22 = vpop.permute.xlu1 %4966 }
 0x740   : > { %4986 = vst.msk [vmem:[#allocation2 + $0x48] sm:$0xf] %vm1691_vm8, %v4967_v22  ;;  %v5248_v5 = vpop.permute.xlu0 %5247  ;;  %v7025_v57 = vld [vmem:[#allocation2 + $0x30] ss:$12 sps:$4 sm:$0xff]  }
 0x741   : > { %5114 = vst.msk [vmem:[#allocation2 + $0x48] sm:$0xf] %vm1833_vm5, %v5095_v52 }
 0x742   : > { %5266 = vst.msk [vmem:[#allocation2 + $0x40] sm:$0xf] %vm1513_vm14, %v5248_v5 }
 0x743   : > { %5392 = vst.msk [vmem:[#allocation2 + $0x40] sm:$0xf] %vm1691_vm8, %v5374_v11  ;;  %v5410_v48 = vpop.permute.xlu1 %5409 }
 0x744   : > { %5423 = vst.msk [vmem:[#allocation2 + $0x40] sm:$0xf] %vm1833_vm5, %v9791_v3  ;;  %5424 = vst.msk [vmem:[#allocation2 + $0x4c] sm:$0xf] %vm1833_vm5, %v5410_v48  ;;  %v4969_v44 = vpop.permute.xlu0 %4968 }
 0x745   : > { %4987 = vst.msk [vmem:[#allocation2 + $0x54] sm:$0xf] %vm1691_vm8, %v4969_v44 }
 0x748   : > { %v5378_v21 = vpop.permute.xlu0 %5377 }
 0x749   : > { %v5395_v46 = vsel %vm8339_vm15, %v5378_v21, %v5394_v51 }
 0x74a   : > { %5396 = vst [vmem:[#allocation2 + $0x58] sm:$0x1] %v5395_v46 }
 0x74b   : > { %v7023_v19 = vld [vmem:[#allocation2 + $0x34] ss:$12 sps:$4 sm:$0xff]  }
 0x74c   : > { %v5097_v43 = vpop.permute.xlu0 %5096  ;;  %5819 = vmatprep.mubr.bf16.mxu0 %v7023_v19 }
 0x74d   : > { %5115 = vst.msk [vmem:[#allocation2 + $0x54] sm:$0xf] %vm1833_vm5, %v5097_v43  ;;  %5820 = vmatmul.mubr.bf16.gmra.mxu0 %v7025_v57 }
 0x751   : > { %v7026_v35 = vld [vmem:[#allocation2 + $0x4c] ss:$12 sps:$4 sm:$0xff]  }
 0x752   : > { %5827 = vmatprep.mubr.bf16.mxu0 %v7026_v35 }
 0x754   : > { %v7028_v18 = vld [vmem:[#allocation2 + $0x48] ss:$12 sps:$4 sm:$0xff]  }
 0x755   : > { %5828 = vmatmul.mubr.bf16.gmra.mxu0 %v7028_v18 }
 0x758   : > { %v6770_v29 = vpop.f32.mrf.mxu1 }
 0x75a   : > { %v5870_v8 = vpop.f32.mrf.mxu1 }
 0x75c   : > { %v6771_v2 = vpop.f32.mrf.mxu1 }
 0x75e   : > { %v5873_v55 = vpop.f32.mrf.mxu1 }
 0x760   : > { %v6774_v10 = vpop.f32.mrf.mxu1 }
 0x762   : > { %v5886_v12 = vpop.f32.mrf.mxu1 }
 0x764   : > { %v6775_v23 = vpop.f32.mrf.mxu1 }
 0x766   : > { %v5889_v11 = vpop.f32.mrf.mxu1 }
 0x7e8   : > { %v6662_v54 = vpop.f32.mrf.mxu0 }
 0x7ea   : > { %v6663_v15 = vpop.f32.mrf.mxu0 }
 0x7eb   : > { %v6664_v53 = vadd.f32 %v6663_v15, %v6662_v54 }
 0x7ec   : > { %v6665_v60 = vpop.f32.mrf.mxu0 }
 0x7ed   : > { %v5806_v13 = vadd.f32 %v6664_v53, %v6384_v39 }
 0x7ee   : > { %v6666_v16 = vpop.f32.mrf.mxu0 }
 0x7ef   : > { %v5871_v36 = vadd.f32 %v5870_v8, %v5806_v13  ;;  %v6667_v32 = vadd.f32 %v6666_v16, %v6665_v60 }
 0x7f1   : > { %5901 = vst [vmem:[%s7653_s30 + $0x18] sm:$0xff] %v5871_v36  ;;  %v5809_v45 = vadd.f32 %v6667_v32, %v6384_v39 }
 0x7f3   : > { %v5874_v49 = vadd.f32 %v5873_v55, %v5809_v45 }
 0x7f5   : > { %5902 = vst [vmem:[%s7653_s30 + $0x38] sm:$0xff] %v5874_v49 }
 0x7fb   : > { %v6668_v27 = vpop.f32.mrf.mxu0 }
 0x7fd   : > { %v6669_v20 = vpop.f32.mrf.mxu0 }
 0x7fe   : > { %v6670_v14 = vadd.f32 %v6669_v20, %v6668_v27 }
 0x7ff   : > { %v6671_v28 = vpop.f32.mrf.mxu0 }
 0x800   : > { %v5814_v7 = vadd.f32 %v6670_v14, %v6384_v39 }
 0x801   : > { %v6672_v17 = vpop.f32.mrf.mxu0 }
 0x802   : > { %v5879_v56 = vadd.f32 %v6770_v29, %v5814_v7  ;;  %v6673_v38 = vadd.f32 %v6672_v17, %v6671_v28 }
 0x804   : > { %5903 = vst [vmem:[%s7653_s30 + $0x58] sm:$0xff] %v5879_v56  ;;  %v5817_v3 = vadd.f32 %v6673_v38, %v6384_v39 }
 0x806   : > { %v5882_v4 = vadd.f32 %v6771_v2, %v5817_v3 }
 0x808   : > { %5904 = vst [vmem:[%s7653_s30 + $0x78] sm:$0xff] %v5882_v4 }
 0x80d   : > { %v6674_v47 = vpop.f32.mrf.mxu0 }
 0x80f   : > { %v6675_v40 = vpop.f32.mrf.mxu0 }
 0x810   : > { %v6676_v26 = vadd.f32 %v6675_v40, %v6674_v47 }
 0x811   : > { %v6677_v34 = vpop.f32.mrf.mxu0 }
 0x812   : > { %v5822_v41 = vadd.f32 %v6676_v26, %v6384_v39 }
 0x813   : > { %v6678_v33 = vpop.f32.mrf.mxu0 }
 0x814   : > { %v5887_v50 = vadd.f32 %v5886_v12, %v5822_v41  ;;  %v6679_v62 = vadd.f32 %v6678_v33, %v6677_v34 }
 0x815   : > { %v6680_v31 = vpop.f32.mrf.mxu0 }
 0x816   : > { %5905 = vst [vmem:[%s7653_s30 + $0x98] sm:$0xff] %v5887_v50  ;;  %v5825_v63 = vadd.f32 %v6679_v62, %v6384_v39 }
 0x817   : > { %v6681_v0 = vpop.f32.mrf.mxu0 }
 0x818   : > { %v5890_v30 = vadd.f32 %v5889_v11, %v5825_v63  ;;  %v6682_v1 = vadd.f32 %v6681_v0, %v6680_v31 }
 0x819   : > { %v6683_v25 = vpop.f32.mrf.mxu0 }
 0x81a   : > { %5906 = vst [vmem:[%s7653_s30 + $0xb8] sm:$0xff] %v5890_v30  ;;  %v5830_v24 = vadd.f32 %v6682_v1, %v6384_v39 }
 0x81b   : > { %v6684_v37 = vpop.f32.mrf.mxu0 }
 0x81c   : > { %v5895_v6 = vadd.f32 %v6774_v10, %v5830_v24  ;;  %v6685_v59 = vadd.f32 %v6684_v37, %v6683_v25 }
 0x81e   : > { %5907 = vst [vmem:[%s7653_s30 + $0xd8] sm:$0xff] %v5895_v6  ;;  %v5833_v61 = vadd.f32 %v6685_v59, %v6384_v39 }
 0x820   : > { %v5898_v58 = vadd.f32 %v6775_v23, %v5833_v61 }
 0x822   : > { %5908 = vst [vmem:[%s7653_s30 + $0xf8] sm:$0xff] %v5898_v58 }
 0x823   : > { %7226 = shalt.err (!%p7223_p3)
}
 0x824   : > { %s7227_s30 = scalar_lea.hbm %s9844_s7, 4096  ;;  %s7231_s0 = scalar_lea.hbm %s10047_s27, 8192 }
 0x825   : > { %p7228_p6 = scmp.ne.s32.totalorder %s9844_s7, %s7227_s30  ;;  %p7232_p9 = scmp.lt.s32.totalorder %s9844_s7, %s10047_s27 }
 0x826   : > { %p7233_p12 = scmp.lt.s32.totalorder %s7231_s0, %s7227_s30 }
 0x827   : > { %p7229_p4 = pnand %p7228_p6, %p10048_p2 }
 0x828   : > { %p7234_p0 = por %p7233_p12, %p7232_p9 }
 0x829   : > { %p7230_p1 = pneg %p7229_p4 }
 0x82b   : > { %p7235_p13 = pnand %p7234_p0, %p7230_p1 }
 0x82d   : > { %7238 = shalt.err (!%p7235_p13)
}
 0x82e   : > { %s7306_s8 = smov 512   ;;  %s10049_s5 = smov 32  }
 0x82f   : > { %s10050_s6 = scalar_lea.sflag [#allocation5], %s7617_s25 }
 0x830   : > { %6802 = dma.vmem_to_hbm [thread:$0]  (%p10048_p2), %s9846_s29, 4096, %s9844_s7, %s10050_s6, %s7306_s8, %s7306_s8, %s10049_s5  }
 0x831 PF: > { %s10051_s22 = sld [smem:[#allocation21_spill]] }
 0x832   : > { %s10052_s28 = sld [smem:[#allocation27_spill]] }
 0x833   : > { %s10053_s1 = sld [smem:[#allocation23_spill]] }
 0x837   : > { %s5938_s3 = sand.u32 1, %s10051_s22  }
 0x838   : > { %p10054_p5 = scmp.ne.s32.totalorder %s10052_s28, 0  ;;  %s5939_s4 = scalar_lea.sflag [#allocation5], %s5938_s3 }
 0x839   : > { %p10055_p8 = scmp.ge.s32.totalorder %s10053_s1, 2 }
 0x83b   : > { %p6828_p7 = pnand %p10055_p8, %p10054_p5 }
 0x83d   : > { %p6829_p11 = pneg %p6828_p7 }
 0x83f   : > { %7272 = dma.done.wait (%p6829_p11), %s5939_s4, 4096  }
 0x840   : > { %7274 = vsyncadd (%p6829_p11), %s5939_s4, 4294963200  ;;  %s10056_s30 = sld [smem:[#allocation24_spill]]  ;;  %s10059_s29 = smov %s7281_s2 }
 0x841   : > { %s10057_s9 = sld [smem:[#allocation22_spill]] }
 0x842   : > { %s10058_s6 = sld [smem:[#allocation25_spill]] }
 0x846   : > { %p41_p10 = scmp.ge.s32.totalorder %s10056_s30, 4  }
 0x847   : > { %s10060_s2 = smov %s10057_s9 }
 0x848   :  { %43 = sbr.rel (!%p41_p10) target bundleno = 22 (0x16), region = 189 }
 0x84d   :  { %5944 = vsyncpa [#allocation4], 1 }
 0x84e   :  { %5946 = vsyncpa [#allocation4 + $0x1], 1 }
 0x84f   :  { %5947 = vsyncpa [#allocation7], 1 }
 0x850   :  { %5948 = vsyncpa [#allocation10], 1 }
 0x851   :  { %5949 = vsyncpa [#allocation13], 1 }
 0x852   :  { %5950 = vsyncpa [#allocation5], 1 }
 0x853   :  { %5952 = vsyncpa [#allocation5 + $0x1], 1 }

</bundles_post_ra>
